<compile_context>
chip_gen: v6e
topology: v6e:2x2x1
jax: 0.10.0
libtpu: 0.0.40
codegen_flags: <defaults>
</compile_context>

<pallas_src>
import functools

import jax
import jax.numpy as jnp
from jax.experimental import pallas as pl
from jax.experimental.pallas import tpu as pltpu

EMB_DIM = 64            # embedding_dim (module default)
ATT_DIM = EMB_DIM // 2  # attention_size = emb_dim / 2
NUM_LOCAL = 10          # num_local (hard-coded in the module)


def _round_up(x, m):
    return ((x + m - 1) // m) * m


# ---------------------------------------------------------------------------
# One-time parameter preparation (hoisted out of the forward):
#   block-diagonal trans_W / WA / WB, tiled biases, head selectors and the
#   expander / reducer 0-1 matrices used to keep the weighted sum lane-dense.
# ---------------------------------------------------------------------------
def prepare_params(params):
    L, D, A = NUM_LOCAL, EMB_DIM, ATT_DIM
    eye_l = jnp.eye(L, dtype=jnp.float32)

    # trans_W (L,D,D) -> block diag (L*D, L*D): [l*D+d, m*D+e] = W[l,d,e]*(l==m)
    tw_bd = jnp.einsum("lde,lm->ldme", params["trans_W"].astype(jnp.float32),
                       eye_l).reshape(L * D, L * D)

    def att_bd(w):       # (D,A) -> (L*D, L*A) block diag (same block repeated)
        return jnp.einsum("da,lm->ldma", w.astype(jnp.float32),
                          eye_l).reshape(L * D, L * A)

    def head_sel(h):     # (A,1) -> (L*A, L): column l holds H in rows l*A:(l+1)*A
        return jnp.einsum("a,lm->lam", h[:, 0].astype(jnp.float32),
                          eye_l).reshape(L * A, L)

    expander = jnp.kron(eye_l, jnp.ones((1, D), jnp.float32))          # (L, L*D)
    reducer = jnp.tile(jnp.eye(D, dtype=jnp.float32), (L, 1))          # (L*D, D)

    return {
        "tw_bd": tw_bd.astype(jnp.bfloat16),
        "tb_flat": params["trans_B"].reshape(1, L * D).astype(jnp.float32),
        "wa_bd": att_bd(params["WA"]).astype(jnp.bfloat16),
        "ba_t": jnp.tile(params["BA"].reshape(1, A), (1, L)).astype(jnp.float32),
        "ha_sel": head_sel(params["HA"]),
        "wb_bd": att_bd(params["WB"]).astype(jnp.bfloat16),
        "bb_t": jnp.tile(params["BB"].reshape(1, A), (1, L)).astype(jnp.float32),
        "hb_sel": head_sel(params["HB"]),
        "expander": expander,
        "reducer": reducer,
    }


# ---------------------------------------------------------------------------
# Kernel 1: per-local transform + attention aggregation over the FULL table.
#   emb_ref : (TN, L*D) f32  rows of emb (users then items), lane-dense
#   tw_ref  : (L*D, L*D) bf16 block-diagonal trans_W
#   tb_ref  : (1, L*D)  f32   flattened trans_B
#   wa/wb   : (L*D, L*A) bf16 block-diagonal attention W (users / items)
#   ba/bb   : (1, L*A)  f32   tiled attention bias
#   hsa/hsb : (L*A, L)  f32   head selector (H per local column)
#   exp_ref : (L, L*D)  f32   0/1 expander  (w -> per-column weights)
#   red_ref : (L*D, D)  f32   0/1 reducer   (sum the L lane-groups)
#   out_ref : (TN, D)   f32   aggregated embedding
# ---------------------------------------------------------------------------
def _agg_kernel(emb_ref, tw_ref, tb_ref, wa_ref, ba_ref, hsa_ref,
                wb_ref, bb_ref, hsb_ref, exp_ref, red_ref, out_ref,
                *, num_users):
    i = pl.program_id(0)
    tn = emb_ref.shape[0]

    x = emb_ref[...]                                    # (TN, L*D) f32 from HBM
    xb = x.astype(jnp.bfloat16)                         # cast in VMEM only

    # per-local linear transform as one block-diagonal lane-dense matmul
    es = jnp.dot(xb, tw_ref[...], preferred_element_type=jnp.float32)
    es = es + tb_ref[...]                               # (TN, L*D) f32
    esb = es.astype(jnp.bfloat16)

    # attention logits for both weight sets (only the block straddling the
    # user/item boundary truly needs both; the extra small matmul elsewhere
    # is the price of a single pass over emb with no HBM slice copies)
    ha = jnp.maximum(
        jnp.dot(esb, wa_ref[...], preferred_element_type=jnp.float32)
        + ba_ref[...], 0.0)                             # (TN, L*A) f32
    hb = jnp.maximum(
        jnp.dot(esb, wb_ref[...], preferred_element_type=jnp.float32)
        + bb_ref[...], 0.0)
    la = jnp.dot(ha, hsa_ref[...], preferred_element_type=jnp.float32)  # (TN, L)
    lb = jnp.dot(hb, hsb_ref[...], preferred_element_type=jnp.float32)  # (TN, L)

    # per-row select: rows < num_users are users (WA/HA), the rest items.
    row = i * tn + jax.lax.broadcasted_iota(jnp.int32, (tn, 1), 0)
    logits = jnp.where(row < num_users, la, lb)         # (TN, L)

    # softmax over locals (max-subtracted: identical math, robust).  Tail-block
    # padding rows may hold garbage but every op here is row-local.
    logits = logits - jnp.max(logits, axis=-1, keepdims=True)
    w = jnp.exp(logits)
    w = w / jnp.sum(w, axis=-1, keepdims=True)          # (TN, L) f32

    # weighted sum over locals, fully lane-dense:
    #   w_exp[n, l*D+d] = w[n, l]            (w @ expander)
    #   out[n, d]       = sum_l (w_exp*es)[n, l*D+d]   ((w_exp*es) @ reducer)
    w_exp = jnp.dot(w, exp_ref[...], preferred_element_type=jnp.float32)
    out = jnp.dot(w_exp * es, red_ref[...], preferred_element_type=jnp.float32)
    out_ref[...] = out.astype(out_ref.dtype)


def attention_transform_agg(emb, prep, num_users, tn=1024):
    """emb: (N, L, D) f32 (users then items) -> aggregated (N, D) f32."""
    N, L, D = emb.shape
    LD, LA = L * D, L * ATT_DIM
    emb2 = emb.reshape(N, LD)              # contiguous reshape: no HBM copy

    tn = min(tn, N)
    if tn < N and tn % 8 != 0:
        tn = max((tn // 8) * 8, 8)
    grid = (pl.cdiv(N, tn),)
    # NOTE (v7x megacore): keep N/tn >= ~8 so the parallel axis shards across
    # both TensorCores; shrink tn if the table is small.

    return pl.pallas_call(
        functools.partial(_agg_kernel, num_users=num_users),
        out_shape=jax.ShapeDtypeStruct((N, D), jnp.float32),
        grid_spec=pltpu.PrefetchScalarGridSpec(
            num_scalar_prefetch=0,
            grid=grid,
            in_specs=[
                pl.BlockSpec((tn, LD), lambda i: (i, 0)),
                pl.BlockSpec((LD, LD), lambda i: (0, 0)),
                pl.BlockSpec((1, LD), lambda i: (0, 0)),
                pl.BlockSpec((LD, LA), lambda i: (0, 0)),
                pl.BlockSpec((1, LA), lambda i: (0, 0)),
                pl.BlockSpec((LA, L), lambda i: (0, 0)),
                pl.BlockSpec((LD, LA), lambda i: (0, 0)),
                pl.BlockSpec((1, LA), lambda i: (0, 0)),
                pl.BlockSpec((LA, L), lambda i: (0, 0)),
                pl.BlockSpec((L, LD), lambda i: (0, 0)),
                pl.BlockSpec((LD, D), lambda i: (0, 0)),
            ],
            out_specs=pl.BlockSpec((tn, D), lambda i: (i, 0)),
        ),
        compiler_params=pltpu.CompilerParams(
            dimension_semantics=("parallel",),
            vmem_limit_bytes=64 * 1024 * 1024),
    )(emb2, prep["tw_bd"], prep["tb_flat"],
      prep["wa_bd"], prep["ba_t"], prep["ha_sel"],
      prep["wb_bd"], prep["bb_t"], prep["hb_sel"],
      prep["expander"], prep["reducer"])


# ---------------------------------------------------------------------------
# Kernel 2: BPR loss  mean(softplus(neg_score - pos_score)) — lane-dense,
# tiled reduction over batch columns.  Inputs arrive transposed as (D, B).
# ---------------------------------------------------------------------------
def _bpr_kernel(u_ref, p_ref, n_ref, out_ref, *, batch):
    i = pl.program_id(0)
    tb = u_ref.shape[1]

    @pl.when(i == 0)
    def _init():
        out_ref[...] = jnp.zeros_like(out_ref)

    # (D, TB): reduce over the D sublane axis -> (1, TB) lane-dense scores
    x = jnp.sum(u_ref[...] * (n_ref[...] - p_ref[...]), axis=0, keepdims=True)
    sp = jnp.maximum(x, 0.0) + jnp.log1p(jnp.exp(-jnp.abs(x)))  # stable softplus

    # mask columns added by padding the batch up to a TB multiple
    col = i * tb + jax.lax.broadcasted_iota(jnp.int32, (1, tb), 1)
    sp = jnp.where(col < batch, sp, 0.0)

    out_ref[...] += jnp.sum(sp, keepdims=True)                  # (1, 1)

    @pl.when(i == pl.num_programs(0) - 1)
    def _finalize():
        out_ref[...] = out_ref[...] * (1.0 / batch)


def bpr_loss(u_t, pos_t, neg_t, tb=1024):
    """u_t / pos_t / neg_t: (D, B) f32 (transposed gathers)."""
    d, bsz = u_t.shape
    tb = max(128, (tb // 128) * 128)
    tb = min(tb, _round_up(bsz, 128))
    bpad = _round_up(bsz, tb)
    if bpad != bsz:
        pad = ((0, 0), (0, bpad - bsz))
        u_t = jnp.pad(u_t, pad)
        pos_t = jnp.pad(pos_t, pad)
        neg_t = jnp.pad(neg_t, pad)
    grid = bpad // tb

    out = pl.pallas_call(
        functools.partial(_bpr_kernel, batch=bsz),
        out_shape=jax.ShapeDtypeStruct((1, 1), jnp.float32),
        grid_spec=pltpu.PrefetchScalarGridSpec(
            num_scalar_prefetch=0,
            grid=(grid,),
            in_specs=[
                pl.BlockSpec((d, tb), lambda i: (0, i)),
                pl.BlockSpec((d, tb), lambda i: (0, i)),
                pl.BlockSpec((d, tb), lambda i: (0, i)),
            ],
            out_specs=pl.BlockSpec((1, 1), lambda i: (0, 0)),
        ),
        compiler_params=pltpu.CompilerParams(
            dimension_semantics=("arbitrary",)),
    )(u_t, pos_t, neg_t)
    return out[0, 0]


# ---------------------------------------------------------------------------
# RecEraser forward
# ---------------------------------------------------------------------------
def receraser_forward(prep, emb, indices, num_users, tn=1024, tb=1024):
    users, pos_items, neg_items = indices

    # single pass over the whole (users + items) table: no slice copies of emb
    agg = attention_transform_agg(emb, prep, num_users, tn=tn)   # (N, D) f32
    u_e = agg[:num_users]
    i_e = agg[num_users:]

    # row gathers left to XLA (tiny); transposed to (D, B) so the BPR kernel
    # runs lane-dense.  TODO(synk): for batches in the thousands, fuse these
    # gathers into the BPR kernel via scalar-prefetched indices + pl.Element.
    u_t = jnp.take(u_e, users, axis=0).T
    p_t = jnp.take(i_e, pos_items, axis=0).T
    n_t = jnp.take(i_e, neg_items, axis=0).T

    loss = bpr_loss(u_t, p_t, n_t, tb=tb)
    return loss, u_e, i_e


# ---------------------------------------------------------------------------
# Pure-JAX f32 reference (mirrors the PyTorch module exactly)
# ---------------------------------------------------------------------------
def _ref_attention_agg(es, W, B, H):
    h = jax.nn.relu(jnp.einsum("abc,ck->abk", es, W) + B)
    w = jnp.exp(jnp.einsum("abc,ck->abk", h, H))
    w = w / jnp.sum(w, axis=1, keepdims=True)
    return jnp.sum(w * es, axis=1)


def ref_forward(params, emb, indices, num_users):
    users, pos_items, neg_items = indices
    user_emb = emb[:num_users]
    item_emb = emb[num_users:]
    u_es = jnp.einsum("abc,bcd->abd", user_emb, params["trans_W"]) + params["trans_B"]
    i_es = jnp.einsum("abc,bcd->abd", item_emb, params["trans_W"]) + params["trans_B"]
    u_e = _ref_attention_agg(u_es, params["WA"], params["BA"], params["HA"])
    i_e = _ref_attention_agg(i_es, params["WB"], params["BB"], params["HB"])
    ug, pg, ng = u_e[users], i_e[pos_items], i_e[neg_items]
    loss = jnp.mean(jax.nn.softplus(-(jnp.sum(ug * pg, 1) - jnp.sum(ug * ng, 1))))
    return loss, u_e, i_e


if __name__ == "__main__":
    # num_users=40 with tn=32 exercises multi-step grid + a tail block and the
    # per-row user/item weight select; batch=300 with tb=128 exercises BPR
    # column padding + masking + multi-step accumulation.
    num_users, num_items = 40, 96
    batch = 300

    key = jax.random.PRNGKey(0)
    kwa, kwb, ktw, ktb, kemb, ku, kp, kn = jax.random.split(key, 8)

    scale = jnp.sqrt(2.0 / (ATT_DIM + EMB_DIM))
    params = {
        "WA": jax.random.normal(kwa, (EMB_DIM, ATT_DIM), jnp.float32) * scale,
        "BA": jnp.zeros((ATT_DIM,), jnp.float32),
        "HA": jnp.ones((ATT_DIM, 1), jnp.float32) * 0.01,
        "WB": jax.random.normal(kwb, (EMB_DIM, ATT_DIM), jnp.float32) * scale,
        "BB": jnp.zeros((ATT_DIM,), jnp.float32),
        "HB": jnp.ones((ATT_DIM, 1), jnp.float32) * 0.01,
        "trans_W": jax.random.normal(ktw, (NUM_LOCAL, EMB_DIM, EMB_DIM), jnp.float32) * 0.01,
        "trans_B": jax.random.normal(ktb, (NUM_LOCAL, EMB_DIM), jnp.float32) * 0.01,
    }
    prep = prepare_params(params)   # one-time: block-diag bf16 weights etc.

    emb = jax.random.normal(
        kemb, (num_users + num_items, NUM_LOCAL, EMB_DIM), jnp.float32)
    users = jax.random.randint(ku, (batch,), 0, num_users)
    pos_items = jax.random.randint(kp, (batch,), 0, num_items)
    neg_items = jax.random.randint(kn, (batch,), 0, num_items)
    indices = (users, pos_items, neg_items)

    # small tn/tb so multi-step grid + tail paths are exercised here;
    # production sizes use the defaults (tn=1024, tb=1024).
    loss, u_e, i_e = receraser_forward(prep, emb, indices, num_users,
                                       tn=32, tb=128)
    jax.block_until_ready((loss, u_e, i_e))

    # correctness vs the pure-f32 reference (tolerance accounts for the bf16
    # matmul operands used inside the kernel; accumulation is f32).
    rloss, ru_e, ri_e = ref_forward(params, emb, indices, num_users)
    assert jnp.allclose(u_e, ru_e, atol=5e-3, rtol=5e-2), "u_e mismatch"
    assert jnp.allclose(i_e, ri_e, atol=5e-3, rtol=5e-2), "i_e mismatch"
    assert jnp.allclose(loss, rloss, atol=5e-3, rtol=5e-2), "loss mismatch"

    print("KERNEL_OK")
</pallas_src>

<mosaic_0001>
module attributes {stable_mosaic.version = 11 : i64} {
  func.func @_agg_kernel(%arg0: i32, %arg1: memref<32x640xf32, #tpu.memory_space<vmem>>, %arg2: memref<640x640xbf16, #tpu.memory_space<vmem>>, %arg3: memref<1x640xf32, #tpu.memory_space<vmem>>, %arg4: memref<640x320xbf16, #tpu.memory_space<vmem>>, %arg5: memref<1x320xf32, #tpu.memory_space<vmem>>, %arg6: memref<320x10xf32, #tpu.memory_space<vmem>>, %arg7: memref<640x320xbf16, #tpu.memory_space<vmem>>, %arg8: memref<1x320xf32, #tpu.memory_space<vmem>>, %arg9: memref<320x10xf32, #tpu.memory_space<vmem>>, %arg10: memref<10x640xf32, #tpu.memory_space<vmem>>, %arg11: memref<640x64xf32, #tpu.memory_space<vmem>>, %arg12: memref<32x64xf32, #tpu.memory_space<vmem>>) attributes {dimension_semantics = [#tpu.dimension_semantics<parallel>], iteration_bounds = array<i64: 5>, scalar_prefetch = 0 : i64, scratch_operands = 0 : i64, tpu.core_type = #tpu.core_type<tc>, window_params = [{transform_indices = @transform_0, window_bounds = array<i64: 32, 640>}, {pipeline_mode = #tpu.pipeline_mode<synchronous>, transform_indices = @transform_1, window_bounds = array<i64: 640, 640>}, {pipeline_mode = #tpu.pipeline_mode<synchronous>, transform_indices = @transform_2, window_bounds = array<i64: 1, 640>}, {pipeline_mode = #tpu.pipeline_mode<synchronous>, transform_indices = @transform_3, window_bounds = array<i64: 640, 320>}, {pipeline_mode = #tpu.pipeline_mode<synchronous>, transform_indices = @transform_4, window_bounds = array<i64: 1, 320>}, {pipeline_mode = #tpu.pipeline_mode<synchronous>, transform_indices = @transform_5, window_bounds = array<i64: 320, 10>}, {pipeline_mode = #tpu.pipeline_mode<synchronous>, transform_indices = @transform_6, window_bounds = array<i64: 640, 320>}, {pipeline_mode = #tpu.pipeline_mode<synchronous>, transform_indices = @transform_7, window_bounds = array<i64: 1, 320>}, {pipeline_mode = #tpu.pipeline_mode<synchronous>, transform_indices = @transform_8, window_bounds = array<i64: 320, 10>}, {pipeline_mode = #tpu.pipeline_mode<synchronous>, transform_indices = @transform_9, window_bounds = array<i64: 10, 640>}, {pipeline_mode = #tpu.pipeline_mode<synchronous>, transform_indices = @transform_10, window_bounds = array<i64: 640, 64>}, {transform_indices = @transform_11, window_bounds = array<i64: 32, 64>}]} {
    %c0 = arith.constant 0 : index
    %c0_0 = arith.constant 0 : index
    %0 = vector.load %arg1[%c0, %c0_0] : memref<32x640xf32, #tpu.memory_space<vmem>>, vector<32x640xf32>
    %1 = arith.truncf %0 : vector<32x640xf32> to vector<32x640xbf16>
    %c0_1 = arith.constant 0 : index
    %c0_2 = arith.constant 0 : index
    %2 = vector.load %arg2[%c0_1, %c0_2] : memref<640x640xbf16, #tpu.memory_space<vmem>>, vector<640x640xbf16>
    %cst = arith.constant dense<0.000000e+00> : vector<32x640xf32>
    %3 = tpu.matmul %1, %2, %cst {dimension_numbers = #tpu.dot_dimension_numbers<[1], [0], [0], [1], [0, 0, 1, 1], [], []>} : vector<32x640xbf16>, vector<640x640xbf16>, vector<32x640xf32> -> vector<32x640xf32>
    %c0_3 = arith.constant 0 : index
    %c0_4 = arith.constant 0 : index
    %4 = vector.load %arg3[%c0_3, %c0_4] : memref<1x640xf32, #tpu.memory_space<vmem>>, vector<1x640xf32>
    %5 = vector.broadcast %4 : vector<1x640xf32> to vector<32x640xf32>
    %6 = arith.addf %3, %5 : vector<32x640xf32>
    %7 = arith.truncf %6 : vector<32x640xf32> to vector<32x640xbf16>
    %c0_5 = arith.constant 0 : index
    %c0_6 = arith.constant 0 : index
    %8 = vector.load %arg4[%c0_5, %c0_6] : memref<640x320xbf16, #tpu.memory_space<vmem>>, vector<640x320xbf16>
    %cst_7 = arith.constant dense<0.000000e+00> : vector<32x320xf32>
    %9 = tpu.matmul %7, %8, %cst_7 {dimension_numbers = #tpu.dot_dimension_numbers<[1], [0], [0], [1], [0, 0, 1, 1], [], []>} : vector<32x640xbf16>, vector<640x320xbf16>, vector<32x320xf32> -> vector<32x320xf32>
    %c0_8 = arith.constant 0 : index
    %c0_9 = arith.constant 0 : index
    %10 = vector.load %arg5[%c0_8, %c0_9] : memref<1x320xf32, #tpu.memory_space<vmem>>, vector<1x320xf32>
    %11 = vector.broadcast %10 : vector<1x320xf32> to vector<32x320xf32>
    %12 = arith.addf %9, %11 : vector<32x320xf32>
    %cst_10 = arith.constant 0.000000e+00 : f32
    %13 = vector.broadcast %cst_10 : f32 to vector<32x320xf32>
    %14 = arith.maximumf %12, %13 : vector<32x320xf32>
    %c0_11 = arith.constant 0 : index
    %c0_12 = arith.constant 0 : index
    %15 = vector.load %arg7[%c0_11, %c0_12] : memref<640x320xbf16, #tpu.memory_space<vmem>>, vector<640x320xbf16>
    %cst_13 = arith.constant dense<0.000000e+00> : vector<32x320xf32>
    %16 = tpu.matmul %7, %15, %cst_13 {dimension_numbers = #tpu.dot_dimension_numbers<[1], [0], [0], [1], [0, 0, 1, 1], [], []>} : vector<32x640xbf16>, vector<640x320xbf16>, vector<32x320xf32> -> vector<32x320xf32>
    %c0_14 = arith.constant 0 : index
    %c0_15 = arith.constant 0 : index
    %17 = vector.load %arg8[%c0_14, %c0_15] : memref<1x320xf32, #tpu.memory_space<vmem>>, vector<1x320xf32>
    %18 = vector.broadcast %17 : vector<1x320xf32> to vector<32x320xf32>
    %19 = arith.addf %16, %18 : vector<32x320xf32>
    %cst_16 = arith.constant 0.000000e+00 : f32
    %20 = vector.broadcast %cst_16 : f32 to vector<32x320xf32>
    %21 = arith.maximumf %19, %20 : vector<32x320xf32>
    %c0_17 = arith.constant 0 : index
    %c0_18 = arith.constant 0 : index
    %22 = vector.load %arg6[%c0_17, %c0_18] : memref<320x10xf32, #tpu.memory_space<vmem>>, vector<320x10xf32>
    %cst_19 = arith.constant dense<0.000000e+00> : vector<32x10xf32>
    %23 = tpu.matmul %14, %22, %cst_19 {dimension_numbers = #tpu.dot_dimension_numbers<[1], [0], [0], [1], [0, 0, 1, 1], [], []>} : vector<32x320xf32>, vector<320x10xf32>, vector<32x10xf32> -> vector<32x10xf32>
    %c0_20 = arith.constant 0 : index
    %c0_21 = arith.constant 0 : index
    %24 = vector.load %arg9[%c0_20, %c0_21] : memref<320x10xf32, #tpu.memory_space<vmem>>, vector<320x10xf32>
    %cst_22 = arith.constant dense<0.000000e+00> : vector<32x10xf32>
    %25 = tpu.matmul %21, %24, %cst_22 {dimension_numbers = #tpu.dot_dimension_numbers<[1], [0], [0], [1], [0, 0, 1, 1], [], []>} : vector<32x320xf32>, vector<320x10xf32>, vector<32x10xf32> -> vector<32x10xf32>
    %c32_i32 = arith.constant 32 : i32
    %26 = arith.muli %arg0, %c32_i32 : i32
    %27 = tpu.iota {dimensions = array<i32: 0>} : vector<32x1xi32>
    %28 = vector.broadcast %26 : i32 to vector<32x1xi32>
    %29 = arith.addi %28, %27 : vector<32x1xi32>
    %c40_i32 = arith.constant 40 : i32
    %30 = vector.broadcast %c40_i32 : i32 to vector<32x1xi32>
    %31 = arith.cmpi slt, %29, %30 : vector<32x1xi32>
    %32 = vector.shape_cast %31 : vector<32x1xi1> to vector<32x1xi1>
    %33 = vector.broadcast %32 : vector<32x1xi1> to vector<32x10xi1>
    %34 = arith.select %33, %23, %25 : vector<32x10xi1>, vector<32x10xf32>
    %cst_23 = arith.constant dense<0xFF800000> : vector<32xf32>
    %35 = vector.multi_reduction <maximumf>, %34, %cst_23 [1] : vector<32x10xf32> to vector<32xf32>
    %36 = vector.shape_cast %35 : vector<32xf32> to vector<32x1xf32>
    %37 = vector.broadcast %36 : vector<32x1xf32> to vector<32x10xf32>
    %38 = arith.subf %34, %37 : vector<32x10xf32>
    %39 = math.exp %38 : vector<32x10xf32>
    %cst_24 = arith.constant dense<0.000000e+00> : vector<32xf32>
    %40 = vector.multi_reduction <add>, %39, %cst_24 [1] : vector<32x10xf32> to vector<32xf32>
    %41 = vector.shape_cast %40 : vector<32xf32> to vector<32x1xf32>
    %42 = vector.broadcast %41 : vector<32x1xf32> to vector<32x10xf32>
    %43 = arith.divf %39, %42 : vector<32x10xf32>
    %c0_25 = arith.constant 0 : index
    %c0_26 = arith.constant 0 : index
    %44 = vector.load %arg10[%c0_25, %c0_26] : memref<10x640xf32, #tpu.memory_space<vmem>>, vector<10x640xf32>
    %cst_27 = arith.constant dense<0.000000e+00> : vector<32x640xf32>
    %45 = tpu.matmul %43, %44, %cst_27 {dimension_numbers = #tpu.dot_dimension_numbers<[1], [0], [0], [1], [0, 0, 1, 1], [], []>} : vector<32x10xf32>, vector<10x640xf32>, vector<32x640xf32> -> vector<32x640xf32>
    %46 = arith.mulf %45, %6 : vector<32x640xf32>
    %c0_28 = arith.constant 0 : index
    %c0_29 = arith.constant 0 : index
    %47 = vector.load %arg11[%c0_28, %c0_29] : memref<640x64xf32, #tpu.memory_space<vmem>>, vector<640x64xf32>
    %cst_30 = arith.constant dense<0.000000e+00> : vector<32x64xf32>
    %48 = tpu.matmul %46, %47, %cst_30 {dimension_numbers = #tpu.dot_dimension_numbers<[1], [0], [0], [1], [0, 0, 1, 1], [], []>} : vector<32x640xf32>, vector<640x64xf32>, vector<32x64xf32> -> vector<32x64xf32>
    %c0_31 = arith.constant 0 : index
    %c0_32 = arith.constant 0 : index
    %49 = vector.load %arg12[%c0_31, %c0_32] : memref<32x64xf32, #tpu.memory_space<vmem>>, vector<32x64xf32>
    tpu.vector_store %arg12[%c0_31, %c0_32], %48 {strides = array<i32>} : memref<32x64xf32, #tpu.memory_space<vmem>>, vector<32x64xf32>,
    return
  }
  func.func @transform_0(%arg0: i32) -> (i32, i32) {
    %c0_i32 = arith.constant 0 : i32
    %c0_i32_0 = arith.constant 0 : i32
    return %arg0, %c0_i32 : i32, i32
  }
  func.func @transform_1(%arg0: i32) -> (i32, i32) {
    %c0_i32 = arith.constant 0 : i32
    %c0_i32_0 = arith.constant 0 : i32
    %c0_i32_1 = arith.constant 0 : i32
    return %c0_i32, %c0_i32_0 : i32, i32
  }
  func.func @transform_2(%arg0: i32) -> (i32, i32) {
    %c0_i32 = arith.constant 0 : i32
    %c0_i32_0 = arith.constant 0 : i32
    %c0_i32_1 = arith.constant 0 : i32
    return %c0_i32, %c0_i32_0 : i32, i32
  }
  func.func @transform_3(%arg0: i32) -> (i32, i32) {
    %c0_i32 = arith.constant 0 : i32
    %c0_i32_0 = arith.constant 0 : i32
    %c0_i32_1 = arith.constant 0 : i32
    return %c0_i32, %c0_i32_0 : i32, i32
  }
  func.func @transform_4(%arg0: i32) -> (i32, i32) {
    %c0_i32 = arith.constant 0 : i32
    %c0_i32_0 = arith.constant 0 : i32
    %c0_i32_1 = arith.constant 0 : i32
    return %c0_i32, %c0_i32_0 : i32, i32
  }
  func.func @transform_5(%arg0: i32) -> (i32, i32) {
    %c0_i32 = arith.constant 0 : i32
    %c0_i32_0 = arith.constant 0 : i32
    %c0_i32_1 = arith.constant 0 : i32
    return %c0_i32, %c0_i32_0 : i32, i32
  }
  func.func @transform_6(%arg0: i32) -> (i32, i32) {
    %c0_i32 = arith.constant 0 : i32
    %c0_i32_0 = arith.constant 0 : i32
    %c0_i32_1 = arith.constant 0 : i32
    return %c0_i32, %c0_i32_0 : i32, i32
  }
  func.func @transform_7(%arg0: i32) -> (i32, i32) {
    %c0_i32 = arith.constant 0 : i32
    %c0_i32_0 = arith.constant 0 : i32
    %c0_i32_1 = arith.constant 0 : i32
    return %c0_i32, %c0_i32_0 : i32, i32
  }
  func.func @transform_8(%arg0: i32) -> (i32, i32) {
    %c0_i32 = arith.constant 0 : i32
    %c0_i32_0 = arith.constant 0 : i32
    %c0_i32_1 = arith.constant 0 : i32
    return %c0_i32, %c0_i32_0 : i32, i32
  }
  func.func @transform_9(%arg0: i32) -> (i32, i32) {
    %c0_i32 = arith.constant 0 : i32
    %c0_i32_0 = arith.constant 0 : i32
    %c0_i32_1 = arith.constant 0 : i32
    return %c0_i32, %c0_i32_0 : i32, i32
  }
  func.func @transform_10(%arg0: i32) -> (i32, i32) {
    %c0_i32 = arith.constant 0 : i32
    %c0_i32_0 = arith.constant 0 : i32
    %c0_i32_1 = arith.constant 0 : i32
    return %c0_i32, %c0_i32_0 : i32, i32
  }
  func.func @transform_11(%arg0: i32) -> (i32, i32) {
    %c0_i32 = arith.constant 0 : i32
    %c0_i32_0 = arith.constant 0 : i32
    return %arg0, %c0_i32 : i32, i32
  }
}

</mosaic_0001>

<bundles_post_ra>
// kernel: tpu_custom_call.1
= control target key start
LH: loop header
LB: loop body
LE: loop exit
PB: predicated region body
PF: predicated region fallthrough
CT: control target
= control target key end

     0   :  { %s7830_s17 = smov 0   ;;  %s7832_s18 = smov 0   ;;  %s10115_s0 = inlined_call_operand.vmem [shape: f32[136,640], index: 0, kind: input, shape index: {}]   ;;  %s10116_s1 = inlined_call_operand.vmem [shape: bf16[640,640], index: 1, kind: input, shape index: {}]   ;;  %s10117_s2 = inlined_call_operand.vmem [shape: f32[1,640], index: 2, kind: input, shape index: {}]   ;;  %s10118_s3 = inlined_call_operand.vmem [shape: bf16[640,320], index: 3, kind: input, shape index: {}]   ;;  %s10119_s4 = inlined_call_operand.vmem [shape: f32[1,320], index: 4, kind: input, shape index: {}]   ;;  %s10120_s5 = inlined_call_operand.vmem [shape: f32[320,10], index: 5, kind: input, shape index: {}]   ;;  %s10121_s6 = inlined_call_operand.vmem [shape: bf16[640,320], index: 6, kind: input, shape index: {}]   ;;  %s10122_s7 = inlined_call_operand.vmem [shape: f32[1,320], index: 7, kind: input, shape index: {}]   ;;  %s10123_s8 = inlined_call_operand.vmem [shape: f32[320,10], index: 8, kind: input, shape index: {}]   ;;  %s10124_s9 = inlined_call_operand.vmem [shape: f32[10,640], index: 9, kind: input, shape index: {}]   ;;  %s10125_s10 = inlined_call_operand.vmem [shape: f32[640,64], index: 10, kind: input, shape index: {}]   ;;  %s10126_s11 = inlined_call_operand.vmem [shape: f32[136,64], index: 11, kind: output, shape index: {}]  }
   0x1   :  { %s7834_s19 = smov 0  }
   0x2 LB: > { %s7843_s20 = sadd.s32 4294967295, %s7734_s19   ;;  %s7845_s21 = sadd.s32 1, %s7734_s19   ;;  %s7734_s19 = sphi %s7834_s19, %s10133_s19   ;;  %s7730_s18 = sphi %s7832_s18, %s10132_s18   ;;  %s7726_s17 = sphi %s7830_s17, %s10131_s17  }
   0x3   : > { %s261_s22 = ssub.s32 %s7734_s19, %s7845_s21  ;;  %s264_s23 = sadd.s32 1, %s7730_s18 }
   0x4   : > { %p262_p0 = scmp.eq.s32.totalorder %s261_s22, 0  ;;  %p274_p1 = scmp.ne.s32.totalorder %s7730_s18, %s7726_s17 }
   0x5   : > { %p275_p2 = scmp.eq.s32.totalorder %s7843_s20, 4  ;;  %p5907_p3 = scmp.ge.s32.totalorder %s7734_s19, 1 }
   0x6   : > { %s7853_s24 = scalar_select %p262_p0, %s7730_s18, %s264_s23  }
   0x7   : > { %p7855_p4 = por %p275_p2, %p274_p1  ;;  %p349_p5 = scmp.lt.s32.totalorder %s7734_s19, 6 }
   0x9   : > { %p350_p6 = pnand %p5907_p3, %p349_p5 }
   0xa   : > { %s7944_s30 = sshll.u32 (!%p350_p6), %s7843_s20, 2  ;;  %s6359_s27 = sshll.u32 (!%p350_p6), %s7843_s20, 5 }
   0xb   : > { %353 = sbr.rel (%p350_p6) target bundleno = 1793 (0x701), region = 64  ;;  %p400_p7 = scmp.lt.s32.totalorder (!%p350_p6), %s7944_s30, 16 }
   0xc   : > { %s391_s19 = sand.u32 (!%p350_p6), 1, %s7726_s17  }
   0xd   : > { %s5908_s22 = sshll.u32 (!%p350_p6), %s391_s19, 5 }
  0x10   : > { %v7064_v0 = vld [vmem:[%s10116_s1 + $0x11c] ss:$20 sps:$4 sm:$0xff]   ;;  %v7066_v1 = vld [vmem:[%s10116_s1 + $0x118] ss:$20 sps:$4 sm:$0xff]   ;;  %v7070_v4 = vld [vmem:[%s10116_s1 + $0xf4] ss:$20 sps:$4 sm:$0xff]   ;;  %s10066_s26 = scalar_lea.vmem (%p7855_p4), %s10126_s11, %s6359_s27  }
  0x11   : > { %1754 = vmatprep.subr.bf16.mxu0 %v7064_v0  ;;  %v7067_v2 = vld [vmem:[%s10116_s1 + $0x39c] ss:$20 sps:$4 sm:$0xff]   ;;  %v7069_v3 = vld [vmem:[%s10116_s1 + $0x398] ss:$20 sps:$4 sm:$0xff]   ;;  %v7073_v6 = vld [vmem:[%s10116_s1 + $0x374] ss:$20 sps:$4 sm:$0xff]  }
  0x12   : > { %1755 = vmatpush1.bf16.msra.mxu0 %v7066_v1  ;;  %v7072_v5 = vld [vmem:[%s10116_s1 + $0xf0] ss:$20 sps:$4 sm:$0xff]   ;;  %1807 = vmatprep.subr.bf16.mxu1 %v7067_v2  ;;  %v7076_v8 = vld [vmem:[%s10116_s1 + $0xcc] ss:$20 sps:$4 sm:$0xff]   ;;  %v7078_v9 = vld [vmem:[%s10116_s1 + $0xc8] ss:$20 sps:$4 sm:$0xff]  }
  0x13   : > { %1808 = vmatpush1.bf16.msra.mxu1 %v7069_v3  ;;  %1756 = vmatprep.subr.bf16.mxu0 %v7070_v4  ;;  %v7075_v7 = vld [vmem:[%s10116_s1 + $0x370] ss:$20 sps:$4 sm:$0xff]   ;;  %v7079_v10 = vld [vmem:[%s10116_s1 + $0x34c] ss:$20 sps:$4 sm:$0xff]   ;;  %v7081_v12 = vld [vmem:[%s10116_s1 + $0x348] ss:$20 sps:$4 sm:$0xff]  }
  0x14   : > { %1809 = vmatprep.subr.bf16.mxu1 %v7073_v6  ;;  %v7082_v11 = vld [vmem:[%s10116_s1 + $0xa4] ss:$20 sps:$4 sm:$0xff]   ;;  %v7084_v14 = vld [vmem:[%s10116_s1 + $0xa0] ss:$20 sps:$4 sm:$0xff]   ;;  %v7088_v15 = vld [vmem:[%s10116_s1 + $0x7c] ss:$20 sps:$4 sm:$0xff]  }
  0x15   : > { %v7085_v13 = vld [vmem:[%s10116_s1 + $0x324] ss:$20 sps:$4 sm:$0xff]   ;;  %v7087_v16 = vld [vmem:[%s10116_s1 + $0x320] ss:$20 sps:$4 sm:$0xff]   ;;  %v7091_v17 = vld [vmem:[%s10116_s1 + $0x2fc] ss:$20 sps:$4 sm:$0xff]  }
  0x16   : > { %1757 = vmatpush1.bf16.msra.mxu0 %v7072_v5  ;;  %v7090_v18 = vld [vmem:[%s10116_s1 + $0x78] ss:$20 sps:$4 sm:$0xff]   ;;  %v7094_v19 = vld [vmem:[%s10116_s1 + $0x54] ss:$20 sps:$4 sm:$0xff]   ;;  %v7096_v22 = vld [vmem:[%s10116_s1 + $0x50] ss:$20 sps:$4 sm:$0xff]  }
  0x17   : > { %1758 = vmatprep.subr.bf16.mxu0 %v7076_v8  ;;  %1810 = vmatpush1.bf16.msra.mxu1 %v7075_v7  ;;  %v7093_v20 = vld [vmem:[%s10116_s1 + $0x2f8] ss:$20 sps:$4 sm:$0xff]   ;;  %v7097_v21 = vld [vmem:[%s10116_s1 + $0x2d4] ss:$20 sps:$4 sm:$0xff]   ;;  %v7099_v24 = vld [vmem:[%s10116_s1 + $0x2d0] ss:$20 sps:$4 sm:$0xff]  }
  0x18   : > { %1811 = vmatprep.subr.bf16.mxu1 %v7079_v10  ;;  %v7100_v23 = vld [vmem:[%s10116_s1 + $0x2c] ss:$20 sps:$4 sm:$0xff]   ;;  %v7102_v26 = vld [vmem:[%s10116_s1 + $0x28] ss:$20 sps:$4 sm:$0xff]   ;;  %v7106_v27 = vld [vmem:[%s10116_s1 + $0x4] ss:$20 sps:$4 sm:$0xff]  }
  0x19   : > { %v7103_v25 = vld [vmem:[%s10116_s1 + $0x2ac] ss:$20 sps:$4 sm:$0xff]   ;;  %v7105_v28 = vld [vmem:[%s10116_s1 + $0x2a8] ss:$20 sps:$4 sm:$0xff]   ;;  %v7109_v29 = vld [vmem:[%s10116_s1 + $0x284] ss:$20 sps:$4 sm:$0xff]  }
  0x1a   : > { %1759 = vmatpush1.bf16.msra.mxu0 %v7078_v9  ;;  %v7108_v30 = vld [vmem:[%s10116_s1] ss:$20 sps:$4 sm:$0xff]   ;;  %v7112_v31 = vld [vmem:[%s10116_s1 + $0x25c] ss:$20 sps:$4 sm:$0xff]   ;;  %v7114_v34 = vld [vmem:[%s10116_s1 + $0x258] ss:$20 sps:$4 sm:$0xff]  }
  0x1b   : > { %1760 = vmatprep.subr.bf16.mxu0 %v7082_v11  ;;  %1812 = vmatpush1.bf16.msra.mxu1 %v7081_v12  ;;  %v7111_v32 = vld [vmem:[%s10116_s1 + $0x280] ss:$20 sps:$4 sm:$0xff]   ;;  %v7115_v33 = vld [vmem:[%s10116_s1 + $0x4dc] ss:$20 sps:$4 sm:$0xff]   ;;  %s401_s14 = scalar_select %p400_p7, %s7944_s30, 16  ;;  %vm4539_vm0 = vcmask 523264  }
  0x1c   : > { %1813 = vmatprep.subr.bf16.mxu1 %v7085_v13  ;;  %v7118_v35 = vld [vmem:[%s10116_s1 + $0x234] ss:$20 sps:$4 sm:$0xff]   ;;  %v7117_v36 = vld [vmem:[%s10116_s1 + $0x4d8] ss:$20 sps:$4 sm:$0xff]   ;;  %v7120_v38 = vld [vmem:[%s10116_s1 + $0x230] ss:$20 sps:$4 sm:$0xff]  }
  0x1d   : > { %v7121_v37 = vld [vmem:[%s10116_s1 + $0x4b4] ss:$20 sps:$4 sm:$0xff]   ;;  %s6973_s29 = smul.u32 40, %s401_s14  ;;  %v7124_v39 = vld [vmem:[%s10116_s1 + $0x20c] ss:$20 sps:$4 sm:$0xff]   ;;  %vm4971_vm3 = vcmask 80896  }
  0x1e   : > { %1761 = vmatpush1.bf16.msra.mxu0 %v7084_v14  ;;  %v7123_v40 = vld [vmem:[%s10116_s1 + $0x4b0] ss:$20 sps:$4 sm:$0xff]   ;;  %v7127_v41 = vld [vmem:[%s10116_s1 + $0x48c] ss:$20 sps:$4 sm:$0xff]   ;;  %v7126_v42 = vld [vmem:[%s10116_s1 + $0x208] ss:$20 sps:$4 sm:$0xff]  }
  0x1f   : > { %1762 = vmatprep.subr.bf16.mxu0 %v7088_v15  ;;  %1814 = vmatpush1.bf16.msra.mxu1 %v7087_v16  ;;  %s7996_s28 = scalar_lea.vmem %s10115_s0, %s6973_s29  ;;  %v7130_v43 = vld [vmem:[%s10116_s1 + $0x1e4] ss:$20 sps:$4 sm:$0xff]   ;;  %v7129_v44 = vld [vmem:[%s10116_s1 + $0x488] ss:$20 sps:$4 sm:$0xff]   ;;  %v7132_v48 = vld [vmem:[%s10116_s1 + $0x1e0] ss:$20 sps:$4 sm:$0xff]  }
  0x20   : > { %1815 = vmatprep.subr.bf16.mxu1 %v7091_v17  ;;  %v7133_v45 = vld [vmem:[%s10116_s1 + $0x464] ss:$20 sps:$4 sm:$0xff]   ;;  %v418_v46 = vld [vmem:[%s7996_s28 + $0x8] sm:$0xff]  ;;  %v423_v47 = vld [vmem:[%s7996_s28 + $0x30] sm:$0xff]  ;;  %vm5038_vm6 = vcmask 1041408   ;;  %s5684_s17 = ssub.s32 (%p7855_p4), 17, %s7944_s30 }
  0x21   : > { %v8012_v49 = vpack.c.bf16 %v423_v47, %v418_v46  ;;  %v7136_v50 = vld [vmem:[%s10116_s1 + $0x1bc] ss:$20 sps:$4 sm:$0xff]   ;;  %v7135_v51 = vld [vmem:[%s10116_s1 + $0x460] ss:$20 sps:$4 sm:$0xff]   ;;  %v7138_v56 = vld [vmem:[%s10116_s1 + $0x1b8] ss:$20 sps:$4 sm:$0xff]  }
  0x22   : > { %1763 = vmatpush1.bf16.msra.mxu0 %v7090_v18  ;;  %v420_v52 = vld [vmem:[%s7996_s28 + $0x18] sm:$0xff]  ;;  %v425_v53 = vld [vmem:[%s7996_s28 + $0x40] sm:$0xff]  ;;  %v7142_v57 = vld [vmem:[%s10116_s1 + $0x194] ss:$20 sps:$4 sm:$0xff]   ;;  %p5685_p8 = scmp.lt.s32.totalorder (%p7855_p4), %s5684_s17, 4 }
  0x23   : > { %1764 = vmatprep.subr.bf16.mxu0 %v7094_v19  ;;  %1816 = vmatpush1.bf16.msra.mxu1 %v7093_v20  ;;  %v7139_v54 = vld [vmem:[%s10116_s1 + $0x43c] ss:$20 sps:$4 sm:$0xff]   ;;  %v8026_v55 = vpack.c.bf16 %v425_v53, %v420_v52  ;;  %v7141_v58 = vld [vmem:[%s10116_s1 + $0x438] ss:$20 sps:$4 sm:$0xff]   ;;  %v7145_v59 = vld [vmem:[%s10116_s1 + $0x414] ss:$20 sps:$4 sm:$0xff]  }
  0x24   : > { %1817 = vmatprep.subr.bf16.mxu1 %v7097_v21  ;;  %1786 = vmatprep.mubr.bf16.mxu0 %v8012_v49  ;;  %v7144_v60 = vld [vmem:[%s10116_s1 + $0x190] ss:$20 sps:$4 sm:$0xff]   ;;  %v7148_v61 = vld [vmem:[%s10116_s1 + $0x16c] ss:$20 sps:$4 sm:$0xff]   ;;  %v7150_v0 = vld [vmem:[%s10116_s1 + $0x168] ss:$20 sps:$4 sm:$0xff]  }
  0x25   : > { %1839 = vmatprep.mubr.bf16.mxu1 %v8026_v55  ;;  %v7147_v62 = vld [vmem:[%s10116_s1 + $0x410] ss:$20 sps:$4 sm:$0xff]   ;;  %v7151_v63 = vld [vmem:[%s10116_s1 + $0x3ec] ss:$20 sps:$4 sm:$0xff]   ;;  %v7153_v2 = vld [vmem:[%s10116_s1 + $0x3e8] ss:$20 sps:$4 sm:$0xff]  }
  0x26   : > { %1765 = vmatpush1.bf16.msra.mxu0 %v7096_v22  ;;  %v7154_v1 = vld [vmem:[%s10116_s1 + $0x144] ss:$20 sps:$4 sm:$0xff]   ;;  %v7156_v3 = vld [vmem:[%s10116_s1 + $0x140] ss:$20 sps:$4 sm:$0xff]   ;;  %v422_v7 = vld [vmem:[%s7996_s28 + $0x28] sm:$0xff] }
  0x27   : > { %1766 = vmatprep.subr.bf16.mxu0 %v7100_v23  ;;  %1818 = vmatpush1.bf16.msra.mxu1 %v7099_v24  ;;  %v7157_v4 = vld [vmem:[%s10116_s1 + $0x3c4] ss:$20 sps:$4 sm:$0xff]   ;;  %v7159_v6 = vld [vmem:[%s10116_s1 + $0x3c0] ss:$20 sps:$4 sm:$0xff]   ;;  %v7162_v8 = vld [vmem:[%s10116_s1 + $0x61c] ss:$20 sps:$4 sm:$0xff]  }
  0x28   : > { %1819 = vmatprep.subr.bf16.mxu1 %v7103_v25  ;;  %v417_v5 = vld [vmem:[%s7996_s28] sm:$0xff]  ;;  %v419_v9 = vld [vmem:[%s7996_s28 + $0x10] sm:$0xff]  ;;  %v428_v10 = vld [vmem:[%s7996_s28 + $0x58] sm:$0xff] }
  0x29   : > { %v433_v11 = vld [vmem:[%s7996_s28 + $0x80] sm:$0xff]  ;;  %v424_v12 = vld [vmem:[%s7996_s28 + $0x38] sm:$0xff]  ;;  %v8083_v14 = vpack.c.bf16 %v422_v7, %v417_v5  ;;  %v430_v15 = vld [vmem:[%s7996_s28 + $0x68] sm:$0xff] }
  0x2a   : > { %1767 = vmatpush1.bf16.msra.mxu0 %v7102_v26  ;;  %v7165_v13 = vld [vmem:[%s10116_s1 + $0x124] ss:$20 sps:$4 sm:$0xff]   ;;  %v435_v16 = vld [vmem:[%s7996_s28 + $0x90] sm:$0xff]  ;;  %v8090_v18 = vpack.c.bf16 %v433_v11, %v428_v10  ;;  %v8092_v19 = vpack.c.bf16 %v424_v12, %v419_v9  ;;  %v7196_v52 = vld [vmem:[%s10116_s1 + $0x528] ss:$20 sps:$4 sm:$0xff]  }
  0x2b   : > { %1768 = vmatprep.subr.bf16.mxu0 %v7106_v27  ;;  %1820 = vmatpush1.bf16.msra.mxu1 %v7105_v28  ;;  %v7160_v17 = vld [vmem:[%s10116_s1 + $0x618] ss:$20 sps:$4 sm:$0xff]   ;;  %v7168_v20 = vld [vmem:[%s10116_s1 + $0x5f4] ss:$20 sps:$4 sm:$0xff]   ;;  %v8100_v22 = vpack.c.bf16 %v435_v16, %v430_v15  ;;  %v7166_v23 = vld [vmem:[%s10116_s1 + $0x5f0] ss:$20 sps:$4 sm:$0xff]  }
  0x2c   : > { %1821 = vmatprep.subr.bf16.mxu1 %v7109_v29  ;;  %v7163_v21 = vld [vmem:[%s10116_s1 + $0x120] ss:$20 sps:$4 sm:$0xff]   ;;  %v7171_v24 = vld [vmem:[%s10116_s1 + $0xfc] ss:$20 sps:$4 sm:$0xff]   ;;  %v7169_v28 = vld [vmem:[%s10116_s1 + $0xf8] ss:$20 sps:$4 sm:$0xff]  }
  0x2d   : > { %v427_v25 = vld [vmem:[%s7996_s28 + $0x50] sm:$0xff]  ;;  %v432_v26 = vld [vmem:[%s7996_s28 + $0x78] sm:$0xff]  ;;  %v7174_v27 = vld [vmem:[%s10116_s1 + $0x5cc] ss:$20 sps:$4 sm:$0xff]  }
  0x2e   : > { %1769 = vmatpush1.bf16.msra.mxu0 %v7108_v30  ;;  %v429_v29 = vld [vmem:[%s7996_s28 + $0x60] sm:$0xff]  ;;  %v434_v30 = vld [vmem:[%s7996_s28 + $0x88] sm:$0xff]  ;;  %v7195_v46 = vld [vmem:[%s10116_s1 + $0x5c] ss:$20 sps:$4 sm:$0xff]  }
  0x2f   : > { %1770 = vmatprep.subr.bf16.mxu0 %v7112_v31  ;;  %1822 = vmatpush1.bf16.msra.mxu1 %v7111_v32  ;;  %v7177_v31 = vld [vmem:[%s10116_s1 + $0xd4] ss:$20 sps:$4 sm:$0xff]   ;;  %v8125_v32 = vpack.c.bf16 %v432_v26, %v427_v25  ;;  %v7190_v47 = vld [vmem:[%s10116_s1 + $0x550] ss:$20 sps:$4 sm:$0xff]   ;;  %v7228_v12 = vld [vmem:[%s10116_s1 + $0x32c] ss:$20 sps:$4 sm:$0xff]  }
  0x30   : > { %1823 = vmatprep.subr.bf16.mxu1 %v7115_v33  ;;  %v7172_v33 = vld [vmem:[%s10116_s1 + $0x5c8] ss:$20 sps:$4 sm:$0xff]   ;;  %v7204_v53 = vld [vmem:[%s10116_s1 + $0x504] ss:$20 sps:$4 sm:$0xff]   ;;  %v431_v5 = vld [vmem:[%s7996_s28 + $0x70] sm:$0xff] }
  0x31   : > { %v7222_v7 = vld [vmem:[%s10116_s1 + $0x354] ss:$20 sps:$4 sm:$0xff]   ;;  %v7220_v11 = vld [vmem:[%s10116_s1 + $0x350] ss:$20 sps:$4 sm:$0xff]   ;;  %v7231_v15 = vld [vmem:[%s10116_s1 + $0x1ec] ss:$20 sps:$4 sm:$0xff]  }
  0x32   : > { %1771 = vmatpush2.bf16.msra.mxu0 %v7114_v34  ;;  %v7180_v34 = vld [vmem:[%s10116_s1 + $0x5a4] ss:$20 sps:$4 sm:$0xff]   ;;  %v7225_v10 = vld [vmem:[%s10116_s1 + $0x214] ss:$20 sps:$4 sm:$0xff]   ;;  %v7243_v26 = vld [vmem:[%s10116_s1 + $0x19c] ss:$20 sps:$4 sm:$0xff]  }
  0x33   : > { %1772 = vmatprep.subr.bf16.mxu0 %v7118_v35  ;;  %1824 = vmatpush2.bf16.msra.mxu1 %v7117_v36  ;;  %v8133_v35 = vpack.c.bf16 %v434_v30, %v429_v29  ;;  %v7175_v36 = vld [vmem:[%s10116_s1 + $0xd0] ss:$20 sps:$4 sm:$0xff]   ;;  %v7226_v16 = vld [vmem:[%s10116_s1 + $0x328] ss:$20 sps:$4 sm:$0xff]   ;;  %v7235_v25 = vld [vmem:[%s10116_s1 + $0x1c0] ss:$20 sps:$4 sm:$0xff]  }
  0x34   : > { %1825 = vmatprep.subr.bf16.mxu1 %v7121_v37  ;;  %v7183_v37 = vld [vmem:[%s10116_s1 + $0xac] ss:$20 sps:$4 sm:$0xff]   ;;  %v7249_v30 = vld [vmem:[%s10116_s1 + $0x174] ss:$20 sps:$4 sm:$0xff]  }
  0x35   : > { %v7241_v29 = vld [vmem:[%s10116_s1 + $0x198] ss:$20 sps:$4 sm:$0xff]  }
  0x36   : > { %1773 = vmatpush2.bf16.msra.mxu0 %v7120_v38  ;;  %v7178_v38 = vld [vmem:[%s10116_s1 + $0x5a0] ss:$20 sps:$4 sm:$0xff]  }
  0x37   : > { %1774 = vmatprep.subr.bf16.mxu0 %v7124_v39  ;;  %1826 = vmatpush2.bf16.msra.mxu1 %v7123_v40  ;;  %v7768_v39 = vmov 0   ;;  %v7186_v40 = vld [vmem:[%s10116_s1 + $0x57c] ss:$20 sps:$4 sm:$0xff]  }
  0x38   : > { %1827 = vmatprep.subr.bf16.mxu1 %v7127_v41  ;;  %v7181_v41 = vld [vmem:[%s10116_s1 + $0xa8] ss:$20 sps:$4 sm:$0xff]  }
  0x3a   : > { %1775 = vmatpush2.bf16.msra.mxu0 %v7126_v42  ;;  %v7189_v42 = vld [vmem:[%s10116_s1 + $0x84] ss:$20 sps:$4 sm:$0xff]  }
  0x3b   : > { %1776 = vmatprep.subr.bf16.mxu0 %v7130_v43  ;;  %1828 = vmatpush2.bf16.msra.mxu1 %v7129_v44  ;;  %v7184_v43 = vld [vmem:[%s10116_s1 + $0x578] ss:$20 sps:$4 sm:$0xff]   ;;  %v7192_v44 = vld [vmem:[%s10116_s1 + $0x554] ss:$20 sps:$4 sm:$0xff]  }
  0x3c   : > { %1829 = vmatprep.subr.bf16.mxu1 %v7133_v45  ;;  %v7187_v45 = vld [vmem:[%s10116_s1 + $0x80] ss:$20 sps:$4 sm:$0xff]  }
  0x3e   : > { %1777 = vmatpush2.bf16.msra.mxu0 %v7132_v48  ;;  %v7198_v48 = vld [vmem:[%s10116_s1 + $0x52c] ss:$20 sps:$4 sm:$0xff]  }
  0x3f   : > { %1778 = vmatprep.subr.bf16.mxu0 %v7136_v50  ;;  %1830 = vmatpush2.bf16.msra.mxu1 %v7135_v51  ;;  %v7193_v50 = vld [vmem:[%s10116_s1 + $0x58] ss:$20 sps:$4 sm:$0xff]   ;;  %v7201_v51 = vld [vmem:[%s10116_s1 + $0x34] ss:$20 sps:$4 sm:$0xff]  }
  0x40   : > { %1831 = vmatprep.subr.bf16.mxu1 %v7139_v54  ;;  %v7199_v54 = vld [vmem:[%s10116_s1 + $0x30] ss:$20 sps:$4 sm:$0xff]  }
  0x42   : > { %1779 = vmatpush2.bf16.msra.mxu0 %v7138_v56  ;;  %v7202_v56 = vld [vmem:[%s10116_s1 + $0x500] ss:$20 sps:$4 sm:$0xff]  }
  0x43   : > { %1780 = vmatprep.subr.bf16.mxu0 %v7142_v57  ;;  %1832 = vmatpush2.bf16.msra.mxu1 %v7141_v58  ;;  %v7207_v57 = vld [vmem:[%s10116_s1 + $0xc] ss:$20 sps:$4 sm:$0xff]  }
  0x44   : > { %1833 = vmatprep.subr.bf16.mxu1 %v7145_v59  ;;  %v421_v58 = vld [vmem:[%s7996_s28 + $0x20] sm:$0xff]  ;;  %v426_v59 = vld [vmem:[%s7996_s28 + $0x48] sm:$0xff] }
  0x46   : > { %1781 = vmatpush2.bf16.msra.mxu0 %v7144_v60  ;;  %v7210_v60 = vld [vmem:[%s10116_s1 + $0x3a4] ss:$20 sps:$4 sm:$0xff]  }
  0x47   : > { %1782 = vmatprep.subr.bf16.mxu0 %v7148_v61  ;;  %1834 = vmatpush2.bf16.msra.mxu1 %v7147_v62  ;;  %v7205_v61 = vld [vmem:[%s10116_s1 + $0x8] ss:$20 sps:$4 sm:$0xff]   ;;  %v8204_v62 = vpack.c.bf16 %v426_v59, %v421_v58  ;;  %v7285_v59 = vld [vmem:[%s10116_s1 + $0x584] ss:$20 sps:$4 sm:$0xff]  }
  0x48   : > { %1835 = vmatprep.subr.bf16.mxu1 %v7151_v63  ;;  %v7213_v63 = vld [vmem:[%s10116_s1 + $0x264] ss:$20 sps:$4 sm:$0xff]   ;;  %v7277_v58 = vld [vmem:[%s10116_s1 + $0x5a8] ss:$20 sps:$4 sm:$0xff]  }
  0x4a   : > { %1783 = vmatpush2.bf16.msra.mxu0 %v7150_v0  ;;  %v7208_v0 = vld [vmem:[%s10116_s1 + $0x3a0] ss:$20 sps:$4 sm:$0xff]  }
  0x4b   : > { %1784 = vmatprep.subr.bf16.mxu0 %v7154_v1  ;;  %1836 = vmatpush2.bf16.msra.mxu1 %v7153_v2  ;;  %v7216_v1 = vld [vmem:[%s10116_s1 + $0x37c] ss:$20 sps:$4 sm:$0xff]   ;;  %v7211_v2 = vld [vmem:[%s10116_s1 + $0x260] ss:$20 sps:$4 sm:$0xff]  }
  0x4c   : > { %1837 = vmatprep.subr.bf16.mxu1 %v7157_v4  ;;  %v7219_v4 = vld [vmem:[%s10116_s1 + $0x23c] ss:$20 sps:$4 sm:$0xff]  }
  0x4e   : > { %1785 = vmatpush2.bf16.msra.mxu0 %v7156_v3  ;;  %v7214_v3 = vld [vmem:[%s10116_s1 + $0x378] ss:$20 sps:$4 sm:$0xff]  }
  0x4f   : > { %1860 = vmatprep.subr.bf16.mxu0 %v7162_v8  ;;  %1838 = vmatpush2.bf16.msra.mxu1 %v7159_v6  ;;  %v436_v6 = vld [vmem:[%s7996_s28 + $0x98] sm:$0xff]  ;;  %s10048_s28 = scalar_lea.vmem [#allocation2], %s5908_s22  }
  0x50   : > { %1913 = vmatprep.subr.bf16.mxu1 %v7165_v13  ;;  %v7217_v8 = vld [vmem:[%s10116_s1 + $0x238] ss:$20 sps:$4 sm:$0xff]   ;;  %v8234_v9 = vpack.c.bf16 %v436_v6, %v431_v5  ;;  %v7223_v13 = vld [vmem:[%s10116_s1 + $0x210] ss:$20 sps:$4 sm:$0xff]  }
  0x51   : > { %1787 = vmatmul.mubr.bf16.vlgmr.msra.gmra.mxu0 %v8083_v14  ;;  %v7292_v5 = vld [vmem:[%s10116_s1 + $0x3f0] ss:$20 sps:$4 sm:$0xff]   ;;  %v7300_v6 = vld [vmem:[%s10116_s1 + $0x3cc] ss:$20 sps:$4 sm:$0xff]  }
  0x52   : > { %1861 = vmatpush1.bf16.msra.mxu0 %v7160_v17  ;;  %1796 = vmatprep.mubr.bf16.mxu0 %v8090_v18  ;;  %v7234_v17 = vld [vmem:[%s10116_s1 + $0x304] ss:$20 sps:$4 sm:$0xff]  }
  0x53   : > { %1840 = vmatmul.mubr.bf16.vlgmr.msra.gmra.mxu1 %v8092_v19  ;;  %1862 = vmatprep.subr.bf16.mxu0 %v7168_v20  ;;  %v7229_v20 = vld [vmem:[%s10116_s1 + $0x1e8] ss:$20 sps:$4 sm:$0xff]  }
  0x54   : > { %1914 = vmatpush1.bf16.msra.mxu1 %v7163_v21  ;;  %1849 = vmatprep.mubr.bf16.mxu1 %v8100_v22  ;;  %v7237_v21 = vld [vmem:[%s10116_s1 + $0x1c4] ss:$20 sps:$4 sm:$0xff]  }
  0x55   : > { %1915 = vmatprep.subr.bf16.mxu1 %v7171_v24  ;;  %v7240_v24 = vld [vmem:[%s10116_s1 + $0x2dc] ss:$20 sps:$4 sm:$0xff]  }
  0x56   : > { %1863 = vmatpush1.bf16.msra.mxu0 %v7166_v23  ;;  %v7232_v23 = vld [vmem:[%s10116_s1 + $0x300] ss:$20 sps:$4 sm:$0xff]  }
  0x57   : > { %1864 = vmatprep.subr.bf16.mxu0 %v7174_v27  ;;  %v7238_v27 = vld [vmem:[%s10116_s1 + $0x2d8] ss:$20 sps:$4 sm:$0xff]  }
  0x58   : > { %1916 = vmatpush1.bf16.msra.mxu1 %v7169_v28  ;;  %v7246_v28 = vld [vmem:[%s10116_s1 + $0x2b4] ss:$20 sps:$4 sm:$0xff]  }
  0x59   : > { %1917 = vmatprep.subr.bf16.mxu1 %v7177_v31  ;;  %1797 = vmatmul.mubr.bf16.gmra.mxu0 %v8125_v32  ;;  %v7244_v31 = vld [vmem:[%s10116_s1 + $0x2b0] ss:$20 sps:$4 sm:$0xff]  }
  0x5a   : > { %1865 = vmatpush1.bf16.msra.mxu0 %v7172_v33  ;;  %1892 = vmatprep.mubr.bf16.mxu0 %v7768_v39  ;;  %v7252_v33 = vld [vmem:[%s10116_s1 + $0x28c] ss:$20 sps:$4 sm:$0xff]  }
  0x5b   : > { %1866 = vmatprep.subr.bf16.mxu0 %v7180_v34  ;;  %1850 = vmatmul.mubr.bf16.gmra.mxu1 %v8133_v35  ;;  %v7247_v34 = vld [vmem:[%s10116_s1 + $0x170] ss:$20 sps:$4 sm:$0xff]  }
  0x5c   : > { %1918 = vmatpush1.bf16.msra.mxu1 %v7175_v36  ;;  %1945 = vmatprep.mubr.bf16.mxu1 %v8012_v49  ;;  %v7255_v36 = vld [vmem:[%s10116_s1 + $0x14c] ss:$20 sps:$4 sm:$0xff]  }
  0x5d   : > { %1919 = vmatprep.subr.bf16.mxu1 %v7183_v37  ;;  %v7250_v37 = vld [vmem:[%s10116_s1 + $0x288] ss:$20 sps:$4 sm:$0xff]  }
  0x5e   : > { %1867 = vmatpush1.bf16.msra.mxu0 %v7178_v38  ;;  %v7258_v38 = vld [vmem:[%s10116_s1 + $0x4e4] ss:$20 sps:$4 sm:$0xff]  }
  0x5f   : > { %1868 = vmatprep.subr.bf16.mxu0 %v7186_v40  ;;  %v7253_v40 = vld [vmem:[%s10116_s1 + $0x148] ss:$20 sps:$4 sm:$0xff]  }
  0x60   : > { %1920 = vmatpush1.bf16.msra.mxu1 %v7181_v41  ;;  %v7261_v41 = vld [vmem:[%s10116_s1 + $0x624] ss:$20 sps:$4 sm:$0xff]  }
  0x61   : > { %1921 = vmatprep.subr.bf16.mxu1 %v7189_v42  ;;  %v7256_v42 = vld [vmem:[%s10116_s1 + $0x4e0] ss:$20 sps:$4 sm:$0xff]  }
  0x62   : > { %1869 = vmatpush1.bf16.msra.mxu0 %v7184_v43  ;;  %v7264_v43 = vld [vmem:[%s10116_s1 + $0x4bc] ss:$20 sps:$4 sm:$0xff]  }
  0x63   : > { %1870 = vmatprep.subr.bf16.mxu0 %v7192_v44  ;;  %v7259_v44 = vld [vmem:[%s10116_s1 + $0x620] ss:$20 sps:$4 sm:$0xff]  }
  0x64   : > { %1922 = vmatpush1.bf16.msra.mxu1 %v7187_v45  ;;  %v7267_v45 = vld [vmem:[%s10116_s1 + $0x5fc] ss:$20 sps:$4 sm:$0xff]  }
  0x65   : > { %1923 = vmatprep.subr.bf16.mxu1 %v7195_v46  ;;  %v7262_v46 = vld [vmem:[%s10116_s1 + $0x4b8] ss:$20 sps:$4 sm:$0xff]  }
  0x66   : > { %1871 = vmatpush1.bf16.msra.mxu0 %v7190_v47  ;;  %v7270_v47 = vld [vmem:[%s10116_s1 + $0x494] ss:$20 sps:$4 sm:$0xff]  }
  0x67   : > { %1872 = vmatprep.subr.bf16.mxu0 %v7198_v48  ;;  %v7265_v48 = vld [vmem:[%s10116_s1 + $0x5f8] ss:$20 sps:$4 sm:$0xff]  }
  0x68   : > { %1924 = vmatpush1.bf16.msra.mxu1 %v7193_v50  ;;  %v7273_v50 = vld [vmem:[%s10116_s1 + $0x5d4] ss:$20 sps:$4 sm:$0xff]  }
  0x69   : > { %1925 = vmatprep.subr.bf16.mxu1 %v7201_v51  ;;  %v7268_v51 = vld [vmem:[%s10116_s1 + $0x490] ss:$20 sps:$4 sm:$0xff]  }
  0x6a   : > { %1873 = vmatpush1.bf16.msra.mxu0 %v7196_v52  ;;  %v7276_v52 = vld [vmem:[%s10116_s1 + $0x46c] ss:$20 sps:$4 sm:$0xff]  }
  0x6b   : > { %1874 = vmatprep.subr.bf16.mxu0 %v7204_v53  ;;  %v7271_v53 = vld [vmem:[%s10116_s1 + $0x5d0] ss:$20 sps:$4 sm:$0xff]  }
  0x6c   : > { %1926 = vmatpush1.bf16.msra.mxu1 %v7199_v54  ;;  %v7279_v54 = vld [vmem:[%s10116_s1 + $0x5ac] ss:$20 sps:$4 sm:$0xff]  }
  0x6d   : > { %1927 = vmatprep.subr.bf16.mxu1 %v7207_v57  ;;  %v7282_v57 = vld [vmem:[%s10116_s1 + $0x444] ss:$20 sps:$4 sm:$0xff]  }
  0x6e   : > { %1875 = vmatpush1.bf16.msra.mxu0 %v7202_v56  ;;  %v7274_v56 = vld [vmem:[%s10116_s1 + $0x468] ss:$20 sps:$4 sm:$0xff]  }
  0x6f   : > { %1966 = vmatprep.subr.bf16.mxu0 %v7210_v60  ;;  %v7280_v60 = vld [vmem:[%s10116_s1 + $0x440] ss:$20 sps:$4 sm:$0xff]  }
  0x70   : > { %1928 = vmatpush1.bf16.msra.mxu1 %v7205_v61  ;;  %v7288_v61 = vld [vmem:[%s10116_s1 + $0x41c] ss:$20 sps:$4 sm:$0xff]  }
  0x71   : > { %1893 = vmatmul.mubr.bf16.vlgmr.msra.gmra.mxu0 %v8204_v62  ;;  %1929 = vmatprep.subr.bf16.mxu1 %v7213_v63  ;;  %v7283_v63 = vld [vmem:[%s10116_s1 + $0x580] ss:$20 sps:$4 sm:$0xff]  }
  0x72   : > { %1967 = vmatpush1.bf16.msra.mxu0 %v7208_v0  ;;  %1902 = vmatprep.mubr.bf16.mxu0 %v7768_v39  ;;  %v7291_v0 = vld [vmem:[%s10116_s1 + $0x55c] ss:$20 sps:$4 sm:$0xff]  }
  0x73   : > { %1968 = vmatprep.subr.bf16.mxu0 %v7216_v1  ;;  %v7286_v1 = vld [vmem:[%s10116_s1 + $0x418] ss:$20 sps:$4 sm:$0xff]  }
  0x74   : > { %1930 = vmatpush2.bf16.msra.mxu1 %v7211_v2  ;;  %v7294_v2 = vld [vmem:[%s10116_s1 + $0x3f4] ss:$20 sps:$4 sm:$0xff]  }
  0x75   : > { %1931 = vmatprep.subr.bf16.mxu1 %v7219_v4  ;;  %v7297_v4 = vld [vmem:[%s10116_s1 + $0x534] ss:$20 sps:$4 sm:$0xff]  }
  0x76   : > { %1969 = vmatpush1.bf16.msra.mxu0 %v7214_v3  ;;  %v7289_v3 = vld [vmem:[%s10116_s1 + $0x558] ss:$20 sps:$4 sm:$0xff]  }
  0x77   : > { %1970 = vmatprep.subr.bf16.mxu0 %v7222_v7  ;;  %v7295_v7 = vld [vmem:[%s10116_s1 + $0x530] ss:$20 sps:$4 sm:$0xff]  }
  0x78   : > { %1932 = vmatpush2.bf16.msra.mxu1 %v7217_v8  ;;  %v7303_v8 = vld [vmem:[%s10116_s1 + $0x50c] ss:$20 sps:$4 sm:$0xff]  }
  0x79   : > { %1903 = vmatmul.mubr.bf16.gmra.mxu0 %v8234_v9  ;;  %1933 = vmatprep.subr.bf16.mxu1 %v7225_v10  ;;  %v7298_v10 = vld [vmem:[%s10116_s1 + $0x3c8] ss:$20 sps:$4 sm:$0xff]  }
  0x7a   : > { %1971 = vmatpush1.bf16.msra.mxu0 %v7220_v11  ;;  %1998 = vmatprep.mubr.bf16.mxu0 %v8026_v55  ;;  %v7304_v11 = vld [vmem:[%s10116_s1 + $0x268] ss:$20 sps:$4 sm:$0xff]  }
  0x7b   : > { %1972 = vmatprep.subr.bf16.mxu0 %v7228_v12  ;;  %v7301_v12 = vld [vmem:[%s10116_s1 + $0x508] ss:$20 sps:$4 sm:$0xff]  }
  0x7c   : > { %1934 = vmatpush2.bf16.msra.mxu1 %v7223_v13  ;;  %v7306_v13 = vld [vmem:[%s10116_s1 + $0x4e8] ss:$20 sps:$4 sm:$0xff]  }
  0x7d   : > { %1935 = vmatprep.subr.bf16.mxu1 %v7231_v15  ;;  %v7305_v15 = vld [vmem:[%s10116_s1 + $0x128] ss:$20 sps:$4 sm:$0xff]  }
  0x7e   : > { %1973 = vmatpush1.bf16.msra.mxu0 %v7226_v16  ;;  %v7308_v16 = vld [vmem:[%s10116_s1 + $0x240] ss:$20 sps:$4 sm:$0xff]  }
  0x7f   : > { %1974 = vmatprep.subr.bf16.mxu0 %v7234_v17  ;;  %v7307_v17 = vld [vmem:[%s10116_s1 + $0x3a8] ss:$20 sps:$4 sm:$0xff]  }
  0x80   : > { %1936 = vmatpush2.bf16.msra.mxu1 %v7229_v20  ;;  %v7310_v20 = vld [vmem:[%s10116_s1 + $0x4c0] ss:$20 sps:$4 sm:$0xff]  }
  0x81   : > { %1937 = vmatprep.subr.bf16.mxu1 %v7237_v21  ;;  %v7309_v21 = vld [vmem:[%s10116_s1 + $0x100] ss:$20 sps:$4 sm:$0xff]  }
  0x82   : > { %1975 = vmatpush1.bf16.msra.mxu0 %v7232_v23  ;;  %v7312_v23 = vld [vmem:[%s10116_s1 + $0x218] ss:$20 sps:$4 sm:$0xff]  }
  0x83   : > { %1976 = vmatprep.subr.bf16.mxu0 %v7240_v24  ;;  %v7311_v24 = vld [vmem:[%s10116_s1 + $0x380] ss:$20 sps:$4 sm:$0xff]  }
  0x84   : > { %1938 = vmatpush2.bf16.msra.mxu1 %v7235_v25  ;;  %v7314_v25 = vld [vmem:[%s10116_s1 + $0x498] ss:$20 sps:$4 sm:$0xff]  }
  0x85   : > { %1939 = vmatprep.subr.bf16.mxu1 %v7243_v26  ;;  %v7313_v26 = vld [vmem:[%s10116_s1 + $0xd8] ss:$20 sps:$4 sm:$0xff]  }
  0x86   : > { %1977 = vmatpush1.bf16.msra.mxu0 %v7238_v27  ;;  %v7316_v27 = vld [vmem:[%s10116_s1 + $0x1f0] ss:$20 sps:$4 sm:$0xff]  }
  0x87   : > { %1978 = vmatprep.subr.bf16.mxu0 %v7246_v28  ;;  %v7315_v28 = vld [vmem:[%s10116_s1 + $0x358] ss:$20 sps:$4 sm:$0xff]  }
  0x88   : > { %1940 = vmatpush2.bf16.msra.mxu1 %v7241_v29  ;;  %v7318_v29 = vld [vmem:[%s10116_s1 + $0x470] ss:$20 sps:$4 sm:$0xff]  }
  0x89   : > { %1941 = vmatprep.subr.bf16.mxu1 %v7249_v30  ;;  %v7317_v30 = vld [vmem:[%s10116_s1 + $0xb0] ss:$20 sps:$4 sm:$0xff]  }
  0x8a   : > { %1979 = vmatpush1.bf16.msra.mxu0 %v7244_v31  ;;  %v7320_v31 = vld [vmem:[%s10116_s1 + $0x1c8] ss:$20 sps:$4 sm:$0xff]  }
  0x8b   : > { %1980 = vmatprep.subr.bf16.mxu0 %v7252_v33  ;;  %v7319_v33 = vld [vmem:[%s10116_s1 + $0x330] ss:$20 sps:$4 sm:$0xff]  }
  0x8c   : > { %1942 = vmatpush2.bf16.msra.mxu1 %v7247_v34  ;;  %v7321_v34 = vld [vmem:[%s10116_s1 + $0x88] ss:$20 sps:$4 sm:$0xff]  }
  0x8d   : > { %1943 = vmatprep.subr.bf16.mxu1 %v7255_v36  ;;  %v7323_v36 = vld [vmem:[%s10116_s1 + $0x308] ss:$20 sps:$4 sm:$0xff]  }
  0x8e   : > { %1981 = vmatpush1.bf16.msra.mxu0 %v7250_v37  ;;  %v7324_v37 = vld [vmem:[%s10116_s1 + $0x1a0] ss:$20 sps:$4 sm:$0xff]  }
  0x8f   : > { %1982 = vmatprep.subr.bf16.mxu0 %v7258_v38  ;;  %v7326_v38 = vld [vmem:[%s10116_s1 + $0x420] ss:$20 sps:$4 sm:$0xff]  }
  0x90   : > { %1944 = vmatpush2.bf16.msra.mxu1 %v7253_v40  ;;  %v7328_v40 = vld [vmem:[%s10116_s1 + $0x178] ss:$20 sps:$4 sm:$0xff]  }
  0x91   : > { %2019 = vmatprep.subr.bf16.mxu1 %v7261_v41  ;;  %v7327_v41 = vld [vmem:[%s10116_s1 + $0x2e0] ss:$20 sps:$4 sm:$0xff]  }
  0x92   : > { %1983 = vmatpush2.bf16.msra.mxu0 %v7256_v42  ;;  %v7330_v42 = vld [vmem:[%s10116_s1 + $0x3f8] ss:$20 sps:$4 sm:$0xff]  }
  0x93   : > { %1946 = vmatmul.mubr.bf16.vlgmr.msra.gmra.mxu1 %v8083_v14  ;;  %1984 = vmatprep.subr.bf16.mxu0 %v7264_v43  ;;  %v7329_v43 = vld [vmem:[%s10116_s1 + $0x38] ss:$20 sps:$4 sm:$0xff]  }
  0x94   : > { %2020 = vmatpush1.bf16.msra.mxu1 %v7259_v44  ;;  %1955 = vmatprep.mubr.bf16.mxu1 %v8090_v18  ;;  %v7332_v44 = vld [vmem:[%s10116_s1 + $0x150] ss:$20 sps:$4 sm:$0xff]  }
  0x95   : > { %2021 = vmatprep.subr.bf16.mxu1 %v7267_v45  ;;  %v7331_v45 = vld [vmem:[%s10116_s1 + $0x2b8] ss:$20 sps:$4 sm:$0xff]  }
  0x96   : > { %1985 = vmatpush2.bf16.msra.mxu0 %v7262_v46  ;;  %v7333_v46 = vld [vmem:[%s10116_s1 + $0x10] ss:$20 sps:$4 sm:$0xff]  }
  0x97   : > { %1986 = vmatprep.subr.bf16.mxu0 %v7270_v47  ;;  %v7334_v47 = vld [vmem:[%s10116_s1 + $0x3d0] ss:$20 sps:$4 sm:$0xff]  }
  0x98   : > { %2022 = vmatpush1.bf16.msra.mxu1 %v7265_v48  ;;  %v7335_v48 = vld [vmem:[%s10116_s1 + $0x290] ss:$20 sps:$4 sm:$0xff]  }
  0x99   : > { %2023 = vmatprep.subr.bf16.mxu1 %v7273_v50  ;;  %v7336_v50 = vld [vmem:[%s10116_s1 + $0x628] ss:$20 sps:$4 sm:$0xff]  }
  0x9a   : > { %1987 = vmatpush2.bf16.msra.mxu0 %v7268_v51  ;;  %v7346_v51 = vld [vmem:[%s10118_s3 + $0xac] ss:$12 sps:$4 sm:$0xff]  }
  0x9b   : > { %1988 = vmatprep.subr.bf16.mxu0 %v7276_v52  ;;  %1956 = vmatmul.mubr.bf16.gmra.mxu1 %v8125_v32  ;;  %v7337_v52 = vld [vmem:[%s10116_s1 + $0x600] ss:$20 sps:$4 sm:$0xff]  }
  0x9c   : > { %2024 = vmatpush1.bf16.msra.mxu1 %v7271_v53  ;;  %2051 = vmatprep.mubr.bf16.mxu1 %v7768_v39  ;;  %v7344_v53 = vld [vmem:[%s10118_s3 + $0xa8] ss:$12 sps:$4 sm:$0xff]  }
  0x9d   : > { %2025 = vmatprep.subr.bf16.mxu1 %v7279_v54  ;;  %v7349_v54 = vld [vmem:[%s10118_s3 + $0x94] ss:$12 sps:$4 sm:$0xff]  }
  0x9e   : > { %1989 = vmatpush2.bf16.msra.mxu0 %v7274_v56  ;;  %v7338_v56 = vld [vmem:[%s10116_s1 + $0x5d8] ss:$20 sps:$4 sm:$0xff]  }
  0x9f   : > { %1990 = vmatprep.subr.bf16.mxu0 %v7282_v57  ;;  %v7347_v57 = vld [vmem:[%s10118_s3 + $0x90] ss:$12 sps:$4 sm:$0xff]  }
  0xa0   : > { %2026 = vmatpush1.bf16.msra.mxu1 %v7277_v58  ;;  %v7352_v58 = vld [vmem:[%s10118_s3 + $0x7c] ss:$12 sps:$4 sm:$0xff]  }
  0xa1   : > { %2027 = vmatprep.subr.bf16.mxu1 %v7285_v59  ;;  %v7353_v59 = vld [vmem:[%s10118_s3 + $0x60] ss:$12 sps:$4 sm:$0xff]  }
  0xa2   : > { %1991 = vmatpush2.bf16.msra.mxu0 %v7280_v60  ;;  %v7358_v60 = vld [vmem:[%s10118_s3 + $0x4c] ss:$12 sps:$4 sm:$0xff]  }
  0xa3   : > { %1992 = vmatprep.subr.bf16.mxu0 %v7288_v61  ;;  %v7342_v61 = vld [vmem:[%s10116_s1 + $0x538] ss:$20 sps:$4 sm:$0xff]  }
  0xa4   : > { %2028 = vmatpush1.bf16.msra.mxu1 %v7283_v63  ;;  %v7359_v63 = vld [vmem:[%s10118_s3 + $0x30] ss:$12 sps:$4 sm:$0xff]  }
  0xa5   : > { %2029 = vmatprep.subr.bf16.mxu1 %v7291_v0  ;;  %v7364_v0 = vld [vmem:[%s10118_s3 + $0x1c] ss:$12 sps:$4 sm:$0xff]  }
  0xa6   : > { %1993 = vmatpush2.bf16.msra.mxu0 %v7286_v1  ;;  %v7343_v1 = vld [vmem:[%s10116_s1 + $0x510] ss:$20 sps:$4 sm:$0xff]  }
  0xa7   : > { %1994 = vmatprep.subr.bf16.mxu0 %v7294_v2  ;;  %v7362_v2 = vld [vmem:[%s10118_s3 + $0x18] ss:$12 sps:$4 sm:$0xff]  }
  0xa8   : > { %2030 = vmatpush1.bf16.msra.mxu1 %v7289_v3  ;;  %v7367_v3 = vld [vmem:[%s10118_s3 + $0x4] ss:$12 sps:$4 sm:$0xff]  }
  0xa9   : > { %2031 = vmatprep.subr.bf16.mxu1 %v7297_v4  ;;  %v7394_v4 = vld [vmem:[%s10118_s3 + $0x22c] ss:$12 sps:$4 sm:$0xff]  }
  0xaa   : > { %1995 = vmatpush2.bf16.msra.mxu0 %v7292_v5  ;;  %v7365_v5 = vld [vmem:[%s10118_s3] ss:$12 sps:$4 sm:$0xff]  }
  0xab   : > { %1996 = vmatprep.subr.bf16.mxu0 %v7300_v6  ;;  %v7370_v6 = vld [vmem:[%s10118_s3 + $0x16c] ss:$12 sps:$4 sm:$0xff]  }
  0xac   : > { %2032 = vmatpush1.bf16.msra.mxu1 %v7295_v7  ;;  %v7392_v7 = vld [vmem:[%s10118_s3 + $0x228] ss:$12 sps:$4 sm:$0xff]  }
  0xad   : > { %2033 = vmatprep.subr.bf16.mxu1 %v7303_v8  ;;  %v7397_v8 = vld [vmem:[%s10118_s3 + $0x214] ss:$12 sps:$4 sm:$0xff]  }
  0xae   : > { %1997 = vmatpush2.bf16.msra.mxu0 %v7298_v10  ;;  %v7368_v10 = vld [vmem:[%s10118_s3 + $0x168] ss:$12 sps:$4 sm:$0xff]  }
  0xaf   : > { %6397 = vmatprep.subr.bf16.mxu0 %v7304_v11  ;;  %v7373_v11 = vld [vmem:[%s10118_s3 + $0x154] ss:$12 sps:$4 sm:$0xff]  }
  0xb0   : > { %2034 = vmatpush1.bf16.msra.mxu1 %v7301_v12  ;;  %v7395_v12 = vld [vmem:[%s10118_s3 + $0x210] ss:$12 sps:$4 sm:$0xff]  }
  0xb1   : > { %1999 = vmatmul.mubr.bf16.vlgmr.msra.gmra.mxu0 %v8092_v19  ;;  %6425 = vmatprep.subr.bf16.mxu1 %v7306_v13  ;;  %v7400_v13 = vld [vmem:[%s10118_s3 + $0x1fc] ss:$12 sps:$4 sm:$0xff]  }
  0xb2   : > { %6398 = vmatpush3.bf16.msra.mxu0 %v7305_v15  ;;  %2008 = vmatprep.mubr.bf16.mxu0 %v8100_v22  ;;  %v7371_v15 = vld [vmem:[%s10118_s3 + $0x150] ss:$12 sps:$4 sm:$0xff]  }
  0xb3   : > { %2052 = vmatmul.mubr.bf16.vlgmr.msra.gmra.mxu1 %v8204_v62  ;;  %6399 = vmatprep.subr.bf16.mxu0 %v7308_v16  ;;  %v7376_v16 = vld [vmem:[%s10118_s3 + $0x13c] ss:$12 sps:$4 sm:$0xff]  }
  0xb4   : > { %6426 = vmatpush3.bf16.msra.mxu1 %v7307_v17  ;;  %2061 = vmatprep.mubr.bf16.mxu1 %v7768_v39  ;;  %v7403_v17 = vld [vmem:[%s10118_s3 + $0x1e4] ss:$12 sps:$4 sm:$0xff]  }
  0xb5   : > { %6427 = vmatprep.subr.bf16.mxu1 %v7310_v20  ;;  %v7374_v20 = vld [vmem:[%s10118_s3 + $0x138] ss:$12 sps:$4 sm:$0xff]  }
  0xb6   : > { %6400 = vmatpush3.bf16.msra.mxu0 %v7309_v21  ;;  %v7379_v21 = vld [vmem:[%s10118_s3 + $0x124] ss:$12 sps:$4 sm:$0xff]  }
  0xb7   : > { %6401 = vmatprep.subr.bf16.mxu0 %v7312_v23  ;;  %v7401_v23 = vld [vmem:[%s10118_s3 + $0x1e0] ss:$12 sps:$4 sm:$0xff]  }
  0xb8   : > { %6428 = vmatpush3.bf16.msra.mxu1 %v7311_v24  ;;  %v7406_v24 = vld [vmem:[%s10118_s3 + $0x1cc] ss:$12 sps:$4 sm:$0xff]  }
  0xb9   : > { %2009 = vmatmul.mubr.bf16.gmra.mxu0 %v8133_v35  ;;  %6429 = vmatprep.subr.bf16.mxu1 %v7314_v25  ;;  %v7377_v25 = vld [vmem:[%s10118_s3 + $0x120] ss:$12 sps:$4 sm:$0xff]  }
  0xba   : > { %6402 = vmatpush3.bf16.msra.mxu0 %v7313_v26  ;;  %2104 = vmatprep.mubr.bf16.mxu0 %v8012_v49  ;;  %v7322_v49 = vld [vmem:[%s10116_s1 + $0x448] ss:$20 sps:$4 sm:$0xff]   ;;  %v7382_v26 = vld [vmem:[%s10118_s3 + $0x10c] ss:$12 sps:$4 sm:$0xff]  }
  0xbb   : > { %2062 = vmatmul.mubr.bf16.gmra.mxu1 %v8234_v9  ;;  %6403 = vmatprep.subr.bf16.mxu0 %v7316_v27  ;;  %v7404_v27 = vld [vmem:[%s10118_s3 + $0x1c8] ss:$12 sps:$4 sm:$0xff]  }
  0xbc   : > { %6430 = vmatpush3.bf16.msra.mxu1 %v7315_v28  ;;  %2153 = vmatprep.mubr.bf16.mxu1 %v8026_v55  ;;  %v7325_v55 = vld [vmem:[%s10116_s1 + $0x60] ss:$20 sps:$4 sm:$0xff]  }
  0xbd   : > { %6431 = vmatprep.subr.bf16.mxu1 %v7318_v29  ;;  %v7409_v28 = vld [vmem:[%s10118_s3 + $0x1b4] ss:$12 sps:$4 sm:$0xff]  }
  0xbe   : > { %6404 = vmatpush3.bf16.msra.mxu0 %v7317_v30  ;;  %v7380_v29 = vld [vmem:[%s10118_s3 + $0x108] ss:$12 sps:$4 sm:$0xff]  }
  0xbf   : > { %6405 = vmatprep.subr.bf16.mxu0 %v7320_v31  ;;  %v7385_v30 = vld [vmem:[%s10118_s3 + $0xf4] ss:$12 sps:$4 sm:$0xff]   ;;  %v7407_v31 = vld [vmem:[%s10118_s3 + $0x1b0] ss:$12 sps:$4 sm:$0xff]  }
  0xc0   : > { %6432 = vmatpush3.bf16.msra.mxu1 %v7319_v33  ;;  %v7383_v33 = vld [vmem:[%s10118_s3 + $0xf0] ss:$12 sps:$4 sm:$0xff]  }
  0xc1   : > { %6433 = vmatprep.subr.bf16.mxu1 %v7322_v49  ;;  %v7388_v49 = vld [vmem:[%s10118_s3 + $0xdc] ss:$12 sps:$4 sm:$0xff]  }
  0xc2   : > { %6406 = vmatpush3.bf16.msra.mxu0 %v7321_v34  ;;  %v7412_v34 = vld [vmem:[%s10118_s3 + $0x19c] ss:$12 sps:$4 sm:$0xff]  }
  0xc3   : > { %6407 = vmatprep.subr.bf16.mxu0 %v7324_v37  ;;  %v7386_v37 = vld [vmem:[%s10118_s3 + $0xd8] ss:$12 sps:$4 sm:$0xff]  }
  0xc4   : > { %6434 = vmatpush3.bf16.msra.mxu1 %v7323_v36  ;;  %v7410_v36 = vld [vmem:[%s10118_s3 + $0x198] ss:$12 sps:$4 sm:$0xff]  }
  0xc5   : > { %6435 = vmatprep.subr.bf16.mxu1 %v7326_v38  ;;  %v7391_v38 = vld [vmem:[%s10118_s3 + $0xc4] ss:$12 sps:$4 sm:$0xff]  }
  0xc6   : > { %6408 = vmatpush3.bf16.msra.mxu0 %v7325_v55  ;;  %v7415_v55 = vld [vmem:[%s10118_s3 + $0x184] ss:$12 sps:$4 sm:$0xff]  }
  0xc7   : > { %6409 = vmatprep.subr.bf16.mxu0 %v7328_v40  ;;  %v7413_v40 = vld [vmem:[%s10118_s3 + $0x180] ss:$12 sps:$4 sm:$0xff]  }
  0xc8   : > { %6436 = vmatpush3.bf16.msra.mxu1 %v7327_v41  ;;  %v7418_v41 = vld [vmem:[%s10118_s3 + $0x2ec] ss:$12 sps:$4 sm:$0xff]  }
  0xc9   : > { %6437 = vmatprep.subr.bf16.mxu1 %v7330_v42  ;;  %v7389_v42 = vld [vmem:[%s10118_s3 + $0xc0] ss:$12 sps:$4 sm:$0xff]  }
  0xca   : > { %6410 = vmatpush3.bf16.msra.mxu0 %v7329_v43  ;;  %v7416_v43 = vld [vmem:[%s10118_s3 + $0x2e8] ss:$12 sps:$4 sm:$0xff]  }
  0xcb   : > { %6411 = vmatprep.subr.bf16.mxu0 %v7332_v44  ;;  %v7421_v44 = vld [vmem:[%s10118_s3 + $0x2d4] ss:$12 sps:$4 sm:$0xff]  }
  0xcc   : > { %6438 = vmatpush3.bf16.msra.mxu1 %v7331_v45  ;;  %v7419_v45 = vld [vmem:[%s10118_s3 + $0x2d0] ss:$12 sps:$4 sm:$0xff]  }
  0xcd   : > { %6439 = vmatprep.subr.bf16.mxu1 %v7334_v47 }
  0xce   : > { %6412 = vmatpush3.bf16.msra.mxu0 %v7333_v46  ;;  %v7424_v46 = vld [vmem:[%s10118_s3 + $0x2bc] ss:$12 sps:$4 sm:$0xff]  }
  0xcf   : > { %6821 = vmatprep.subr.bf16.mxu0 %v7336_v50 }
  0xd0   : > { %6440 = vmatpush3.bf16.msra.mxu1 %v7335_v48  ;;  %v7422_v48 = vld [vmem:[%s10118_s3 + $0x2b8] ss:$12 sps:$4 sm:$0xff]  }
  0xd1   : > { %2105 = vmatmul.mubr.bf16.vlgmr.msra.gmra.mxu0 %v8083_v14  ;;  %3046 = vmatprep.subr.bf16.mxu1 %v7346_v51  ;;  %v7339_v14 = vld [vmem:[%s10116_s1 + $0x5b0] ss:$20 sps:$4 sm:$0xff]  }
  0xd2   : > { %6822 = vmatpush3.bf16.msra.mxu0 %v7336_v50  ;;  %2112 = vmatprep.mubr.bf16.mxu0 %v8090_v18  ;;  %v7350_v18 = vld [vmem:[%s10118_s3 + $0x78] ss:$12 sps:$4 sm:$0xff]  }
  0xd3   : > { %2154 = vmatmul.mubr.bf16.vlgmr.msra.gmra.mxu1 %v8092_v19  ;;  %6823 = vmatprep.subr.bf16.mxu0 %v7337_v52  ;;  %v7355_v19 = vld [vmem:[%s10118_s3 + $0x64] ss:$12 sps:$4 sm:$0xff]  }
  0xd4   : > { %2161 = vmatprep.mubr.bf16.mxu1 %v8100_v22  ;;  %3047 = vmatpush1.bf16.msra.mxu1 %v7344_v53  ;;  %v7340_v22 = vld [vmem:[%s10116_s1 + $0x588] ss:$20 sps:$4 sm:$0xff]   ;;  %v7427_v50 = vld [vmem:[%s10118_s3 + $0x2a4] ss:$12 sps:$4 sm:$0xff]   ;;  %v7430_v53 = vld [vmem:[%s10118_s3 + $0x28c] ss:$12 sps:$4 sm:$0xff]  }
  0xd5   : > { %3048 = vmatprep.subr.bf16.mxu1 %v7349_v54  ;;  %v7457_v54 = vld [vmem:[%s10118_s3 + $0x3ac] ss:$12 sps:$4 sm:$0xff]  }
  0xd6   : > { %6824 = vmatpush3.bf16.msra.mxu0 %v7337_v52  ;;  %v7425_v52 = vld [vmem:[%s10118_s3 + $0x2a0] ss:$12 sps:$4 sm:$0xff]  }
  0xd7   : > { %6825 = vmatprep.subr.bf16.mxu0 %v7338_v56 }
  0xd8   : > { %3049 = vmatpush1.bf16.msra.mxu1 %v7347_v57  ;;  %v7428_v57 = vld [vmem:[%s10118_s3 + $0x288] ss:$12 sps:$4 sm:$0xff]  }
  0xd9   : > { %2113 = vmatmul.mubr.bf16.gmra.mxu0 %v8125_v32  ;;  %3050 = vmatprep.subr.bf16.mxu1 %v7352_v58  ;;  %v7341_v32 = vld [vmem:[%s10116_s1 + $0x560] ss:$20 sps:$4 sm:$0xff]  }
  0xda   : > { %6826 = vmatpush3.bf16.msra.mxu0 %v7338_v56  ;;  %6837 = vmatprep.mubr.bf16.mxu0 %v8204_v62  ;;  %v7356_v62 = vld [vmem:[%s10118_s3 + $0x48] ss:$12 sps:$4 sm:$0xff]  }
  0xdb   : > { %6827 = vmatprep.subr.bf16.mxu0 %v7339_v14  ;;  %2162 = vmatmul.mubr.bf16.gmra.mxu1 %v8133_v35  ;;  %v7361_v35 = vld [vmem:[%s10118_s3 + $0x34] ss:$12 sps:$4 sm:$0xff]  }
  0xdc   : > { %3051 = vmatpush1.bf16.msra.mxu1 %v7350_v18  ;;  %v7433_v58 = vld [vmem:[%s10118_s3 + $0x274] ss:$12 sps:$4 sm:$0xff]  }
  0xdd   : > { %3052 = vmatprep.subr.bf16.mxu1 %v7355_v19 }
  0xde   : > { %6828 = vmatpush3.bf16.msra.mxu0 %v7339_v14  ;;  %v689_v14 = vlaneseq }
  0xdf   : > { %6829 = vmatprep.subr.bf16.mxu0 %v7340_v22 }
  0xe0   : > { %3053 = vmatpush1.bf16.msra.mxu1 %v7353_v59  ;;  %v7436_v59 = vld [vmem:[%s10118_s3 + $0x25c] ss:$12 sps:$4 sm:$0xff]  }
  0xe1   : > { %3054 = vmatprep.subr.bf16.mxu1 %v7358_v60 }
  0xe2   : > { %6830 = vmatpush3.bf16.msra.mxu0 %v7340_v22  ;;  %v7431_v22 = vld [vmem:[%s10118_s3 + $0x270] ss:$12 sps:$4 sm:$0xff]  }
  0xe3   : > { %6831 = vmatprep.subr.bf16.mxu0 %v7341_v32 }
  0xe4   : > { %3055 = vmatpush1.bf16.msra.mxu1 %v7356_v62 }
  0xe5   : > { %3056 = vmatprep.subr.bf16.mxu1 %v7361_v35  ;;  %v7434_v35 = vld [vmem:[%s10118_s3 + $0x258] ss:$12 sps:$4 sm:$0xff]  }
  0xe6   : > { %6832 = vmatpush3.bf16.msra.mxu0 %v7341_v32  ;;  %v8729_v32 = vshrl.u32 %v689_v14, 7 }
  0xe7   : > { %6833 = vmatprep.subr.bf16.mxu0 %v7342_v61 }
  0xe8   : > { %3057 = vmatpush1.bf16.msra.mxu1 %v7359_v63  ;;  %v7439_v63 = vld [vmem:[%s10118_s3 + $0x244] ss:$12 sps:$4 sm:$0xff]  }
  0xe9   : > { %3058 = vmatprep.subr.bf16.mxu1 %v7364_v0  ;;  %v8738_v0 = vsub.s32 0, %v8729_v32 }
  0xea   : > { %6834 = vmatpush3.bf16.msra.mxu0 %v7342_v61 }
  0xeb   : > { %6835 = vmatprep.subr.bf16.mxu0 %v7343_v1 }
  0xec   : > { %3059 = vmatpush1.bf16.msra.mxu1 %v7362_v2  ;;  %v8746_v2 = vld [vmem:[%s10117_s2] sm:$0x1f] }
  0xed   : > { %3060 = vmatprep.subr.bf16.mxu1 %v7367_v3 }
  0xee   : > { %6836 = vmatpush3.bf16.msra.mxu0 %v7343_v1  ;;  %v8741_v1 = vsub.s32 1, %v8729_v32 }
  0xef   : > { %3099 = vmatprep.subr.bf16.mxu0 %v7394_v4  ;;  %v7437_v4 = vld [vmem:[%s10118_s3 + $0x240] ss:$12 sps:$4 sm:$0xff]  }
  0xf0   : > { %3061 = vmatpush1.bf16.msra.mxu1 %v7365_v5  ;;  %v7440_v5 = vld [vmem:[%s10118_s3 + $0x170] ss:$12 sps:$4 sm:$0xff]  }
  0xf1   : > { %6838 = vmatmul.mubr.bf16.vlgmr.msra.gmra.mxu0 %v8234_v9  ;;  %3062 = vmatprep.subr.bf16.mxu1 %v7370_v6  ;;  %v7398_v9 = vld [vmem:[%s10118_s3 + $0x1f8] ss:$12 sps:$4 sm:$0xff]  }
  0xf2   : > { %3100 = vmatpush1.bf16.msra.mxu0 %v7392_v7 }
  0xf3   : > { %3101 = vmatprep.subr.bf16.mxu0 %v7397_v8  ;;  %v696_v8 = vrot.slane %v8746_v2, %v8741_v1 }
  0xf4   : > { %3063 = vmatpush2.bf16.msra.mxu1 %v7368_v10  ;;  %v692_v10 = vrot.slane %v8746_v2, %v8738_v0 }
  0xf5   : > { %3064 = vmatprep.subr.bf16.mxu1 %v7373_v11 }
  0xf6   : > { %3102 = vmatpush1.bf16.msra.mxu0 %v7395_v12 }
  0xf7   : > { %3103 = vmatprep.subr.bf16.mxu0 %v7400_v13 }
  0xf8   : > { %3065 = vmatpush2.bf16.msra.mxu1 %v7371_v15 }
  0xf9   : > { %3066 = vmatprep.subr.bf16.mxu1 %v7376_v16 }
  0xfa   : > { %3104 = vmatpush1.bf16.msra.mxu0 %v7398_v9 }
  0xfb   : > { %3105 = vmatprep.subr.bf16.mxu0 %v7403_v17 }
  0xfc   : > { %3067 = vmatpush2.bf16.msra.mxu1 %v7374_v20 }
  0xfd   : > { %3068 = vmatprep.subr.bf16.mxu1 %v7379_v21 }
  0xfe   : > { %3106 = vmatpush1.bf16.msra.mxu0 %v7401_v23 }
  0xff   : > { %3107 = vmatprep.subr.bf16.mxu0 %v7406_v24 }
 0x100   : > { %3069 = vmatpush2.bf16.msra.mxu1 %v7377_v25 }
 0x101   : > { %3070 = vmatprep.subr.bf16.mxu1 %v7382_v26 }
 0x102   : > { %3108 = vmatpush1.bf16.msra.mxu0 %v7404_v27 }
 0x103   : > { %3109 = vmatprep.subr.bf16.mxu0 %v7409_v28 }
 0x104   : > { %3071 = vmatpush2.bf16.msra.mxu1 %v7380_v29 }
 0x105   : > { %3072 = vmatprep.subr.bf16.mxu1 %v7385_v30 }
 0x106   : > { %3110 = vmatpush1.bf16.msra.mxu0 %v7407_v31 }
 0x107   : > { %3111 = vmatprep.subr.bf16.mxu0 %v7412_v34 }
 0x108   : > { %3073 = vmatpush2.bf16.msra.mxu1 %v7383_v33 }
 0x109   : > { %3074 = vmatprep.subr.bf16.mxu1 %v7388_v49 }
 0x10a   : > { %3112 = vmatpush1.bf16.msra.mxu0 %v7410_v36 }
 0x10b   : > { %3113 = vmatprep.subr.bf16.mxu0 %v7415_v55 }
 0x10c   : > { %3075 = vmatpush2.bf16.msra.mxu1 %v7386_v37 }
 0x10d   : > { %3076 = vmatprep.subr.bf16.mxu1 %v7391_v38 }
 0x10e   : > { %3114 = vmatpush1.bf16.msra.mxu0 %v7413_v40  ;;  %v7455_v40 = vld [vmem:[%s10118_s3 + $0x3a8] ss:$12 sps:$4 sm:$0xff]  }
 0x10f   : > { %3115 = vmatprep.subr.bf16.mxu0 %v7418_v41 }
 0x110   : > { %3077 = vmatpush2.bf16.msra.mxu1 %v7389_v42 }
 0x111   : > { %v1788_v47 = vpop.f32.mrf.mxu0  ;;  %3152 = vmatprep.subr.bf16.mxu1 %v7457_v54 }
 0x112   : > { %3116 = vmatpush2.bf16.msra.mxu0 %v7416_v43  ;;  %v1789_v17 = vadd.f32 %v1788_v47, %v692_v10 }
 0x113   : > { %3117 = vmatprep.subr.bf16.mxu0 %v7421_v44  ;;  %v1790_v51 = vpop.f32.mrf.mxu0  ;;  %v1841_v18 = vpop.f32.mrf.mxu1 }
 0x114   : > { %v1791_v16 = vadd.f32 %v1790_v51, %v696_v8  ;;  %v1842_v27 = vadd.f32 %v1841_v18, %v1789_v17  ;;  %v7460_v51 = vld [vmem:[%s10118_s3 + $0x390] ss:$12 sps:$4 sm:$0xff]   ;;  %v703_v17 = vsub.s32 3, %v8729_v32 }
 0x115   : > { %v1792_v56 = vpop.f32.mrf.mxu0  ;;  %v1843_v62 = vpop.f32.mrf.mxu1 }
 0x116   : > { %3118 = vmatpush2.bf16.msra.mxu0 %v7419_v45  ;;  %v1793_v13 = vadd.f32 %v1792_v56, %v692_v10  ;;  %v1844_v25 = vadd.f32 %v1843_v62, %v1791_v16  ;;  %v7462_v45 = vld [vmem:[%s10118_s3 + $0x394] ss:$12 sps:$4 sm:$0xff]   ;;  %v7466_v56 = vld [vmem:[%s10118_s3 + $0x37c] ss:$12 sps:$4 sm:$0xff]   ;;  %v7474_v62 = vld [vmem:[%s10118_s3 + $0x34c] ss:$12 sps:$4 sm:$0xff]  }
 0x117   : > { %3119 = vmatprep.subr.bf16.mxu0 %v7424_v46  ;;  %v1794_v19 = vpop.f32.mrf.mxu0  ;;  %v1845_v3 = vpop.f32.mrf.mxu1  ;;  %v8844_v16 = vsub.s32 2, %v8729_v32 }
 0x118   : > { %v1795_v9 = vadd.f32 %v1794_v19, %v696_v8  ;;  %v1846_v23 = vadd.f32 %v1845_v3, %v1793_v13  ;;  %v7464_v19 = vld [vmem:[%s10118_s3 + $0x378] ss:$12 sps:$4 sm:$0xff]   ;;  %v7482_v3 = vld [vmem:[%s10118_s3 + $0x31c] ss:$12 sps:$4 sm:$0xff]  }
 0x119   : > { %v1798_v60 = vpop.f32.mrf.mxu0  ;;  %v1847_v7 = vpop.f32.mrf.mxu1 }
 0x11a   : > { %3120 = vmatpush2.bf16.msra.mxu0 %v7422_v48  ;;  %v1848_v26 = vadd.f32 %v1847_v7, %v1795_v9  ;;  %v1799_v41 = vadd.f32 %v1798_v60, %v692_v10  ;;  %v7468_v60 = vld [vmem:[%s10118_s3 + $0x360] ss:$12 sps:$4 sm:$0xff]  }
 0x11b   : > { %3121 = vmatprep.subr.bf16.mxu0 %v7427_v50  ;;  %v1800_v61 = vpop.f32.mrf.mxu0  ;;  %v1851_v11 = vpop.f32.mrf.mxu1  ;;  %v7484_v7 = vld [vmem:[%s10118_s3 + $0x300] ss:$12 sps:$4 sm:$0xff]  }
 0x11c   : > { %v1801_v37 = vadd.f32 %v1800_v61, %v696_v8  ;;  %v7478_v61 = vld [vmem:[%s10118_s3 + $0x334] ss:$12 sps:$4 sm:$0xff]  }
 0x11d   : > { %v1802_v6 = vpop.f32.mrf.mxu0  ;;  %v1853_v20 = vpop.f32.mrf.mxu1 }
 0x11e   : > { %3122 = vmatpush2.bf16.msra.mxu0 %v7425_v52  ;;  %v1803_v34 = vadd.f32 %v1802_v6, %v692_v10  ;;  %v1854_v48 = vadd.f32 %v1853_v20, %v1801_v37  ;;  %v1852_v52 = vadd.f32 %v1851_v11, %v1799_v41  ;;  %v7486_v6 = vld [vmem:[%s10118_s3 + $0x304] ss:$12 sps:$4 sm:$0xff]   ;;  %v700_v20 = vrot.slane %v8746_v2, %v8844_v16 }
 0x11f   : > { %3123 = vmatprep.subr.bf16.mxu0 %v7430_v53  ;;  %v1804_v12 = vpop.f32.mrf.mxu0  ;;  %v1855_v28 = vpop.f32.mrf.mxu1  ;;  %v7488_v10 = vld [vmem:[%s10118_s3 + $0x2f0] ss:$12 sps:$4 sm:$0xff]  }
 0x120   : > { %v1805_v55 = vadd.f32 %v1804_v12, %v696_v8  ;;  %v1856_v46 = vadd.f32 %v1855_v28, %v1803_v34 }
 0x121   : > { %v1857_v42 = vpop.f32.mrf.mxu1 }
 0x122   : > { %3124 = vmatpush2.bf16.msra.mxu0 %v7428_v57  ;;  %v1858_v50 = vadd.f32 %v1857_v42, %v1805_v55 }
 0x123   : > { %3125 = vmatprep.subr.bf16.mxu0 %v7433_v58 }
 0x126   : > { %3126 = vmatpush2.bf16.msra.mxu0 %v7431_v22 }
 0x127   : > { %3127 = vmatprep.subr.bf16.mxu0 %v7436_v59  ;;  %v7470_v59 = vld [vmem:[%s10118_s3 + $0x364] ss:$12 sps:$4 sm:$0xff]  }
 0x12a   : > { %3128 = vmatpush2.bf16.msra.mxu0 %v7434_v35  ;;  %v7472_v35 = vld [vmem:[%s10118_s3 + $0x348] ss:$12 sps:$4 sm:$0xff]  }
 0x12b   : > { %3129 = vmatprep.subr.bf16.mxu0 %v7439_v63  ;;  %v7476_v63 = vld [vmem:[%s10118_s3 + $0x330] ss:$12 sps:$4 sm:$0xff]  }
 0x12e   : > { %3130 = vmatpush2.bf16.msra.mxu0 %v7437_v4  ;;  %v7480_v4 = vld [vmem:[%s10118_s3 + $0x318] ss:$12 sps:$4 sm:$0xff]  }
 0x12f   : > { %6463 = vmatprep.subr.bf16.mxu0 %v7440_v5 }
 0x131   : > { %v1894_v15 = vpop.f32.mrf.mxu0 }
 0x132   : > { %v8764_v49 = vadd.f32 %v1894_v15, %v1842_v27 }
 0x133   : > { %v1896_v21 = vpop.f32.mrf.mxu0 }
 0x134   : > { %v8760_v31 = vadd.f32 %v1896_v21, %v1844_v25 }
 0x135   : > { %v1898_v24 = vpop.f32.mrf.mxu0 }
 0x136   : > { %v8758_v29 = vadd.f32 %v1898_v24, %v1846_v23  ;;  %v704_v23 = vrot.slane %v8746_v2, %v703_v17  ;;  %v7443_v17 = vld [vmem:[%s10118_s3 + $0x98] ss:$12 sps:$4 sm:$0xff]  }
 0x137   : > { %v1900_v30 = vpop.f32.mrf.mxu0 }
 0x138   : > { %v8762_v33 = vadd.f32 %v1900_v30, %v1848_v26  ;;  %v8775_v43 = vpack.c.bf16 %v8758_v29, %v8764_v49 }
 0x139   : > { %v1904_v36 = vpop.f32.mrf.mxu0 }
 0x13a   : > { %v8768_v38 = vpack.c.bf16 %v8762_v33, %v8760_v31  ;;  %v8794_v14 = vadd.f32 %v1904_v36, %v1852_v52 }
 0x13b   : > { %v1906_v44 = vpop.f32.mrf.mxu0 }
 0x13c   : > { %3078 = vmatprep.mubr.bf16.mxu1 %v8768_v38  ;;  %v8790_v57 = vadd.f32 %v1906_v44, %v1854_v48 }
 0x13d   : > { %v1908_v47 = vpop.f32.mrf.mxu0  ;;  %3079 = vmatmul.mubr.bf16.vlgmr.msra.gmra.mxu1 %v8775_v43 }
 0x13e   : > { %3153 = vmatpush1.bf16.msra.mxu1 %v7455_v40  ;;  %v8785_v53 = vadd.f32 %v1908_v47, %v1856_v46 }
 0x13f   : > { %v1910_v54 = vpop.f32.mrf.mxu0  ;;  %3154 = vmatprep.subr.bf16.mxu1 %v7462_v45 }
 0x140   : > { %v8792_v58 = vadd.f32 %v1910_v54, %v1858_v50  ;;  %v8805_v22 = vpack.c.bf16 %v8785_v53, %v8794_v14 }
 0x142   : > { %v8798_v18 = vpack.c.bf16 %v8792_v58, %v8790_v57  ;;  %3155 = vmatpush1.bf16.msra.mxu1 %v7460_v51 }
 0x143   : > { %3156 = vmatprep.subr.bf16.mxu1 %v7466_v56 }
 0x144   : > { %3088 = vmatprep.mubr.bf16.mxu1 %v8798_v18 }
 0x145   : > { %3089 = vmatmul.mubr.bf16.gmra.mxu1 %v8805_v22 }
 0x146   : > { %3157 = vmatpush1.bf16.msra.mxu1 %v7464_v19  ;;  %3184 = vmatprep.mubr.bf16.mxu1 %v7768_v39 }
 0x147   : > { %3158 = vmatprep.subr.bf16.mxu1 %v7470_v59 }
 0x14a   : > { %3159 = vmatpush1.bf16.msra.mxu1 %v7468_v60 }
 0x14b   : > { %3160 = vmatprep.subr.bf16.mxu1 %v7474_v62 }
 0x14e   : > { %3161 = vmatpush1.bf16.msra.mxu1 %v7472_v35 }
 0x14f   : > { %3162 = vmatprep.subr.bf16.mxu1 %v7478_v61 }
 0x152   : > { %3163 = vmatpush1.bf16.msra.mxu1 %v7476_v63 }
 0x153   : > { %v1947_v5 = vpop.f32.mrf.mxu1  ;;  %3164 = vmatprep.subr.bf16.mxu1 %v7482_v3  ;;  %v7441_v3 = vld [vmem:[%s10118_s3 + $0xb0] ss:$12 sps:$4 sm:$0xff]  }
 0x154   : > { %v1948_v25 = vadd.f32 %v1947_v5, %v700_v20 }
 0x155   : > { %v1949_v8 = vpop.f32.mrf.mxu1 }
 0x156   : > { %3165 = vmatpush1.bf16.msra.mxu1 %v7480_v4  ;;  %v1950_v28 = vadd.f32 %v1949_v8, %v704_v23 }
 0x157   : > { %3166 = vmatprep.subr.bf16.mxu1 %v7486_v6  ;;  %v1951_v11 = vpop.f32.mrf.mxu1 }
 0x158   : > { %v1952_v30 = vadd.f32 %v1951_v11, %v700_v20 }
 0x159   : > { %v1953_v12 = vpop.f32.mrf.mxu1 }
 0x15a   : > { %3167 = vmatpush1.bf16.msra.mxu1 %v7484_v7  ;;  %v1954_v37 = vadd.f32 %v1953_v12, %v704_v23  ;;  %v7442_v7 = vld [vmem:[%s10118_s3 + $0x158] ss:$12 sps:$4 sm:$0xff]  }
 0x15b   : > { %6491 = vmatprep.subr.bf16.mxu1 %v7488_v10  ;;  %v1957_v13 = vpop.f32.mrf.mxu1 }
 0x15c   : > { %v1958_v41 = vadd.f32 %v1957_v13, %v700_v20 }
 0x15d   : > { %v1959_v15 = vpop.f32.mrf.mxu1 }
 0x15e   : > { %v1960_v46 = vadd.f32 %v1959_v15, %v704_v23 }
 0x15f   : > { %v1961_v9 = vpop.f32.mrf.mxu1 }
 0x160   : > { %v1962_v52 = vadd.f32 %v1961_v9, %v700_v20 }
 0x161   : > { %v1963_v21 = vpop.f32.mrf.mxu1 }
 0x162   : > { %v1964_v35 = vadd.f32 %v1963_v21, %v704_v23  ;;  %v7444_v21 = vld [vmem:[%s10118_s3 + $0x140] ss:$12 sps:$4 sm:$0xff]  }
 0x171   : > { %v2000_v24 = vpop.f32.mrf.mxu0 }
 0x172   : > { %v2001_v42 = vadd.f32 %v2000_v24, %v1948_v25 }
 0x173   : > { %v2002_v26 = vpop.f32.mrf.mxu0  ;;  %v2053_v27 = vpop.f32.mrf.mxu1 }
 0x174   : > { %v2003_v55 = vadd.f32 %v2002_v26, %v1950_v28  ;;  %v8856_v19 = vadd.f32 %v2053_v27, %v2001_v42  ;;  %v7445_v26 = vld [vmem:[%s10118_s3 + $0x80] ss:$12 sps:$4 sm:$0xff]   ;;  %v7446_v27 = vld [vmem:[%s10118_s3 + $0x128] ss:$12 sps:$4 sm:$0xff]  }
 0x175   : > { %v2004_v34 = vpop.f32.mrf.mxu0  ;;  %v2055_v36 = vpop.f32.mrf.mxu1  ;;  %v7447_v28 = vld [vmem:[%s10118_s3 + $0x68] ss:$12 sps:$4 sm:$0xff]  }
 0x176   : > { %v2005_v40 = vadd.f32 %v2004_v34, %v1952_v30  ;;  %v8852_v54 = vadd.f32 %v2055_v36, %v2003_v55  ;;  %v7448_v30 = vld [vmem:[%s10118_s3 + $0x110] ss:$12 sps:$4 sm:$0xff]   ;;  %v7450_v36 = vld [vmem:[%s10118_s3 + $0xf8] ss:$12 sps:$4 sm:$0xff]   ;;  %v7452_v55 = vld [vmem:[%s10118_s3 + $0xe0] ss:$12 sps:$4 sm:$0xff]  }
 0x177   : > { %v2006_v44 = vpop.f32.mrf.mxu0  ;;  %v2057_v45 = vpop.f32.mrf.mxu1  ;;  %v7449_v34 = vld [vmem:[%s10118_s3 + $0x50] ss:$12 sps:$4 sm:$0xff]   ;;  %v7454_v42 = vld [vmem:[%s10118_s3 + $0xc8] ss:$12 sps:$4 sm:$0xff]  }
 0x178   : > { %v2007_v47 = vadd.f32 %v2006_v44, %v1954_v37  ;;  %v8850_v48 = vadd.f32 %v2057_v45, %v2005_v40  ;;  %v7451_v37 = vld [vmem:[%s10118_s3 + $0x38] ss:$12 sps:$4 sm:$0xff]  }
 0x179   : > { %v2010_v50 = vpop.f32.mrf.mxu0  ;;  %v2059_v51 = vpop.f32.mrf.mxu1 }
 0x17a   : > { %v8854_v56 = vadd.f32 %v2059_v51, %v2007_v47  ;;  %v2011_v59 = vadd.f32 %v2010_v50, %v1958_v41  ;;  %v8867_v4 = vpack.c.bf16 %v8850_v48, %v8856_v19  ;;  %v7453_v41 = vld [vmem:[%s10118_s3 + $0x20] ss:$12 sps:$4 sm:$0xff]   ;;  %v7459_v47 = vld [vmem:[%s10118_s3 + $0x3b0] ss:$12 sps:$4 sm:$0xff]  }
 0x17b   : > { %v2012_v60 = vpop.f32.mrf.mxu0  ;;  %v2063_v62 = vpop.f32.mrf.mxu1 }
 0x17c   : > { %v8860_v61 = vpack.c.bf16 %v8854_v56, %v8852_v54  ;;  %v2013_v63 = vadd.f32 %v2012_v60, %v1960_v46  ;;  %v8873_v10 = vadd.f32 %v2063_v62, %v2011_v59  ;;  %v7458_v46 = vld [vmem:[%s10118_s3 + $0x8] ss:$12 sps:$4 sm:$0xff]  }
 0x17d   : > { %v2014_v5 = vpop.f32.mrf.mxu0  ;;  %v2065_v6 = vpop.f32.mrf.mxu1 }
 0x17e   : > { %v2015_v8 = vadd.f32 %v2014_v5, %v1962_v52  ;;  %3131 = vmatprep.mubr.bf16.mxu0 %v8860_v61  ;;  %v8876_v13 = vadd.f32 %v2065_v6, %v2013_v63  ;;  %v7463_v52 = vld [vmem:[%s10118_s3 + $0x398] ss:$12 sps:$4 sm:$0xff]   ;;  %v7471_v6 = vld [vmem:[%s10118_s3 + $0x368] ss:$12 sps:$4 sm:$0xff]  }
 0x17f   : > { %v2016_v11 = vpop.f32.mrf.mxu0  ;;  %v2067_v12 = vpop.f32.mrf.mxu1  ;;  %3132 = vmatmul.mubr.bf16.vlgmr.msra.gmra.mxu0 %v8867_v4 }
 0x180   : > { %v2017_v15 = vadd.f32 %v2016_v11, %v1964_v35  ;;  %v8878_v9 = vadd.f32 %v2067_v12, %v2015_v8  ;;  %6464 = vmatpush3.bf16.msra.mxu0 %v7441_v3  ;;  %v7467_v35 = vld [vmem:[%s10118_s3 + $0x380] ss:$12 sps:$4 sm:$0xff]   ;;  %v7475_v11 = vld [vmem:[%s10118_s3 + $0x350] ss:$12 sps:$4 sm:$0xff]   ;;  %v707_v12 = vsub.s32 4, %v8729_v32 }
 0x181   : > { %v2069_v20 = vpop.f32.mrf.mxu1  ;;  %6465 = vmatprep.subr.bf16.mxu0 %v7442_v7 }
 0x182   : > { %v8886_v23 = vadd.f32 %v2069_v20, %v2017_v15  ;;  %v8890_v24 = vpack.c.bf16 %v8878_v9, %v8873_v10  ;;  %v7479_v20 = vld [vmem:[%s10118_s3 + $0x338] ss:$12 sps:$4 sm:$0xff]  }
 0x184   : > { %v8894_v25 = vpack.c.bf16 %v8886_v23, %v8876_v13  ;;  %6466 = vmatpush3.bf16.msra.mxu0 %v7443_v17 }
 0x185   : > { %6467 = vmatprep.subr.bf16.mxu0 %v7444_v21  ;;  %v708_v21 = vrot.slane %v8746_v2, %v707_v12 }
 0x186   : > { %3141 = vmatprep.mubr.bf16.mxu0 %v8894_v25 }
 0x187   : > { %3142 = vmatmul.mubr.bf16.gmra.mxu0 %v8890_v24 }
 0x188   : > { %6468 = vmatpush3.bf16.msra.mxu0 %v7445_v26  ;;  %3237 = vmatprep.mubr.bf16.mxu0 %v8768_v38 }
 0x189   : > { %6469 = vmatprep.subr.bf16.mxu0 %v7446_v27 }
 0x18c   : > { %6470 = vmatpush3.bf16.msra.mxu0 %v7447_v28 }
 0x18d   : > { %6471 = vmatprep.subr.bf16.mxu0 %v7448_v30 }
 0x190   : > { %6472 = vmatpush3.bf16.msra.mxu0 %v7449_v34 }
 0x191   : > { %6473 = vmatprep.subr.bf16.mxu0 %v7450_v36  ;;  %v6413_v40 = vpop.f32.mrf.mxu0 }
 0x193   : > { %v6414_v44 = vpop.f32.mrf.mxu0  ;;  %v6441_v45 = vpop.f32.mrf.mxu1 }
 0x194   : > { %6474 = vmatpush3.bf16.msra.mxu0 %v7451_v37  ;;  %v6415_v26 = vadd.f32 %v6414_v44, %v6413_v40  ;;  %v7483_v37 = vld [vmem:[%s10118_s3 + $0x320] ss:$12 sps:$4 sm:$0xff]  }
 0x195   : > { %6475 = vmatprep.subr.bf16.mxu0 %v7452_v55  ;;  %v6416_v50 = vpop.f32.mrf.mxu0  ;;  %v6442_v51 = vpop.f32.mrf.mxu1 }
 0x196   : > { %v2107_v55 = vadd.f32 %v6415_v26, %v708_v21  ;;  %v7498_v26 = vld [vmem:[%s10118_s3 + $0x2c0] ss:$12 sps:$4 sm:$0xff]  }
 0x197   : > { %v6417_v59 = vpop.f32.mrf.mxu0  ;;  %v6444_v60 = vpop.f32.mrf.mxu1 }
 0x198   : > { %6476 = vmatpush3.bf16.msra.mxu0 %v7453_v41  ;;  %v6418_v27 = vadd.f32 %v6417_v59, %v6416_v50  ;;  %v6443_v41 = vadd.f32 %v6442_v51, %v6441_v45  ;;  %v7487_v50 = vld [vmem:[%s10118_s3 + $0x308] ss:$12 sps:$4 sm:$0xff]  }
 0x199   : > { %6477 = vmatprep.subr.bf16.mxu0 %v7454_v42  ;;  %v6419_v62 = vpop.f32.mrf.mxu0  ;;  %v6445_v63 = vpop.f32.mrf.mxu1 }
 0x19a   : > { %v2110_v42 = vadd.f32 %v6418_v27, %v708_v21  ;;  %v2156_v59 = vadd.f32 %v6443_v41, %v2107_v55  ;;  %v7495_v27 = vld [vmem:[%s10121_s6 + $0x210] ss:$12 sps:$4 sm:$0xff]  }
 0x19b   : > { %v6420_v3 = vpop.f32.mrf.mxu0  ;;  %v6447_v5 = vpop.f32.mrf.mxu1  ;;  %v7507_v55 = vld [vmem:[%s10121_s6 + $0x1e4] ss:$12 sps:$4 sm:$0xff]  }
 0x19c   : > { %6478 = vmatpush3.bf16.msra.mxu0 %v7458_v46  ;;  %v6421_v34 = vadd.f32 %v6420_v3, %v6419_v62  ;;  %v6446_v46 = vadd.f32 %v6445_v63, %v6444_v60  ;;  %v7489_v63 = vld [vmem:[%s10118_s3 + $0x230] ss:$12 sps:$4 sm:$0xff]  }
 0x19d   : > { %6841 = vmatprep.subr.bf16.mxu0 %v7459_v47  ;;  %v6422_v7 = vpop.f32.mrf.mxu0  ;;  %v6448_v8 = vpop.f32.mrf.mxu1  ;;  %v7508_v41 = vld [vmem:[%s10118_s3 + $0x290] ss:$12 sps:$4 sm:$0xff]  }
 0x19e   : > { %v2115_v2 = vadd.f32 %v6421_v34, %v708_v21  ;;  %v6449_v40 = vadd.f32 %v6448_v8, %v6447_v5  ;;  %v2159_v62 = vadd.f32 %v6446_v46, %v2110_v42  ;;  %v7492_v8 = vld [vmem:[%s10121_s6 + $0x22c] ss:$12 sps:$4 sm:$0xff]   ;;  %v7503_v34 = vld [vmem:[%s10118_s3 + $0x2a8] ss:$12 sps:$4 sm:$0xff]   ;;  %v7509_v46 = vld [vmem:[%s10118_s3 + $0x1d0] ss:$12 sps:$4 sm:$0xff]  }
 0x19f   : > { %3238 = vmatmul.mubr.bf16.vlgmr.msra.gmra.mxu0 %v8775_v43  ;;  %v6423_v15 = vpop.f32.mrf.mxu0  ;;  %v6450_v17 = vpop.f32.mrf.mxu1  ;;  %v7505_v42 = vld [vmem:[%s10121_s6 + $0x1e0] ss:$12 sps:$4 sm:$0xff]  }
 0x1a0   : > { %3245 = vmatprep.mubr.bf16.mxu0 %v8798_v18  ;;  %6842 = vmatpush3.bf16.msra.mxu0 %v7459_v47  ;;  %v6424_v28 = vadd.f32 %v6423_v15, %v6422_v7  ;;  %v2164_v51 = vadd.f32 %v6449_v40, %v2115_v2  ;;  %v7490_v15 = vld [vmem:[%s10121_s6 + $0x228] ss:$12 sps:$4 sm:$0xff]   ;;  %v7514_v2 = vld [vmem:[%s10118_s3 + $0x1b8] ss:$12 sps:$4 sm:$0xff]  }
 0x1a1   : > { %6843 = vmatprep.subr.bf16.mxu0 %v7463_v52  ;;  %v6451_v30 = vpop.f32.mrf.mxu1  ;;  %v7517_v40 = vld [vmem:[%s10121_s6 + $0x1b4] ss:$12 sps:$4 sm:$0xff]  }
 0x1a2   : > { %v2118_v47 = vadd.f32 %v6424_v28, %v708_v21  ;;  %v7497_v21 = vld [vmem:[%s10121_s6 + $0x214] ss:$12 sps:$4 sm:$0xff]  }
 0x1a3   : > { %v7499_v28 = vld [vmem:[%s10118_s3 + $0x200] ss:$12 sps:$4 sm:$0xff]  }
 0x1a4   : > { %6844 = vmatpush3.bf16.msra.mxu0 %v7463_v52  ;;  %v6452_v52 = vadd.f32 %v6451_v30, %v6450_v17  ;;  %v7502_v30 = vld [vmem:[%s10121_s6 + $0x1fc] ss:$12 sps:$4 sm:$0xff]  }
 0x1a5   : > { %6845 = vmatprep.subr.bf16.mxu0 %v7467_v35 }
 0x1a6   : > { %v2167_v3 = vadd.f32 %v6452_v52, %v2118_v47  ;;  %v7512_v47 = vld [vmem:[%s10121_s6 + $0x1cc] ss:$12 sps:$4 sm:$0xff]  }
 0x1a7   : > { %3246 = vmatmul.mubr.bf16.gmra.mxu0 %v8805_v22  ;;  %v7513_v52 = vld [vmem:[%s10118_s3 + $0x278] ss:$12 sps:$4 sm:$0xff]  }
 0x1a8   : > { %6846 = vmatpush3.bf16.msra.mxu0 %v7467_v35 }
 0x1a9   : > { %6847 = vmatprep.subr.bf16.mxu0 %v7471_v6 }
 0x1ac   : > { %6848 = vmatpush3.bf16.msra.mxu0 %v7471_v6 }
 0x1ad   : > { %6849 = vmatprep.subr.bf16.mxu0 %v7475_v11 }
 0x1b0   : > { %6850 = vmatpush3.bf16.msra.mxu0 %v7475_v11  ;;  %v7493_v11 = vld [vmem:[%s10118_s3 + $0x2d8] ss:$12 sps:$4 sm:$0xff]  }
 0x1b1   : > { %v6839_v36 = vpop.f32.mrf.mxu0  ;;  %6851 = vmatprep.subr.bf16.mxu0 %v7479_v20 }
 0x1b2   : > { %v8980_v12 = vadd.f32 %v6839_v36, %v2164_v51  ;;  %v7500_v36 = vld [vmem:[%s10121_s6 + $0x1f8] ss:$12 sps:$4 sm:$0xff]   ;;  %v7524_v51 = vld [vmem:[%s10118_s3 + $0x188] ss:$12 sps:$4 sm:$0xff]  }
 0x1b3   : > { %v2204_v35 = vpop.f32.mrf.mxu0 }
 0x1b4   : > { %6852 = vmatpush3.bf16.msra.mxu0 %v7479_v20  ;;  %v8961_v7 = vadd.f32 %v2204_v35, %v2156_v59  ;;  %v7494_v20 = vld [vmem:[%s10118_s3 + $0x218] ss:$12 sps:$4 sm:$0xff]   ;;  %v7510_v35 = vld [vmem:[%s10121_s6 + $0x1c8] ss:$12 sps:$4 sm:$0xff]   ;;  %v7519_v59 = vld [vmem:[%s10118_s3 + $0x1a0] ss:$12 sps:$4 sm:$0xff]  }
 0x1b5   : > { %v6840_v44 = vpop.f32.mrf.mxu0  ;;  %6853 = vmatprep.subr.bf16.mxu0 %v7483_v37 }
 0x1b6   : > { %v8965_v60 = vadd.f32 %v6840_v44, %v2167_v3  ;;  %v7518_v44 = vld [vmem:[%s10118_s3 + $0x260] ss:$12 sps:$4 sm:$0xff]   ;;  %v7523_v3 = vld [vmem:[%s10118_s3 + $0x248] ss:$12 sps:$4 sm:$0xff]  }
 0x1b7   : > { %v2207_v6 = vpop.f32.mrf.mxu0 }
 0x1b8   : > { %v8963_v45 = vadd.f32 %v2207_v6, %v2159_v62  ;;  %6854 = vmatpush3.bf16.msra.mxu0 %v7483_v37  ;;  %v8988_v17 = vpack.c.bf16 %v8965_v60, %v8980_v12  ;;  %v7504_v37 = vld [vmem:[%s10118_s3 + $0x1e8] ss:$12 sps:$4 sm:$0xff]   ;;  %v7520_v6 = vld [vmem:[%s10121_s6 + $0x198] ss:$12 sps:$4 sm:$0xff]  }
 0x1b9   : > { %6855 = vmatprep.subr.bf16.mxu0 %v7487_v50  ;;  %v7522_v62 = vld [vmem:[%s10121_s6 + $0x19c] ss:$12 sps:$4 sm:$0xff]  }
 0x1ba   : > { %v8972_v5 = vpack.c.bf16 %v8963_v45, %v8961_v7 }
 0x1bc   : > { %6856 = vmatpush3.bf16.msra.mxu0 %v7487_v50  ;;  %3185 = vmatmul.mubr.bf16.vlgmr.msra.gmra.mxu1 %v8972_v5  ;;  %v7515_v50 = vld [vmem:[%s10121_s6 + $0x1b0] ss:$12 sps:$4 sm:$0xff]  }
 0x1bd   : > { %6492 = vmatpush3.bf16.msra.mxu1 %v7489_v63  ;;  %6857 = vmatprep.mubr.bf16.mxu0 %v8972_v5  ;;  %v7527_v63 = vld [vmem:[%s10121_s6 + $0x184] ss:$12 sps:$4 sm:$0xff]  }
 0x1be   : > { %4234 = vmatprep.subr.bf16.mxu0 %v7492_v8  ;;  %6493 = vmatprep.subr.bf16.mxu1 %v7493_v11  ;;  %v7530_v8 = vld [vmem:[%s10121_s6 + $0xac] ss:$12 sps:$4 sm:$0xff]  }
 0x1bf   : > { %6858 = vmatmul.mubr.bf16.vlgmr.msra.gmra.mxu0 %v8988_v17  ;;  %3194 = vmatprep.mubr.bf16.mxu1 %v7768_v39  ;;  %v7525_v11 = vld [vmem:[%s10121_s6 + $0x180] ss:$12 sps:$4 sm:$0xff]  }
 0x1c0   : > { %4235 = vmatpush1.bf16.msra.mxu0 %v7490_v15  ;;  %4266 = vmatprep.mubr.bf16.mxu0 %v8860_v61  ;;  %v7528_v15 = vld [vmem:[%s10121_s6 + $0xa8] ss:$12 sps:$4 sm:$0xff]  }
 0x1c1   : > { %6494 = vmatpush3.bf16.msra.mxu1 %v7494_v20  ;;  %4236 = vmatprep.subr.bf16.mxu0 %v7497_v21  ;;  %v7533_v20 = vld [vmem:[%s10121_s6 + $0x2ec] ss:$12 sps:$4 sm:$0xff]   ;;  %v7536_v21 = vld [vmem:[%s10121_s6 + $0x94] ss:$12 sps:$4 sm:$0xff]  }
 0x1c2   : > { %6495 = vmatprep.subr.bf16.mxu1 %v7498_v26  ;;  %v7531_v26 = vld [vmem:[%s10121_s6 + $0x2e8] ss:$12 sps:$4 sm:$0xff]  }
 0x1c4   : > { %4237 = vmatpush1.bf16.msra.mxu0 %v7495_v27  ;;  %3195 = vmatmul.mubr.bf16.gmra.mxu1 %v8988_v17  ;;  %v7534_v27 = vld [vmem:[%s10121_s6 + $0x90] ss:$12 sps:$4 sm:$0xff]  }
 0x1c5   : > { %6496 = vmatpush3.bf16.msra.mxu1 %v7499_v28  ;;  %3286 = vmatprep.mubr.bf16.mxu1 %v8860_v61  ;;  %v7539_v28 = vld [vmem:[%s10121_s6 + $0x2d4] ss:$12 sps:$4 sm:$0xff]  }
 0x1c6   : > { %4238 = vmatprep.subr.bf16.mxu0 %v7502_v30  ;;  %6497 = vmatprep.subr.bf16.mxu1 %v7503_v34  ;;  %v7542_v30 = vld [vmem:[%s10121_s6 + $0x7c] ss:$12 sps:$4 sm:$0xff]  }
 0x1c7   : > { %v7537_v34 = vld [vmem:[%s10121_s6 + $0x2d0] ss:$12 sps:$4 sm:$0xff]  }
 0x1c8   : > { %4239 = vmatpush1.bf16.msra.mxu0 %v7500_v36  ;;  %v7540_v36 = vld [vmem:[%s10121_s6 + $0x78] ss:$12 sps:$4 sm:$0xff]  }
 0x1c9   : > { %6498 = vmatpush3.bf16.msra.mxu1 %v7504_v37  ;;  %4240 = vmatprep.subr.bf16.mxu0 %v7507_v55  ;;  %v7545_v37 = vld [vmem:[%s10121_s6 + $0x2bc] ss:$12 sps:$4 sm:$0xff]   ;;  %v7548_v55 = vld [vmem:[%s10121_s6 + $0x64] ss:$12 sps:$4 sm:$0xff]  }
 0x1ca   : > { %6499 = vmatprep.subr.bf16.mxu1 %v7508_v41  ;;  %v7543_v41 = vld [vmem:[%s10121_s6 + $0x2b8] ss:$12 sps:$4 sm:$0xff]  }
 0x1cc   : > { %4241 = vmatpush1.bf16.msra.mxu0 %v7505_v42  ;;  %v7546_v42 = vld [vmem:[%s10121_s6 + $0x60] ss:$12 sps:$4 sm:$0xff]  }
 0x1cd   : > { %6500 = vmatpush3.bf16.msra.mxu1 %v7509_v46  ;;  %4242 = vmatprep.subr.bf16.mxu0 %v7512_v47  ;;  %v7551_v46 = vld [vmem:[%s10121_s6 + $0x2a4] ss:$12 sps:$4 sm:$0xff]   ;;  %v7554_v47 = vld [vmem:[%s10121_s6 + $0x4c] ss:$12 sps:$4 sm:$0xff]  }
 0x1ce   : > { %6501 = vmatprep.subr.bf16.mxu1 %v7513_v52  ;;  %v7549_v52 = vld [vmem:[%s10121_s6 + $0x2a0] ss:$12 sps:$4 sm:$0xff]  }
 0x1d0   : > { %4243 = vmatpush1.bf16.msra.mxu0 %v7510_v35  ;;  %v7552_v35 = vld [vmem:[%s10121_s6 + $0x48] ss:$12 sps:$4 sm:$0xff]  }
 0x1d1   : > { %6502 = vmatpush3.bf16.msra.mxu1 %v7514_v2  ;;  %4244 = vmatprep.subr.bf16.mxu0 %v7517_v40  ;;  %v7557_v2 = vld [vmem:[%s10121_s6 + $0x28c] ss:$12 sps:$4 sm:$0xff]   ;;  %v7560_v40 = vld [vmem:[%s10121_s6 + $0x34] ss:$12 sps:$4 sm:$0xff]  }
 0x1d2   : > { %6503 = vmatprep.subr.bf16.mxu1 %v7518_v44  ;;  %v7555_v44 = vld [vmem:[%s10121_s6 + $0x288] ss:$12 sps:$4 sm:$0xff]  }
 0x1d4   : > { %4245 = vmatpush1.bf16.msra.mxu0 %v7515_v50  ;;  %v7558_v50 = vld [vmem:[%s10121_s6 + $0x30] ss:$12 sps:$4 sm:$0xff]  }
 0x1d5   : > { %6504 = vmatpush3.bf16.msra.mxu1 %v7519_v59  ;;  %4246 = vmatprep.subr.bf16.mxu0 %v7522_v62  ;;  %v7563_v59 = vld [vmem:[%s10121_s6 + $0x274] ss:$12 sps:$4 sm:$0xff]   ;;  %v7566_v62 = vld [vmem:[%s10121_s6 + $0x1c] ss:$12 sps:$4 sm:$0xff]  }
 0x1d6   : > { %6505 = vmatprep.subr.bf16.mxu1 %v7523_v3  ;;  %v7561_v3 = vld [vmem:[%s10121_s6 + $0x270] ss:$12 sps:$4 sm:$0xff]  }
 0x1d8   : > { %4247 = vmatpush1.bf16.msra.mxu0 %v7520_v6  ;;  %v7564_v6 = vld [vmem:[%s10121_s6 + $0x18] ss:$12 sps:$4 sm:$0xff]  }
 0x1d9   : > { %6506 = vmatpush3.bf16.msra.mxu1 %v7524_v51  ;;  %4248 = vmatprep.subr.bf16.mxu0 %v7527_v63  ;;  %v7569_v51 = vld [vmem:[%s10121_s6 + $0x25c] ss:$12 sps:$4 sm:$0xff]   ;;  %v7572_v63 = vld [vmem:[%s10121_s6 + $0x4] ss:$12 sps:$4 sm:$0xff]  }
 0x1da   : > { %4181 = vmatprep.subr.bf16.mxu1 %v7530_v8  ;;  %v7567_v8 = vld [vmem:[%s10121_s6 + $0x258] ss:$12 sps:$4 sm:$0xff]  }
 0x1dc   : > { %3287 = vmatmul.mubr.bf16.vlgmr.msra.gmra.mxu1 %v8867_v4  ;;  %4249 = vmatpush1.bf16.msra.mxu0 %v7525_v11  ;;  %v7570_v11 = vld [vmem:[%s10121_s6] ss:$12 sps:$4 sm:$0xff]  }
 0x1dd   : > { %3294 = vmatprep.mubr.bf16.mxu1 %v8894_v25  ;;  %4182 = vmatpush1.bf16.msra.mxu1 %v7528_v15  ;;  %v7575_v15 = vld [vmem:[%s10121_s6 + $0x244] ss:$12 sps:$4 sm:$0xff]  }
 0x1de   : > { %4250 = vmatprep.subr.bf16.mxu0 %v7533_v20  ;;  %4183 = vmatprep.subr.bf16.mxu1 %v7536_v21  ;;  %v7578_v20 = vld [vmem:[%s10121_s6 + $0x16c] ss:$12 sps:$4 sm:$0xff]  }
 0x1df   : > { %v7573_v21 = vld [vmem:[%s10121_s6 + $0x240] ss:$12 sps:$4 sm:$0xff]  }
 0x1e0   : > { %4251 = vmatpush2.bf16.msra.mxu0 %v7531_v26  ;;  %v7576_v26 = vld [vmem:[%s10121_s6 + $0x168] ss:$12 sps:$4 sm:$0xff]  }
 0x1e1   : > { %4184 = vmatpush1.bf16.msra.mxu1 %v7534_v27  ;;  %4252 = vmatprep.subr.bf16.mxu0 %v7539_v28  ;;  %v7579_v27 = vld [vmem:[%s10121_s6 + $0x170] ss:$12 sps:$4 sm:$0xff]   ;;  %v7582_v28 = vld [vmem:[%s10121_s6 + $0x154] ss:$12 sps:$4 sm:$0xff]  }
 0x1e2   : > { %4185 = vmatprep.subr.bf16.mxu1 %v7542_v30  ;;  %v7583_v30 = vld [vmem:[%s10121_s6 + $0xb0] ss:$12 sps:$4 sm:$0xff]  }
 0x1e4   : > { %3295 = vmatmul.mubr.bf16.gmra.mxu1 %v8890_v24  ;;  %4253 = vmatpush2.bf16.msra.mxu0 %v7537_v34  ;;  %v7580_v34 = vld [vmem:[%s10121_s6 + $0x150] ss:$12 sps:$4 sm:$0xff]  }
 0x1e5   : > { %4186 = vmatpush1.bf16.msra.mxu1 %v7540_v36  ;;  %4213 = vmatprep.mubr.bf16.mxu1 %v8768_v38  ;;  %v7584_v36 = vld [vmem:[%s10121_s6 + $0x158] ss:$12 sps:$4 sm:$0xff]  }
 0x1e6   : > { %4254 = vmatprep.subr.bf16.mxu0 %v7545_v37  ;;  %4187 = vmatprep.subr.bf16.mxu1 %v7548_v55  ;;  %v7587_v37 = vld [vmem:[%s10121_s6 + $0x13c] ss:$12 sps:$4 sm:$0xff]   ;;  %v7588_v55 = vld [vmem:[%s10121_s6 + $0x98] ss:$12 sps:$4 sm:$0xff]  }
 0x1e8   : > { %4255 = vmatpush2.bf16.msra.mxu0 %v7543_v41  ;;  %v7585_v41 = vld [vmem:[%s10121_s6 + $0x138] ss:$12 sps:$4 sm:$0xff]  }
 0x1e9   : > { %4188 = vmatpush1.bf16.msra.mxu1 %v7546_v42  ;;  %4256 = vmatprep.subr.bf16.mxu0 %v7551_v46  ;;  %v7589_v42 = vld [vmem:[%s10121_s6 + $0x140] ss:$12 sps:$4 sm:$0xff]   ;;  %v7592_v46 = vld [vmem:[%s10121_s6 + $0x124] ss:$12 sps:$4 sm:$0xff]  }
 0x1ea   : > { %4189 = vmatprep.subr.bf16.mxu1 %v7554_v47  ;;  %v7593_v47 = vld [vmem:[%s10121_s6 + $0x80] ss:$12 sps:$4 sm:$0xff]  }
 0x1ec   : > { %4257 = vmatpush2.bf16.msra.mxu0 %v7549_v52  ;;  %v7590_v52 = vld [vmem:[%s10121_s6 + $0x120] ss:$12 sps:$4 sm:$0xff]  }
 0x1ed   : > { %4190 = vmatpush1.bf16.msra.mxu1 %v7552_v35  ;;  %4258 = vmatprep.subr.bf16.mxu0 %v7557_v2  ;;  %v7594_v35 = vld [vmem:[%s10121_s6 + $0x128] ss:$12 sps:$4 sm:$0xff]   ;;  %v7597_v2 = vld [vmem:[%s10121_s6 + $0x10c] ss:$12 sps:$4 sm:$0xff]  }
 0x1ee   : > { %4191 = vmatprep.subr.bf16.mxu1 %v7560_v40  ;;  %v7598_v40 = vld [vmem:[%s10121_s6 + $0x68] ss:$12 sps:$4 sm:$0xff]  }
 0x1f0   : > { %4259 = vmatpush2.bf16.msra.mxu0 %v7555_v44  ;;  %v7595_v44 = vld [vmem:[%s10121_s6 + $0x108] ss:$12 sps:$4 sm:$0xff]  }
 0x1f1   : > { %4192 = vmatpush1.bf16.msra.mxu1 %v7558_v50  ;;  %4260 = vmatprep.subr.bf16.mxu0 %v7563_v59  ;;  %v7599_v50 = vld [vmem:[%s10121_s6 + $0x110] ss:$12 sps:$4 sm:$0xff]   ;;  %v7602_v59 = vld [vmem:[%s10121_s6 + $0xf4] ss:$12 sps:$4 sm:$0xff]  }
 0x1f2   : > { %4193 = vmatprep.subr.bf16.mxu1 %v7566_v62  ;;  %v7600_v62 = vld [vmem:[%s10121_s6 + $0xf0] ss:$12 sps:$4 sm:$0xff]  }
 0x1f4   : > { %4261 = vmatpush2.bf16.msra.mxu0 %v7561_v3  ;;  %v7604_v3 = vld [vmem:[%s10121_s6 + $0xf8] ss:$12 sps:$4 sm:$0xff]  }
 0x1f5   : > { %4194 = vmatpush1.bf16.msra.mxu1 %v7564_v6  ;;  %4262 = vmatprep.subr.bf16.mxu0 %v7569_v51  ;;  %v7607_v6 = vld [vmem:[%s10121_s6 + $0xdc] ss:$12 sps:$4 sm:$0xff]   ;;  %v7608_v51 = vld [vmem:[%s10121_s6 + $0x38] ss:$12 sps:$4 sm:$0xff]  }
 0x1f6   : > { %4195 = vmatprep.subr.bf16.mxu1 %v7572_v63  ;;  %v7605_v63 = vld [vmem:[%s10121_s6 + $0xd8] ss:$12 sps:$4 sm:$0xff]  }
 0x1f8   : > { %4263 = vmatpush2.bf16.msra.mxu0 %v7567_v8  ;;  %v7609_v8 = vld [vmem:[%s10121_s6 + $0xe0] ss:$12 sps:$4 sm:$0xff]  }
 0x1f9   : > { %4196 = vmatpush1.bf16.msra.mxu1 %v7570_v11  ;;  %4264 = vmatprep.subr.bf16.mxu0 %v7575_v15  ;;  %v7612_v11 = vld [vmem:[%s10121_s6 + $0xc4] ss:$12 sps:$4 sm:$0xff]   ;;  %v7613_v15 = vld [vmem:[%s10121_s6 + $0x20] ss:$12 sps:$4 sm:$0xff]  }
 0x1fa   : > { %4197 = vmatprep.subr.bf16.mxu1 %v7578_v20  ;;  %v7610_v20 = vld [vmem:[%s10121_s6 + $0xc0] ss:$12 sps:$4 sm:$0xff]  }
 0x1fc   : > { %4265 = vmatpush2.bf16.msra.mxu0 %v7573_v21  ;;  %v7614_v21 = vld [vmem:[%s10121_s6 + $0xc8] ss:$12 sps:$4 sm:$0xff]  }
 0x1fd   : > { %4198 = vmatpush2.bf16.msra.mxu1 %v7576_v26  ;;  %6529 = vmatprep.subr.bf16.mxu0 %v7579_v27  ;;  %v7617_v26 = vld [vmem:[%s10121_s6 + $0x3ac] ss:$12 sps:$4 sm:$0xff]   ;;  %v7618_v27 = vld [vmem:[%s10121_s6 + $0x8] ss:$12 sps:$4 sm:$0xff]  }
 0x1fe   : > { %4199 = vmatprep.subr.bf16.mxu1 %v7582_v28  ;;  %v7615_v28 = vld [vmem:[%s10121_s6 + $0x3a8] ss:$12 sps:$4 sm:$0xff]  }
 0x1ff   : > { %4267 = vmatmul.mubr.bf16.vlgmr.msra.gmra.mxu0 %v8867_v4 }
 0x200   : > { %4276 = vmatprep.mubr.bf16.mxu0 %v8894_v25  ;;  %6530 = vmatpush3.bf16.msra.mxu0 %v7583_v30  ;;  %v7619_v30 = vld [vmem:[%s10121_s6 + $0x3b0] ss:$12 sps:$4 sm:$0xff]  }
 0x201   : > { %4200 = vmatpush2.bf16.msra.mxu1 %v7580_v34  ;;  %6531 = vmatprep.subr.bf16.mxu0 %v7584_v36  ;;  %v7622_v34 = vld [vmem:[%s10121_s6 + $0x394] ss:$12 sps:$4 sm:$0xff]   ;;  %v7620_v36 = vld [vmem:[%s10121_s6 + $0x390] ss:$12 sps:$4 sm:$0xff]  }
 0x202   : > { %4201 = vmatprep.subr.bf16.mxu1 %v7587_v37  ;;  %v7623_v37 = vld [vmem:[%s10121_s6 + $0x398] ss:$12 sps:$4 sm:$0xff]  }
 0x204   : > { %6532 = vmatpush3.bf16.msra.mxu0 %v7588_v55  ;;  %v7626_v55 = vld [vmem:[%s10121_s6 + $0x37c] ss:$12 sps:$4 sm:$0xff]  }
 0x205   : > { %4202 = vmatpush2.bf16.msra.mxu1 %v7585_v41  ;;  %6533 = vmatprep.subr.bf16.mxu0 %v7589_v42  ;;  %v7624_v41 = vld [vmem:[%s10121_s6 + $0x378] ss:$12 sps:$4 sm:$0xff]   ;;  %v7627_v42 = vld [vmem:[%s10121_s6 + $0x380] ss:$12 sps:$4 sm:$0xff]  }
 0x206   : > { %4203 = vmatprep.subr.bf16.mxu1 %v7592_v46  ;;  %v7630_v46 = vld [vmem:[%s10121_s6 + $0x364] ss:$12 sps:$4 sm:$0xff]  }
 0x207   : > { %4277 = vmatmul.mubr.bf16.gmra.mxu0 %v8890_v24 }
 0x208   : > { %6534 = vmatpush3.bf16.msra.mxu0 %v7593_v47  ;;  %4372 = vmatprep.mubr.bf16.mxu0 %v8768_v38  ;;  %v7603_v38 = vld [vmem:[%s10121_s6 + $0x50] ss:$12 sps:$4 sm:$0xff]   ;;  %v7634_v47 = vld [vmem:[%s10121_s6 + $0x34c] ss:$12 sps:$4 sm:$0xff]  }
 0x209   : > { %4204 = vmatpush2.bf16.msra.mxu1 %v7590_v52  ;;  %6535 = vmatprep.subr.bf16.mxu0 %v7594_v35  ;;  %v7632_v52 = vld [vmem:[%s10121_s6 + $0x348] ss:$12 sps:$4 sm:$0xff]   ;;  %v7635_v35 = vld [vmem:[%s10121_s6 + $0x350] ss:$12 sps:$4 sm:$0xff]  }
 0x20a   : > { %4205 = vmatprep.subr.bf16.mxu1 %v7597_v2  ;;  %v7638_v2 = vld [vmem:[%s10121_s6 + $0x334] ss:$12 sps:$4 sm:$0xff]  }
 0x20c   : > { %6536 = vmatpush3.bf16.msra.mxu0 %v7598_v40  ;;  %v7639_v40 = vld [vmem:[%s10121_s6 + $0x338] ss:$12 sps:$4 sm:$0xff]  }
 0x20d   : > { %4206 = vmatpush2.bf16.msra.mxu1 %v7595_v44  ;;  %6537 = vmatprep.subr.bf16.mxu0 %v7599_v50  ;;  %v7642_v44 = vld [vmem:[%s10121_s6 + $0x31c] ss:$12 sps:$4 sm:$0xff]   ;;  %v7640_v50 = vld [vmem:[%s10121_s6 + $0x318] ss:$12 sps:$4 sm:$0xff]  }
 0x20e   : > { %4207 = vmatprep.subr.bf16.mxu1 %v7602_v59  ;;  %v7643_v59 = vld [vmem:[%s10121_s6 + $0x320] ss:$12 sps:$4 sm:$0xff]  }
 0x210   : > { %6538 = vmatpush3.bf16.msra.mxu0 %v7603_v38  ;;  %v7646_v38 = vld [vmem:[%s10121_s6 + $0x304] ss:$12 sps:$4 sm:$0xff]  }
 0x211   : > { %4208 = vmatpush2.bf16.msra.mxu1 %v7600_v62  ;;  %6539 = vmatprep.subr.bf16.mxu0 %v7604_v3  ;;  %v7644_v62 = vld [vmem:[%s10121_s6 + $0x300] ss:$12 sps:$4 sm:$0xff]   ;;  %v7647_v3 = vld [vmem:[%s10121_s6 + $0x308] ss:$12 sps:$4 sm:$0xff]  }
 0x212   : > { %4209 = vmatprep.subr.bf16.mxu1 %v7607_v6  ;;  %v7648_v6 = vld [vmem:[%s10121_s6 + $0x2f0] ss:$12 sps:$4 sm:$0xff]  }
 0x214   : > { %6540 = vmatpush3.bf16.msra.mxu0 %v7608_v51  ;;  %v7649_v51 = vld [vmem:[%s10121_s6 + $0x230] ss:$12 sps:$4 sm:$0xff]  }
 0x215   : > { %4210 = vmatpush2.bf16.msra.mxu1 %v7605_v63  ;;  %6541 = vmatprep.subr.bf16.mxu0 %v7609_v8  ;;  %v7650_v63 = vld [vmem:[%s10121_s6 + $0x2d8] ss:$12 sps:$4 sm:$0xff]  }
 0x216   : > { %4211 = vmatprep.subr.bf16.mxu1 %v7612_v11  ;;  %v4538_v8 = vld [vmem:[%s10120_s5 + $0x138] sm:$0xff] }
 0x217   : > { %v7651_v11 = vld [vmem:[%s10121_s6 + $0x218] ss:$12 sps:$4 sm:$0xff]  }
 0x218   : > { %6542 = vmatpush3.bf16.msra.mxu0 %v7613_v15  ;;  %v7652_v15 = vld [vmem:[%s10121_s6 + $0x2c0] ss:$12 sps:$4 sm:$0xff]  }
 0x219   : > { %4212 = vmatpush2.bf16.msra.mxu1 %v7610_v20  ;;  %6543 = vmatprep.subr.bf16.mxu0 %v7614_v21  ;;  %v4537_v20 = vld [vmem:[%s10120_s5 + $0x130] sm:$0xff] }
 0x21a   : > { %4287 = vmatprep.subr.bf16.mxu1 %v7617_v26  ;;  %v7654_v21 = vld [vmem:[%s10121_s6 + $0x2a8] ss:$12 sps:$4 sm:$0xff]   ;;  %v4535_v26 = vld [vmem:[%s10120_s5 + $0x120] sm:$0xff] }
 0x21c   : > { %4214 = vmatmul.mubr.bf16.vlgmr.msra.gmra.mxu1 %v8775_v43  ;;  %6544 = vmatpush3.bf16.msra.mxu0 %v7618_v27  ;;  %v7655_v27 = vld [vmem:[%s10121_s6 + $0x1e8] ss:$12 sps:$4 sm:$0xff]  }
 0x21d   : > { %4223 = vmatprep.mubr.bf16.mxu1 %v8798_v18  ;;  %4288 = vmatpush1.bf16.msra.mxu1 %v7615_v28  ;;  %v4534_v28 = vld [vmem:[%s10120_s5 + $0x118] sm:$0xff] }
 0x21e   : > { %6861 = vmatprep.subr.bf16.mxu0 %v7619_v30  ;;  %4289 = vmatprep.subr.bf16.mxu1 %v7622_v34  ;;  %v4532_v34 = vld [vmem:[%s10120_s5 + $0x108] sm:$0xff] }
 0x21f   : > { %4373 = vmatmul.mubr.bf16.vlgmr.msra.gmra.mxu0 %v8775_v43  ;;  %v7628_v43 = vld [vmem:[%s10121_s6 + $0x360] ss:$12 sps:$4 sm:$0xff]  }
 0x220   : > { %4380 = vmatprep.mubr.bf16.mxu0 %v8798_v18  ;;  %6862 = vmatpush3.bf16.msra.mxu0 %v7619_v30  ;;  %v7631_v18 = vld [vmem:[%s10121_s6 + $0x368] ss:$12 sps:$4 sm:$0xff]   ;;  %v7656_v30 = vld [vmem:[%s10121_s6 + $0x290] ss:$12 sps:$4 sm:$0xff]  }
 0x221   : > { %4290 = vmatpush1.bf16.msra.mxu1 %v7620_v36  ;;  %6863 = vmatprep.subr.bf16.mxu0 %v7623_v37  ;;  %v7658_v36 = vld [vmem:[%s10121_s6 + $0x278] ss:$12 sps:$4 sm:$0xff]  }
 0x222   : > { %4291 = vmatprep.subr.bf16.mxu1 %v7626_v55  ;;  %v7659_v55 = vld [vmem:[%s10121_s6 + $0x1b8] ss:$12 sps:$4 sm:$0xff]  }
 0x224   : > { %4224 = vmatmul.mubr.bf16.gmra.mxu1 %v8805_v22  ;;  %6864 = vmatpush3.bf16.msra.mxu0 %v7623_v37  ;;  %v4531_v37 = vld [vmem:[%s10120_s5 + $0x100] sm:$0xff] }
 0x225   : > { %4292 = vmatpush1.bf16.msra.mxu1 %v7624_v41  ;;  %6865 = vmatprep.subr.bf16.mxu0 %v7627_v42  ;;  %v7660_v41 = vld [vmem:[%s10121_s6 + $0x260] ss:$12 sps:$4 sm:$0xff]  }
 0x226   : > { %4293 = vmatprep.subr.bf16.mxu1 %v7630_v46  ;;  %4319 = vmatprep.mubr.bf16.mxu1 %v7768_v39  ;;  %v7662_v46 = vld [vmem:[%s10121_s6 + $0x248] ss:$12 sps:$4 sm:$0xff]  }
 0x227   : > { %4381 = vmatmul.mubr.bf16.gmra.mxu0 %v8805_v22  ;;  %v7636_v22 = vld [vmem:[%s10121_s6 + $0x330] ss:$12 sps:$4 sm:$0xff]  }
 0x228   : > { %6866 = vmatpush3.bf16.msra.mxu0 %v7627_v42  ;;  %6877 = vmatprep.mubr.bf16.mxu0 %v8972_v5  ;;  %v7661_v42 = vld [vmem:[%s10121_s6 + $0x1a0] ss:$12 sps:$4 sm:$0xff]  }
 0x229   : > { %4294 = vmatpush1.bf16.msra.mxu1 %v7628_v43  ;;  %6867 = vmatprep.subr.bf16.mxu0 %v7631_v18  ;;  %v7663_v43 = vld [vmem:[%s10121_s6 + $0x188] ss:$12 sps:$4 sm:$0xff]  }
 0x22a   : > { %4295 = vmatprep.subr.bf16.mxu1 %v7634_v47  ;;  %v4514_v47 = vld [vmem:[%s10120_s5 + $0x78] sm:$0xff] }
 0x22c   : > { %6868 = vmatpush3.bf16.msra.mxu0 %v7631_v18  ;;  %v4530_v18 = vld [vmem:[%s10120_s5 + $0xf8] sm:$0xff] }
 0x22d   : > { %4296 = vmatpush1.bf16.msra.mxu1 %v7632_v52  ;;  %6869 = vmatprep.subr.bf16.mxu0 %v7635_v35  ;;  %v4529_v52 = vld [vmem:[%s10120_s5 + $0xf0] sm:$0xff] }
 0x22e   : > { %4297 = vmatprep.subr.bf16.mxu1 %v7638_v2  ;;  %v4528_v2 = vld [vmem:[%s10120_s5 + $0xe8] sm:$0xff] }
 0x230   : > { %6870 = vmatpush3.bf16.msra.mxu0 %v7635_v35  ;;  %v4513_v35 = vld [vmem:[%s10120_s5 + $0x70] sm:$0xff] }
 0x231   : > { %4298 = vmatpush1.bf16.msra.mxu1 %v7636_v22  ;;  %6871 = vmatprep.subr.bf16.mxu0 %v7639_v40  ;;  %v9451_v22 = vpop.f32.mrf.mxu1 }
 0x232   : > { %4299 = vmatprep.subr.bf16.mxu1 %v7642_v44  ;;  %v4527_v44 = vld [vmem:[%s10120_s5 + $0xe0] sm:$0xff] }
 0x234   : > { %6872 = vmatpush3.bf16.msra.mxu0 %v7639_v40 }
 0x235   : > { %4300 = vmatpush1.bf16.msra.mxu1 %v7640_v50  ;;  %6873 = vmatprep.subr.bf16.mxu0 %v7643_v59  ;;  %v4526_v50 = vld [vmem:[%s10120_s5 + $0xd8] sm:$0xff] }
 0x236   : > { %4301 = vmatprep.subr.bf16.mxu1 %v7646_v38 }
 0x238   : > { %6874 = vmatpush3.bf16.msra.mxu0 %v7643_v59  ;;  %v9467_v59 = vpop.f32.mrf.mxu1 }
 0x239   : > { %4302 = vmatpush1.bf16.msra.mxu1 %v7644_v62  ;;  %6875 = vmatprep.subr.bf16.mxu0 %v7647_v3  ;;  %v4510_v62 = vld [vmem:[%s10120_s5 + $0x58] sm:$0xff] }
 0x23a   : > { %6557 = vmatprep.subr.bf16.mxu1 %v7648_v6  ;;  %v4509_v6 = vld [vmem:[%s10120_s5 + $0x50] sm:$0xff] }
 0x23c   : > { %4320 = vmatmul.mubr.bf16.vlgmr.msra.gmra.mxu1 %v8972_v5  ;;  %6876 = vmatpush3.bf16.msra.mxu0 %v7647_v3  ;;  %v4536_v5 = vld [vmem:[%s10120_s5 + $0x128] sm:$0xff]  ;;  %v4525_v3 = vld [vmem:[%s10120_s5 + $0xd0] sm:$0xff] }
 0x23d   : > { %6558 = vmatpush3.bf16.msra.mxu1 %v7649_v51  ;;  %4329 = vmatprep.mubr.bf16.mxu1 %v7768_v39  ;;  %v7653_v39 = vld [vmem:[%s10121_s6 + $0x200] ss:$12 sps:$4 sm:$0xff]  }
 0x23e   : > { %6559 = vmatprep.subr.bf16.mxu1 %v7650_v63  ;;  %6881 = vmatprep.subr.mxu0 %v4538_v8  ;;  %v4524_v51 = vld [vmem:[%s10120_s5 + $0xc8] sm:$0xff]  ;;  %v9484_v63 = vpop.f32.mrf.mxu1 }
 0x23f   : > { %6878 = vmatmul.mubr.bf16.vlgmr.msra.gmra.mxu0 %v8988_v17  ;;  %v9453_v40 = vpop.f32.mrf.mxu0 }
 0x240   : > { %6882 = vmatpush3.msra.mxu0 %v4538_v8 }
 0x241   : > { %6560 = vmatpush3.bf16.msra.mxu1 %v7651_v11  ;;  %6883 = vmatprep.subr.mxu0 %v4537_v20  ;;  %v9469_v38 = vpop.f32.mrf.mxu0  ;;  %v4508_v11 = vld [vmem:[%s10120_s5 + $0x48] sm:$0xff] }
 0x242   : > { %6561 = vmatprep.subr.bf16.mxu1 %v7652_v15  ;;  %6884 = vmatpush3.msra.mxu0 %v4537_v20  ;;  %v4507_v15 = vld [vmem:[%s10120_s5 + $0x40] sm:$0xff]  ;;  %v4522_v20 = vld [vmem:[%s10120_s5 + $0xb8] sm:$0xff] }
 0x243   : > { %6885 = vmatprep.subr.mxu0 %v4536_v5  ;;  %v9486_v8 = vpop.f32.mrf.mxu0 }
 0x244   : > { %4330 = vmatmul.mubr.bf16.gmra.mxu1 %v8988_v17  ;;  %6886 = vmatpush3.msra.mxu0 %v4536_v5  ;;  %v4533_v17 = vld [vmem:[%s10120_s5 + $0x110] sm:$0xff]  ;;  %v3086_v5 = vpop.f32.mrf.mxu1 }
 0x245   : > { %6562 = vmatpush3.bf16.msra.mxu1 %v7653_v39  ;;  %4421 = vmatprep.mubr.bf16.mxu1 %v8860_v61  ;;  %v7657_v61 = vld [vmem:[%s10121_s6 + $0x1d0] ss:$12 sps:$4 sm:$0xff]   ;;  %v3139_v39 = vpop.f32.mrf.mxu0 }
 0x246   : > { %6563 = vmatprep.subr.bf16.mxu1 %v7654_v21  ;;  %6887 = vmatprep.subr.mxu0 %v4535_v26  ;;  %v4506_v21 = vld [vmem:[%s10120_s5 + $0x38] sm:$0xff] }
 0x247   : > { %6888 = vmatpush3.msra.mxu0 %v4535_v26  ;;  %v4521_v26 = vld [vmem:[%s10120_s5 + $0xb0] sm:$0xff] }
 0x248   : > { %6889 = vmatprep.subr.mxu0 %v4534_v28 }
 0x249   : > { %6564 = vmatpush3.bf16.msra.mxu1 %v7655_v27  ;;  %6890 = vmatpush3.msra.mxu0 %v4534_v28  ;;  %v4505_v27 = vld [vmem:[%s10120_s5 + $0x30] sm:$0xff]  ;;  %v4520_v28 = vld [vmem:[%s10120_s5 + $0xa8] sm:$0xff] }
 0x24a   : > { %6565 = vmatprep.subr.bf16.mxu1 %v7656_v30  ;;  %6891 = vmatprep.subr.mxu0 %v4533_v17  ;;  %v3090_v30 = vpop.f32.mrf.mxu1 }
 0x24b   : > { %6892 = vmatpush3.msra.mxu0 %v4533_v17  ;;  %v3143_v17 = vpop.f32.mrf.mxu0 }
 0x24c   : > { %6893 = vmatprep.subr.mxu0 %v4532_v34 }
 0x24d   : > { %6566 = vmatpush3.bf16.msra.mxu1 %v7657_v61  ;;  %6894 = vmatpush3.msra.mxu0 %v4532_v34  ;;  %v4504_v61 = vld [vmem:[%s10120_s5 + $0x28] sm:$0xff]  ;;  %v4519_v34 = vld [vmem:[%s10120_s5 + $0xa0] sm:$0xff] }
 0x24e   : > { %6567 = vmatprep.subr.bf16.mxu1 %v7658_v36  ;;  %6895 = vmatprep.subr.mxu0 %v4531_v37  ;;  %v4503_v36 = vld [vmem:[%s10120_s5 + $0x20] sm:$0xff] }
 0x24f   : > { %6896 = vmatpush3.msra.mxu0 %v4531_v37  ;;  %v4518_v37 = vld [vmem:[%s10120_s5 + $0x98] sm:$0xff] }
 0x251   : > { %6568 = vmatpush3.bf16.msra.mxu1 %v7659_v55  ;;  %v3092_v55 = vpop.f32.mrf.mxu1 }
 0x252   : > { %6569 = vmatprep.subr.bf16.mxu1 %v7660_v41  ;;  %v3145_v41 = vpop.f32.mrf.mxu0 }
 0x255   : > { %6570 = vmatpush3.bf16.msra.mxu1 %v7661_v42  ;;  %v4502_v42 = vld [vmem:[%s10120_s5 + $0x18] sm:$0xff] }
 0x256   : > { %6571 = vmatprep.subr.bf16.mxu1 %v7662_v46  ;;  %v9530_v46 = vld [vmem:[%s10119_s4] sm:$0x7] }
 0x259   : > { %6572 = vmatpush3.bf16.msra.mxu1 %v7663_v43  ;;  %v4517_v43 = vld [vmem:[%s10120_s5 + $0x90] sm:$0xff] }
 0x25a   : > { %6595 = vmatprep.subr.mxu1 %v4530_v18  ;;  %v4501_v18 = vld [vmem:[%s10120_s5 + $0x10] sm:$0xff] }
 0x25c   : > { %4422 = vmatmul.mubr.bf16.vlgmr.msra.gmra.mxu1 %v8867_v4  ;;  %v4512_v4 = vld [vmem:[%s10120_s5 + $0x68] sm:$0xff] }
 0x25d   : > { %4429 = vmatprep.mubr.bf16.mxu1 %v8894_v25  ;;  %6596 = vmatpush3.msra.mxu1 %v4514_v47  ;;  %v4511_v25 = vld [vmem:[%s10120_s5 + $0x60] sm:$0xff]  ;;  %v4516_v47 = vld [vmem:[%s10120_s5 + $0x88] sm:$0xff] }
 0x25e   : > { %6597 = vmatprep.subr.mxu1 %v4529_v52  ;;  %v2394_v52 = vrot.slane %v9530_v46, %v8738_v0 }
 0x25f   : > { %6598 = vmatpush3.msra.mxu1 %v4513_v35  ;;  %v3094_v35 = vpop.f32.mrf.mxu1 }
 0x260   : > { %6599 = vmatprep.subr.mxu1 %v4528_v2  ;;  %v3147_v2 = vpop.f32.mrf.mxu0 }
 0x261   : > { %6600 = vmatpush3.msra.mxu1 %v4512_v4  ;;  %v4500_v4 = vld [vmem:[%s10120_s5 + $0x8] sm:$0xff] }
 0x262   : > { %6601 = vmatprep.subr.mxu1 %v4527_v44  ;;  %v2398_v44 = vrot.slane %v9530_v46, %v8741_v1 }
 0x263   : > { %6602 = vmatpush3.msra.mxu1 %v4511_v25  ;;  %v4515_v25 = vld [vmem:[%s10120_s5 + $0x80] sm:$0xff] }
 0x264   : > { %4430 = vmatmul.mubr.bf16.gmra.mxu1 %v8890_v24  ;;  %6603 = vmatprep.subr.mxu1 %v4526_v50  ;;  %v4523_v24 = vld [vmem:[%s10120_s5 + $0xc0] sm:$0xff] }
 0x265   : > { %6604 = vmatpush3.msra.mxu1 %v4510_v62  ;;  %v4499_v50 = vld [vmem:[%s10120_s5] sm:$0xff]  ;;  %v4753_v62 = vld [vmem:[%s10123_s8 + $0xf8] sm:$0xff] }
 0x266   : > { %6605 = vmatprep.subr.mxu1 %v4525_v3  ;;  %v3081_v3 = vadd.f32 %v9451_v22, %v2394_v52 }
 0x267   : > { %6606 = vmatpush3.msra.mxu1 %v4509_v6  ;;  %v3096_v6 = vpop.f32.mrf.mxu1 }
 0x268   : > { %6607 = vmatprep.subr.mxu1 %v4524_v51  ;;  %v3149_v51 = vpop.f32.mrf.mxu0 }
 0x269   : > { %6608 = vmatpush3.msra.mxu1 %v4508_v11  ;;  %v3083_v11 = vadd.f32 %v9467_v59, %v2398_v44 }
 0x26a   : > { %6609 = vmatprep.subr.mxu1 %v4523_v24  ;;  %v3134_v24 = vadd.f32 %v9453_v40, %v3081_v3  ;;  %v3091_v40 = vadd.f32 %v3090_v30, %v2394_v52  ;;  %v4736_v30 = vld [vmem:[%s10123_s8 + $0x70] sm:$0xff]  ;;  %v3095_v3 = vadd.f32 %v3094_v35, %v2394_v52  ;;  %v4734_v35 = vld [vmem:[%s10123_s8 + $0x60] sm:$0xff] }
 0x26b   : > { %6610 = vmatpush3.msra.mxu1 %v4507_v15  ;;  %v9560_v15 = vpop.f32.mrf.mxu0 }
 0x26c   : > { %6611 = vmatprep.subr.mxu1 %v4522_v20 }
 0x26d   : > { %6612 = vmatpush3.msra.mxu1 %v4506_v21  ;;  %v3136_v21 = vadd.f32 %v9469_v38, %v3083_v11  ;;  %v4737_v38 = vld [vmem:[%s10123_s8 + $0x78] sm:$0xff] }
 0x26e   : > { %6613 = vmatprep.subr.mxu1 %v4521_v26  ;;  %v3085_v26 = vadd.f32 %v9484_v63, %v2394_v52  ;;  %v3093_v63 = vadd.f32 %v3092_v55, %v2398_v44  ;;  %v4751_v55 = vld [vmem:[%s10123_s8 + $0xe8] sm:$0xff] }
 0x26f   : > { %6614 = vmatpush3.msra.mxu1 %v4505_v27 }
 0x270   : > { %6615 = vmatprep.subr.mxu1 %v4520_v28 }
 0x271   : > { %6616 = vmatpush3.msra.mxu1 %v4504_v61  ;;  %v3087_v61 = vadd.f32 %v3086_v5, %v2398_v44  ;;  %v3144_v5 = vadd.f32 %v3143_v17, %v3091_v40  ;;  %v4735_v17 = vld [vmem:[%s10123_s8 + $0x68] sm:$0xff]  ;;  %v4732_v40 = vld [vmem:[%s10123_s8 + $0x50] sm:$0xff] }
 0x272   : > { %6617 = vmatprep.subr.mxu1 %v4519_v34  ;;  %v3138_v34 = vadd.f32 %v9486_v8, %v3085_v26  ;;  %v4752_v8 = vld [vmem:[%s10123_s8 + $0xf0] sm:$0xff] }
 0x273   : > { %6618 = vmatpush3.msra.mxu1 %v4503_v36  ;;  %v9565_v36 = vpop.f32.mrf.mxu0 }
 0x274   : > { %6619 = vmatprep.subr.mxu1 %v4518_v37  ;;  %v3140_v37 = vadd.f32 %v3139_v39, %v3087_v61 }
 0x275   : > { %6620 = vmatpush3.msra.mxu1 %v4502_v42 }
 0x276   : > { %6621 = vmatprep.subr.mxu1 %v4517_v43 }
 0x277   : > { %6622 = vmatpush3.msra.mxu1 %v4501_v18 }
 0x278   : > { %6623 = vmatprep.subr.mxu1 %v4516_v47 }
 0x279   : > { %6624 = vmatpush3.msra.mxu1 %v4500_v4 }
 0x27a   : > { %6625 = vmatprep.subr.mxu1 %v4515_v25  ;;  %v9573_v25 = vpop.f32.mrf.mxu0 }
 0x27b   : > { %6626 = vmatpush3.msra.mxu1 %v4499_v50  ;;  %v3146_v50 = vadd.f32 %v3145_v41, %v3093_v63  ;;  %v4750_v41 = vld [vmem:[%s10123_s8 + $0xe0] sm:$0xff] }
 0x27c   : > { %v3186_v20 = vpop.f32.mrf.mxu1  ;;  %6651 = vmatprep.subr.mxu1 %v4753_v62  ;;  %v4746_v63 = vld [vmem:[%s10123_s8 + $0xc0] sm:$0xff] }
 0x27d   : > { %v3187_v27 = vadd.f32 %v3186_v20, %v3134_v24 }
 0x27e   : > { %v3188_v28 = vpop.f32.mrf.mxu1 }
 0x27f   : > { %v3189_v22 = vadd.f32 %v3188_v28, %v3136_v21  ;;  %v3352_v43 = vmax.f32 %v3187_v27, 0.0  ;;  %v3097_v21 = vadd.f32 %v3096_v6, %v2398_v44  ;;  %v3148_v27 = vadd.f32 %v3147_v2, %v3095_v3  ;;  %v9587_v28 = vpop.f32.mrf.mxu0  ;;  %v4749_v44 = vld [vmem:[%s10123_s8 + $0xd8] sm:$0xff]  ;;  %v4743_v3 = vld [vmem:[%s10123_s8 + $0xa8] sm:$0xff] }
 0x280   : > { %v3190_v59 = vpop.f32.mrf.mxu1  ;;  %v4733_v2 = vld [vmem:[%s10123_s8 + $0x58] sm:$0xff] }
 0x281   : > { %v3353_v42 = vmax.f32 %v3189_v22, 0.0  ;;  %v3191_v18 = vadd.f32 %v3190_v59, %v3138_v34  ;;  %v3150_v61 = vadd.f32 %v3149_v51, %v3097_v21  ;;  %v4748_v51 = vld [vmem:[%s10123_s8 + $0xd0] sm:$0xff]  ;;  %v4741_v21 = vld [vmem:[%s10123_s8 + $0x98] sm:$0xff] }
 0x282   : > { %v3192_v47 = vpop.f32.mrf.mxu1 }
 0x283   : > { %v3193_v4 = vadd.f32 %v3192_v47, %v3140_v37  ;;  %4616 = vmatprep.mubr.f32.mxu1 %v3353_v42  ;;  %v3355_v11 = vmax.f32 %v3191_v18, 0.0  ;;  %v9601_v42 = vpop.f32.mrf.mxu0  ;;  %v4747_v18 = vld [vmem:[%s10123_s8 + $0xc8] sm:$0xff] }
 0x284   : > { %v3196_v39 = vpop.f32.mrf.mxu1  ;;  %4617 = vmatmul.mubr.f32.vlgmr.msra.gmra.mxu1 %v3352_v43 }
 0x285   : > { %v3356_v62 = vmax.f32 %v3193_v4, 0.0  ;;  %6652 = vmatpush3.msra.mxu1 %v4737_v38  ;;  %v3197_v24 = vadd.f32 %v3196_v39, %v3144_v5  ;;  %v4731_v38 = vld [vmem:[%s10123_s8 + $0x48] sm:$0xff]  ;;  %v6486_v4 = vpop.f32.mrf.mxu0  ;;  %v9621_v5 = vld [vmem:[%s10123_s8 + $0x138] sm:$0xff] }
 0x286   : > { %v3198_v20 = vpop.f32.mrf.mxu1  ;;  %6653 = vmatprep.subr.mxu1 %v4752_v8  ;;  %v4730_v8 = vld [vmem:[%s10123_s8 + $0x40] sm:$0xff]  ;;  %v4745_v39 = vld [vmem:[%s10123_s8 + $0xb8] sm:$0xff]  ;;  %6903 = vmatprep.subr.mxu0 %v9621_v5 }
 0x287   : > { %v3199_v26 = vadd.f32 %v3198_v20, %v3146_v50  ;;  %4621 = vmatprep.mubr.f32.mxu1 %v3356_v62  ;;  %6654 = vmatpush3.msra.mxu1 %v4736_v30  ;;  %v3358_v6 = vmax.f32 %v3197_v24, 0.0  ;;  %v4729_v30 = vld [vmem:[%s10123_s8 + $0x38] sm:$0xff]  ;;  %v4744_v50 = vld [vmem:[%s10123_s8 + $0xb0] sm:$0xff]  ;;  %v6488_v62 = vpop.f32.mrf.mxu0  ;;  %v4742_v24 = vld [vmem:[%s10123_s8 + $0xa0] sm:$0xff] }
 0x288   : > { %v3200_v52 = vpop.f32.mrf.mxu1  ;;  %4622 = vmatmul.mubr.f32.gmra.mxu1 %v3355_v11  ;;  %6655 = vmatprep.subr.mxu1 %v4751_v55  ;;  %v4728_v55 = vld [vmem:[%s10123_s8 + $0x30] sm:$0xff]  ;;  %v4727_v11 = vld [vmem:[%s10123_s8 + $0x28] sm:$0xff] }
 0x289   : > { %v3359_v22 = vmax.f32 %v3199_v26, 0.0  ;;  %6656 = vmatpush3.msra.mxu1 %v4735_v17  ;;  %v3201_v34 = vadd.f32 %v3200_v52, %v3148_v27  ;;  %v6489_v20 = vpop.f32.mrf.mxu0  ;;  %v4726_v17 = vld [vmem:[%s10123_s8 + $0x20] sm:$0xff]  ;;  %v2402_v27 = vrot.slane %v9530_v46, %v8844_v16  ;;  %v6481_v52 = vadd.f32 %v9565_v36, %v9560_v15  ;;  %v4723_v15 = vld [vmem:[%s10123_s8 + $0x8] sm:$0xff] }
 0x28a   : > { %v3202_v59 = vpop.f32.mrf.mxu1  ;;  %6657 = vmatprep.subr.mxu1 %v4750_v41  ;;  %v4725_v41 = vld [vmem:[%s10123_s8 + $0x18] sm:$0xff] }
 0x28b   : > { %v3203_v37 = vadd.f32 %v3202_v59, %v3150_v61  ;;  %4626 = vmatprep.mubr.f32.mxu1 %v3359_v22  ;;  %6658 = vmatpush3.msra.mxu1 %v4734_v35  ;;  %v3361_v47 = vmax.f32 %v3201_v34, 0.0  ;;  %v6859_v26 = vpop.f32.mrf.mxu0  ;;  %v4740_v35 = vld [vmem:[%s10123_s8 + $0x90] sm:$0xff]  ;;  %v3240_v36 = vadd.f32 %v6481_v52, %v2402_v27  ;;  %v6484_v34 = vadd.f32 %v9587_v28, %v9573_v25 }
 0x28c   : > { %4627 = vmatmul.mubr.f32.gmra.mxu1 %v3358_v6  ;;  %6659 = vmatprep.subr.mxu1 %v4749_v44  ;;  %v4724_v22 = vld [vmem:[%s10123_s8 + $0x10] sm:$0xff]  ;;  %v4739_v44 = vld [vmem:[%s10123_s8 + $0x88] sm:$0xff]  ;;  %v6487_v25 = vadd.f32 %v6486_v4, %v9601_v42 }
 0x28d   : > { %v3362_v43 = vmax.f32 %v3203_v37, 0.0  ;;  %6660 = vmatpush3.msra.mxu1 %v4733_v2  ;;  %v3337_v46 = vpop.f32.mrf.mxu0  ;;  %v4738_v2 = vld [vmem:[%s10123_s8 + $0x80] sm:$0xff]  ;;  %v4760_v42 = vld [vmem:[%s10123_s8 + $0x130] sm:$0xff] }
 0x28e   : > { %6661 = vmatprep.subr.mxu1 %v4748_v51  ;;  %v4722_v51 = vld [vmem:[%s10123_s8] sm:$0xff] }
 0x28f   : > { %4631 = vmatprep.mubr.f32.mxu1 %v3362_v43  ;;  %6662 = vmatpush3.msra.mxu1 %v4732_v40  ;;  %v6860_v43 = vpop.f32.mrf.mxu0 }
 0x290   : > { %4632 = vmatmul.mubr.f32.gmra.mxu1 %v3361_v47  ;;  %6663 = vmatprep.subr.mxu1 %v4747_v18  ;;  %v3243_v47 = vadd.f32 %v6484_v34, %v2402_v27 }
 0x291   : > { %6664 = vmatpush3.msra.mxu1 %v4731_v38 }
 0x292   : > { %6665 = vmatprep.subr.mxu1 %v4746_v63 }
 0x293   : > { %6666 = vmatpush3.msra.mxu1 %v4730_v8 }
 0x294   : > { %6667 = vmatprep.subr.mxu1 %v4745_v39 }
 0x295   : > { %6668 = vmatpush3.msra.mxu1 %v4729_v30  ;;  %v3340_v30 = vpop.f32.mrf.mxu0 }
 0x296   : > { %6669 = vmatprep.subr.mxu1 %v4744_v50 }
 0x297   : > { %6670 = vmatpush3.msra.mxu1 %v4728_v55  ;;  %v3248_v55 = vadd.f32 %v6487_v25, %v2402_v27  ;;  %v9708_v25 = vld [vmem:[%s10122_s7] sm:$0x7] }
 0x298   : > { %6671 = vmatprep.subr.mxu1 %v4743_v3  ;;  %v6490_v3 = vadd.f32 %v6489_v20, %v6488_v62  ;;  %v4759_v62 = vld [vmem:[%s10123_s8 + $0x128] sm:$0xff] }
 0x299   : > { %6672 = vmatpush3.msra.mxu1 %v4727_v11 }
 0x29a   : > { %6673 = vmatprep.subr.mxu1 %v4742_v24  ;;  %v3251_v4 = vadd.f32 %v6490_v3, %v2402_v27  ;;  %v4756_v27 = vld [vmem:[%s10123_s8 + $0x110] sm:$0xff] }
 0x29b   : > { %6674 = vmatpush3.msra.mxu1 %v4726_v17 }
 0x29c   : > { %v6507_v61 = vpop.f32.mrf.mxu1  ;;  %6675 = vmatprep.subr.mxu1 %v4741_v21 }
 0x29d   : > { %6676 = vmatpush3.msra.mxu1 %v4725_v41 }
 0x29e   : > { %v6508_v6 = vpop.f32.mrf.mxu1  ;;  %6677 = vmatprep.subr.mxu1 %v4740_v35 }
 0x29f   : > { %v6509_v59 = vadd.f32 %v6508_v6, %v6507_v61  ;;  %6678 = vmatpush3.msra.mxu1 %v4724_v22  ;;  %v4755_v6 = vld [vmem:[%s10123_s8 + $0x108] sm:$0xff] }
 0x2a0   : > { %v6510_v37 = vpop.f32.mrf.mxu1  ;;  %6679 = vmatprep.subr.mxu1 %v4739_v44  ;;  %v4758_v44 = vld [vmem:[%s10123_s8 + $0x120] sm:$0xff] }
 0x2a1   : > { %v3289_v40 = vadd.f32 %v6509_v59, %v3240_v36  ;;  %6680 = vmatpush3.msra.mxu1 %v4723_v15  ;;  %v4754_v15 = vld [vmem:[%s10123_s8 + $0x100] sm:$0xff] }
 0x2a2   : > { %v6511_v18 = vpop.f32.mrf.mxu1  ;;  %6681 = vmatprep.subr.mxu1 %v4738_v2 }
 0x2a3   : > { %v3338_v28 = vadd.f32 %v3337_v46, %v3289_v40  ;;  %v6512_v38 = vadd.f32 %v6511_v18, %v6510_v37  ;;  %6682 = vmatpush3.msra.mxu1 %v4722_v51 }
 0x2a4   : > { %v6513_v63 = vpop.f32.mrf.mxu1 }
 0x2a5   : > { %v3354_v8 = vmax.f32 %v3338_v28, 0.0  ;;  %v3292_v39 = vadd.f32 %v6512_v38, %v3243_v47 }
 0x2a6   : > { %v6514_v50 = vpop.f32.mrf.mxu1 }
 0x2a7   : > { %v3341_v11 = vadd.f32 %v3340_v30, %v3292_v39  ;;  %v6515_v24 = vadd.f32 %v6514_v50, %v6513_v63  ;;  %6897 = vmatprep.mubr.msk.f32.mxu0 %vm4539_vm0, %v3354_v8  ;;  %v3529_v63 = vrot.slane %v9708_v25, %v8738_v0  ;;  %v3533_v8 = vrot.slane %v9708_v25, %v8741_v1 }
 0x2a8   : > { %v6516_v17 = vpop.f32.mrf.mxu1 }
 0x2a9   : > { %v3357_v21 = vmax.f32 %v3341_v11, 0.0  ;;  %v3297_v41 = vadd.f32 %v6515_v24, %v3248_v55 }
 0x2aa   : > { %v6517_v52 = vpop.f32.mrf.mxu1 }
 0x2ab   : > { %v3346_v35 = vadd.f32 %v6859_v26, %v3297_v41  ;;  %v6518_v61 = vadd.f32 %v6517_v52, %v6516_v17  ;;  %6898 = vmatmul.mubr.msk.f32.vlgmr.msra.gmra.mxu0 %vm4539_vm0, %v3357_v21 }
 0x2ac   : > { %6904 = vmatpush3.msra.mxu0 %v9621_v5  ;;  %v4757_v5 = vld [vmem:[%s10123_s8 + $0x118] sm:$0xff] }
 0x2ad   : > { %v3360_v20 = vmax.f32 %v3346_v35, 0.0  ;;  %v3300_v22 = vadd.f32 %v6518_v61, %v3251_v4  ;;  %6905 = vmatprep.subr.mxu0 %v4760_v42 }
 0x2ae   : > { %6906 = vmatpush3.msra.mxu0 %v4760_v42 }
 0x2af   : > { %v3349_v46 = vadd.f32 %v6860_v43, %v3300_v22  ;;  %6900 = vmatprep.mubr.msk.f32.mxu0 %vm4539_vm0, %v3360_v20  ;;  %6907 = vmatprep.subr.mxu0 %v4759_v62 }
 0x2b0   : > { %6908 = vmatpush3.msra.mxu0 %v4759_v62 }
 0x2b1   : > { %v3363_v26 = vmax.f32 %v3349_v46, 0.0  ;;  %6909 = vmatprep.subr.mxu0 %v4758_v44 }
 0x2b2   : > { %6910 = vmatpush3.msra.mxu0 %v4758_v44 }
 0x2b3   : > { %6901 = vmatmul.mubr.msk.f32.gmra.mxu0 %vm4539_vm0, %v3363_v26  ;;  %6911 = vmatprep.subr.mxu0 %v4757_v5 }
 0x2b4   : > { %6912 = vmatpush3.msra.mxu0 %v4757_v5 }
 0x2b5   : > { %6913 = vmatprep.subr.mxu0 %v4756_v27 }
 0x2b6   : > { %6914 = vmatpush3.msra.mxu0 %v4756_v27 }
 0x2b7   : > { %6915 = vmatprep.subr.mxu0 %v4755_v6 }
 0x2b8   : > { %6916 = vmatpush3.msra.mxu0 %v4755_v6 }
 0x2b9   : > { %6917 = vmatprep.subr.mxu0 %v4754_v15 }
 0x2ba   : > { %6918 = vmatpush3.msra.mxu0 %v4754_v15 }
 0x2bf   : > { %v4268_v36 = vpop.f32.mrf.mxu0 }
 0x2c1   : > { %v4270_v59 = vpop.f32.mrf.mxu0 }
 0x2c3   : > { %v4272_v37 = vpop.f32.mrf.mxu0 }
 0x2c5   : > { %v4274_v40 = vpop.f32.mrf.mxu0 }
 0x2c7   : > { %v4278_v18 = vpop.f32.mrf.mxu0 }
 0x2c9   : > { %v4280_v28 = vpop.f32.mrf.mxu0 }
 0x2cb   : > { %v4282_v39 = vpop.f32.mrf.mxu0 }
 0x2cd   : > { %v4284_v3 = vpop.f32.mrf.mxu0 }
 0x2dc   : > { %v4215_v34 = vpop.f32.mrf.mxu1 }
 0x2dd   : > { %v4216_v50 = vadd.f32 %v4215_v34, %v3529_v63 }
 0x2de   : > { %v4217_v2 = vpop.f32.mrf.mxu1 }
 0x2df   : > { %v4218_v55 = vadd.f32 %v4217_v2, %v3533_v8  ;;  %v6545_v24 = vpop.f32.mrf.mxu0  ;;  %v4269_v21 = vadd.f32 %v4268_v36, %v4216_v50 }
 0x2e0   : > { %v4219_v51 = vpop.f32.mrf.mxu1 }
 0x2e1   : > { %v4220_v17 = vadd.f32 %v4219_v51, %v3529_v63  ;;  %v4271_v42 = vadd.f32 %v4270_v59, %v4218_v55  ;;  %v6546_v62 = vpop.f32.mrf.mxu0 }
 0x2e2   : > { %v4221_v43 = vpop.f32.mrf.mxu1 }
 0x2e3   : > { %v4222_v52 = vadd.f32 %v4221_v43, %v3533_v8  ;;  %v4273_v20 = vadd.f32 %v4272_v37, %v4220_v17  ;;  %v6548_v15 = vpop.f32.mrf.mxu0 }
 0x2e4   : > { %v4225_v47 = vpop.f32.mrf.mxu1 }
 0x2e5   : > { %v4226_v0 = vadd.f32 %v4225_v47, %v3529_v63  ;;  %v4275_v46 = vadd.f32 %v4274_v40, %v4222_v52 }
 0x2e6   : > { %v4227_v38 = vpop.f32.mrf.mxu1 }
 0x2e7   : > { %v4228_v1 = vadd.f32 %v4227_v38, %v3533_v8  ;;  %v4279_v34 = vadd.f32 %v4278_v18, %v4226_v0  ;;  %v6549_v38 = vpop.f32.mrf.mxu0  ;;  %v6547_v0 = vadd.f32 %v6546_v62, %v6545_v24 }
 0x2e8   : > { %v4229_v30 = vpop.f32.mrf.mxu1 }
 0x2e9   : > { %v4230_v36 = vadd.f32 %v4229_v30, %v3529_v63  ;;  %v4281_v43 = vadd.f32 %v4280_v28, %v4228_v1  ;;  %v6551_v30 = vpop.f32.mrf.mxu0 }
 0x2ea   : > { %v4231_v11 = vpop.f32.mrf.mxu1 }
 0x2eb   : > { %v4232_v59 = vadd.f32 %v4231_v11, %v3533_v8  ;;  %v4283_v40 = vadd.f32 %v4282_v39, %v4230_v36  ;;  %v6552_v11 = vpop.f32.mrf.mxu0  ;;  %v3537_v39 = vrot.slane %v9708_v25, %v8844_v16 }
 0x2ed   : > { %v4375_v1 = vadd.f32 %v6547_v0, %v3537_v39 }
 0x2fc   : > { %v4321_v41 = vpop.f32.mrf.mxu1 }
 0x2fd   : > { %v4322_v4 = vadd.f32 %v4321_v41, %v4269_v21  ;;  %v4285_v41 = vadd.f32 %v4284_v3, %v4232_v59 }
 0x2fe   : > { %v4323_v35 = vpop.f32.mrf.mxu1 }
 0x2ff   : > { %v4324_v61 = vadd.f32 %v4323_v35, %v4271_v42  ;;  %v4487_v5 = vmax.f32 %v4322_v4, 0.0  ;;  %v6554_v4 = vpop.f32.mrf.mxu0 }
 0x300   : > { %v4325_v22 = vpop.f32.mrf.mxu1 }
 0x301   : > { %v4488_v44 = vmax.f32 %v4324_v61, 0.0  ;;  %v4326_v26 = vadd.f32 %v4325_v22, %v4273_v20  ;;  %v6555_v35 = vpop.f32.mrf.mxu0 }
 0x302   : > { %v4327_v27 = vpop.f32.mrf.mxu1  ;;  %v6556_v24 = vadd.f32 %v6555_v35, %v6554_v4 }
 0x303   : > { %v4328_v6 = vadd.f32 %v4327_v27, %v4275_v46  ;;  %4838 = vmatprep.mubr.f32.mxu1 %v4488_v44  ;;  %v4490_v50 = vmax.f32 %v4326_v26, 0.0  ;;  %v6879_v61 = vpop.f32.mrf.mxu0  ;;  %v6550_v44 = vadd.f32 %v6549_v38, %v6548_v15 }
 0x304   : > { %v4331_v2 = vpop.f32.mrf.mxu1  ;;  %4839 = vmatmul.mubr.f32.vlgmr.msra.gmra.mxu1 %v4487_v5 }
 0x305   : > { %v4491_v51 = vmax.f32 %v4328_v6, 0.0  ;;  %v4332_v47 = vadd.f32 %v4331_v2, %v4279_v34  ;;  %v4472_v20 = vpop.f32.mrf.mxu0  ;;  %v4378_v36 = vadd.f32 %v6550_v44, %v3537_v39  ;;  %v6553_v34 = vadd.f32 %v6552_v11, %v6551_v30 }
 0x306   : > { %v4333_v37 = vpop.f32.mrf.mxu1 }
 0x307   : > { %v4334_v55 = vadd.f32 %v4333_v37, %v4281_v43  ;;  %4843 = vmatprep.mubr.f32.mxu1 %v4491_v51  ;;  %v4493_v52 = vmax.f32 %v4332_v47, 0.0  ;;  %v6880_v27 = vpop.f32.mrf.mxu0  ;;  %v4383_v25 = vadd.f32 %v6553_v34, %v3537_v39 }
 0x308   : > { %v4335_v17 = vpop.f32.mrf.mxu1  ;;  %4844 = vmatmul.mubr.f32.gmra.mxu1 %v4490_v50 }
 0x309   : > { %v4494_v21 = vmax.f32 %v4334_v55, 0.0  ;;  %v4336_v42 = vadd.f32 %v4335_v17, %v4283_v40  ;;  %v4475_v47 = vpop.f32.mrf.mxu0  ;;  %v4386_v17 = vadd.f32 %v6556_v24, %v3537_v39 }
 0x30a   : > { %v4337_v63 = vpop.f32.mrf.mxu1 }
 0x30b   : > { %v4338_v18 = vadd.f32 %v4337_v63, %v4285_v41  ;;  %4848 = vmatprep.mubr.f32.mxu1 %v4494_v21  ;;  %v4496_v28 = vmax.f32 %v4336_v42, 0.0 }
 0x30c   : > { %4849 = vmatmul.mubr.f32.gmra.mxu1 %v4493_v52 }
 0x30d   : > { %v4497_v8 = vmax.f32 %v4338_v18, 0.0 }
 0x30f   : > { %4853 = vmatprep.mubr.f32.mxu1 %v4497_v8 }
 0x310   : > { %4854 = vmatmul.mubr.f32.gmra.mxu1 %v4496_v28 }
 0x31c   : > { %v6573_v3 = vpop.f32.mrf.mxu1 }
 0x31e   : > { %v6574_v22 = vpop.f32.mrf.mxu1 }
 0x31f   : > { %v6575_v46 = vadd.f32 %v6574_v22, %v6573_v3 }
 0x320   : > { %v6576_v5 = vpop.f32.mrf.mxu1 }
 0x321   : > { %v4424_v26 = vadd.f32 %v6575_v46, %v4375_v1 }
 0x322   : > { %v6577_v6 = vpop.f32.mrf.mxu1 }
 0x323   : > { %v4473_v2 = vadd.f32 %v4472_v20, %v4424_v26  ;;  %v6578_v59 = vadd.f32 %v6577_v6, %v6576_v5  ;;  %v4947_v26 = vadd.s32 8, %v8729_v32 }
 0x324   : > { %v6579_v51 = vpop.f32.mrf.mxu1 }
 0x325   : > { %v4489_v43 = vmax.f32 %v4473_v2, 0.0  ;;  %v4427_v50 = vadd.f32 %v6578_v59, %v4378_v36 }
 0x326   : > { %v6580_v16 = vpop.f32.mrf.mxu1 }
 0x327   : > { %v4476_v62 = vadd.f32 %v4475_v47, %v4427_v50  ;;  %v6581_v37 = vadd.f32 %v6580_v16, %v6579_v51  ;;  %6919 = vmatprep.mubr.msk.f32.mxu0 %vm4539_vm0, %v4489_v43 }
 0x328   : > { %v6582_v15 = vpop.f32.mrf.mxu1 }
 0x329   : > { %v4492_v55 = vmax.f32 %v4476_v62, 0.0  ;;  %v4432_v38 = vadd.f32 %v6581_v37, %v4383_v25  ;;  %v4948_v25 = vadd.s32 16, %v8729_v32 }
 0x32a   : > { %v6583_v40 = vpop.f32.mrf.mxu1 }
 0x32b   : > { %v4481_v21 = vadd.f32 %v6879_v61, %v4432_v38  ;;  %v6584_v41 = vadd.f32 %v6583_v40, %v6582_v15  ;;  %6920 = vmatmul.mubr.msk.f32.vlgmr.msra.gmra.mxu0 %vm4539_vm0, %v4492_v55  ;;  %v4949_v55 = vadd.s32 24, %v8729_v32 }
 0x32d   : > { %v4495_v52 = vmax.f32 %v4481_v21, 0.0  ;;  %v4435_v42 = vadd.f32 %v6584_v41, %v4386_v17 }
 0x32f   : > { %v4484_v63 = vadd.f32 %v6880_v27, %v4435_v42  ;;  %6922 = vmatprep.mubr.msk.f32.mxu0 %vm4539_vm0, %v4495_v52  ;;  %v4950_v27 = vstv %s6359_s27 }
 0x330   : > { %v4951_v34 = vadd.s32 %v4950_v27, %v8729_v32  ;;  %v4952_v59 = vadd.s32 %v4950_v27, %v4947_v26  ;;  %v4953_v41 = vadd.s32 %v4950_v27, %v4948_v25 }
 0x331   : > { %v4498_v18 = vmax.f32 %v4484_v63, 0.0  ;;  %v4954_v63 = vadd.s32 %v4950_v27, %v4949_v55  ;;  %v5024_v55 = vld [vmem:[%s10124_s9 + $0x40] sm:$0x3] }
 0x332   : > { %vm4955_vm1 = vcmp.lt.s32.totalorder %v4951_v34, 40  ;;  %vm4956_vm2 = vcmp.lt.s32.totalorder %v4952_v59, 40  ;;  %vm4957_vm4 = vcmp.lt.s32.totalorder %v4953_v41, 40  ;;  %6366 = vmatprep.subr.msk.mxu1 %vm5038_vm6, %v5024_v55  ;;  %v5016_v41 = vld [vmem:[%s10124_s9] sm:$0xff] }
 0x333   : > { %6923 = vmatmul.mubr.msk.f32.gmra.mxu0 %vm4539_vm0, %v4498_v18  ;;  %vm4958_vm5 = vcmp.lt.s32.totalorder %v4954_v63, 40  ;;  %v5025_v63 = vld [vmem:[%s10124_s9 + $0x48] sm:$0x3]  ;;  %v5381_v55 = vld [vmem:[%s10125_s10 + $0x160] sm:$0xff] }
 0x344   : > { %v6627_v30 = vpop.f32.mrf.mxu1 }
 0x346   : > { %v6628_v8 = vpop.f32.mrf.mxu1 }
 0x347   : > { %v6629_v51 = vadd.f32 %v6628_v8, %v6627_v30 }
 0x348   : > { %v6630_v28 = vpop.f32.mrf.mxu1 }
 0x34a   : > { %v6631_v11 = vpop.f32.mrf.mxu1 }
 0x34b   : > { %v6632_v24 = vadd.f32 %v6631_v11, %v6630_v28 }
 0x34c   : > { %v6633_v4 = vpop.f32.mrf.mxu1 }
 0x34e   : > { %v6634_v35 = vpop.f32.mrf.mxu1 }
 0x34f   : > { %v6635_v18 = vadd.f32 %v6634_v35, %v6633_v4 }
 0x350   : > { %v6636_v61 = vpop.f32.mrf.mxu1 }
 0x352   : > { %v6637_v39 = vpop.f32.mrf.mxu1 }
 0x36b   : > { %v6899_v22 = vpop.f32.mrf.mxu0 }
 0x36c   : > { %v4709_v38 = vadd.f32 %v6899_v22, %v6632_v24 }
 0x36d   : > { %v4703_v44 = vpop.f32.mrf.mxu0 }
 0x36e   : > { %v4704_v62 = vadd.f32 %v6629_v51, %v4703_v44 }
 0x373   : > { %v6902_v46 = vpop.f32.mrf.mxu0 }
 0x375   : > { %v4713_v6 = vpop.f32.mrf.mxu0 }
 0x376   : > { %v4714_v32 = vadd.f32 %v6635_v18, %v4713_v6  ;;  %v5368_v18 = vld [vmem:[%s10125_s10 + $0xf8] sm:$0xff] }
 0x3c4   : > { %v6683_v0 = vpop.f32.mrf.mxu1 }
 0x3c6   : > { %v6684_v3 = vpop.f32.mrf.mxu1 }
 0x3c7   : > { %v6685_v43 = vadd.f32 %v6684_v3, %v6683_v0  ;;  %v6638_v0 = vadd.f32 %v6637_v39, %v6636_v61 }
 0x3c8   : > { %v6686_v20 = vpop.f32.mrf.mxu1 }
 0x3c9   : > { %v4719_v22 = vadd.f32 %v6902_v46, %v6638_v0 }
 0x3ca   : > { %v6687_v1 = vpop.f32.mrf.mxu1 }
 0x3cb   : > { %v6688_v50 = vadd.f32 %v6687_v1, %v6686_v20 }
 0x3cc   : > { %v6689_v5 = vpop.f32.mrf.mxu1 }
 0x3ce   : > { %v6690_v36 = vpop.f32.mrf.mxu1 }
 0x3cf   : > { %v6691_v30 = vadd.f32 %v6690_v36, %v6689_v5 }
 0x3d0   : > { %v6692_v47 = vpop.f32.mrf.mxu1 }
 0x3d2   : > { %v6693_v17 = vpop.f32.mrf.mxu1 }
 0x3d3   : > { %v6694_v8 = vadd.f32 %v6693_v17, %v6692_v47  ;;  %v5017_v17 = vld [vmem:[%s10124_s9 + $0x8] sm:$0xff] }
 0x3eb   : > { %v6921_v2 = vpop.f32.mrf.mxu0 }
 0x3ec   : > { %v4931_v37 = vadd.f32 %v6921_v2, %v6688_v50 }
 0x3ed   : > { %v4925_v16 = vpop.f32.mrf.mxu0 }
 0x3ee   : > { %v4926_v15 = vadd.f32 %v6685_v43, %v4925_v16  ;;  %v4968_v52 = vsel %vm4956_vm2, %v4709_v38, %v4931_v37  ;;  %v5021_v38 = vld [vmem:[%s10124_s9 + $0x28] sm:$0x3] }
 0x3ef   : > { %v4975_v11 = vsel %vm4971_vm3, %v4968_v52, -inf }
 0x3f0   : > { %v4967_v40 = vsel %vm4955_vm1, %v4704_v62, %v4926_v15  ;;  %v5022_v15 = vld [vmem:[%s10124_s9 + $0x30] sm:$0x3] }
 0x3f1   : > { %v4972_v21 = vsel %vm4971_vm3, %v4967_v40, -inf  ;;  %6360 = vmatprep.subr.msk.mxu0 %vm5038_vm6, %v5022_v15  ;;  %v5361_v15 = vld [vmem:[%s10125_s10 + $0xc0] sm:$0xff] }
 0x3f2   : > { %4973 = vmax.xlane.f32.xlu0 %v4972_v21  ;;  %6361 = vmatpush1.msk.msra.mxu0 %vm5038_vm6, %v5021_v38  ;;  %v5019_v21 = vld [vmem:[%s10124_s9 + $0x18] sm:$0xff]  ;;  %v5345_v38 = vld [vmem:[%s10125_s10 + $0x40] sm:$0xff] }
 0x3f3   : > { %v6924_v42 = vpop.f32.mrf.mxu0  ;;  %5084 = vmatprep.subr.mxu0 %v5017_v17  ;;  %v5360_v17 = vld [vmem:[%s10125_s10 + $0xb8] sm:$0xff] }
 0x3f4   : > { %v4941_v3 = vadd.f32 %v6924_v42, %v6694_v8  ;;  %5085 = vmatpush1.msra.mxu0 %v5016_v41  ;;  %v7769_v42 = vmov 0.0   ;;  %v5344_v41 = vld [vmem:[%s10125_s10 + $0x38] sm:$0xff] }
 0x3f5   : > { %v4935_v28 = vpop.f32.mrf.mxu0  ;;  %5118 = vmatprep.mubr.f32.mxu0 %v7769_v42  ;;  %5207 = vmatprep.mubr.f32.mxu1 %v7769_v42 }
 0x3f6   : > { %v4936_v20 = vadd.f32 %v6691_v30, %v4935_v28  ;;  %4976 = vmax.xlane.f32.xlu0 %v4975_v11  ;;  %v4970_v26 = vsel %vm4958_vm5, %v4719_v22, %v4941_v3  ;;  %6925 = vmatprep.subr.msk.mxu0 %vm5038_vm6, %v5025_v63  ;;  %v5352_v3 = vld [vmem:[%s10125_s10 + $0x78] sm:$0xff]  ;;  %v5367_v22 = vld [vmem:[%s10125_s10 + $0xf0] sm:$0xff] }
 0x3f7   : > { %v4981_v4 = vsel %vm4971_vm3, %v4970_v26, -inf }
 0x3f8   : > { %v4969_v1 = vsel %vm4957_vm4, %v4714_v32, %v4936_v20  ;;  %v5020_v20 = vld [vmem:[%s10124_s9 + $0x20] sm:$0xff] }
 0x3f9   : > { %v4978_v44 = vsel %vm4971_vm3, %v4969_v1, -inf }
 0x3fa   : > { %4979 = vmax.xlane.f32.xlu1 %v4978_v44 }
 0x3fe   : > { %4982 = vmax.xlane.f32.xlu1 %v4981_v4  ;;  %v5400_v4 = vld [vmem:[%s10125_s10 + $0x1f8] sm:$0xff] }
 0x47b   : > { %v4974_v35 = vpop.xlane.xlu0 %4973 }
 0x47c   : > { %v4984_v5 = vsub.f32 %v4967_v40, %v4974_v35  ;;  %v5023_v40 = vld [vmem:[%s10124_s9 + $0x38] sm:$0x3]  ;;  %v5366_v35 = vld [vmem:[%s10125_s10 + $0xe8] sm:$0xff] }
 0x47d   : > { %6367 = vmatpush1.msk.msra.mxu1 %vm5038_vm6, %v5023_v40  ;;  %v5396_v40 = vld [vmem:[%s10125_s10 + $0x1d8] sm:$0xff] }
 0x47e   : > { %v4988_v27 = vmul.f32 1.442695, %v4984_v5  ;;  %5173 = vmatprep.subr.mxu1 %v5019_v21  ;;  %v5380_v21 = vld [vmem:[%s10125_s10 + $0x158] sm:$0xff] }
 0x47f   : > { %v4977_v36 = vpop.xlane.xlu0 %4976 }
 0x480   : > { %7664 = vpow2.f32 %v4988_v27  ;;  %v4985_v61 = vsub.f32 %v4968_v52, %v4977_v36  ;;  %v5018_v52 = vld [vmem:[%s10124_s9 + $0x10] sm:$0xff]  ;;  %v5350_v36 = vld [vmem:[%s10125_s10 + $0x68] sm:$0xff] }
 0x481   : > { %5174 = vmatpush1.msra.mxu1 %v5018_v52  ;;  %v5395_v52 = vld [vmem:[%s10125_s10 + $0x1d0] sm:$0xff] }
 0x482   : > { %v4990_v39 = vmul.f32 1.442695, %v4985_v61  ;;  %6713 = vmatprep.subr.mxu1 %v5368_v18  ;;  %v5365_v61 = vld [vmem:[%s10125_s10 + $0xe0] sm:$0xff]  ;;  %v5343_v18 = vld [vmem:[%s10125_s10 + $0x30] sm:$0xff] }
 0x483   : > { %v4980_v6 = vpop.xlane.xlu1 %4979 }
 0x484   : > { %7666 = vpow2.f32 %v4990_v39  ;;  %v4986_v34 = vsub.f32 %v4969_v1, %v4980_v6 }
 0x486   : > { %v4992_v2 = vmul.f32 1.442695, %v4986_v34  ;;  %v5349_v34 = vld [vmem:[%s10125_s10 + $0x60] sm:$0xff] }
 0x487   : > { %v4983_v46 = vpop.xlane.xlu1 %4982 }
 0x488   : > { %7668 = vpow2.f32 %v4992_v2  ;;  %v4987_v59 = vsub.f32 %v4970_v26, %v4983_v46  ;;  %v5351_v26 = vld [vmem:[%s10125_s10 + $0x70] sm:$0xff]  ;;  %v5364_v2 = vld [vmem:[%s10125_s10 + $0xd8] sm:$0xff] }
 0x489   : > { %v5348_v46 = vld [vmem:[%s10125_s10 + $0x58] sm:$0xff] }
 0x48a   : > { %v4994_v51 = vmul.f32 1.442695, %v4987_v59  ;;  %v5363_v59 = vld [vmem:[%s10125_s10 + $0xd0] sm:$0xff] }
 0x48c   : > { %7670 = vpow2.f32 %v4994_v51  ;;  %v5384_v51 = vld [vmem:[%s10125_s10 + $0x178] sm:$0xff] }
 0x48d   : > { %v7665_v43 = vpop.eup %7664 }
 0x48e   : > { %v4996_v50 = vsel %vm4971_vm3, %v7665_v43, 0.0 }
 0x48f   : > { %4997 = vadd.xlane.f32.xlu0 %v4996_v50  ;;  %v5347_v50 = vld [vmem:[%s10125_s10 + $0x50] sm:$0xff] }
 0x491   : > { %v7667_v47 = vpop.eup %7666 }
 0x492   : > { %v4999_v16 = vsel %vm4971_vm3, %v7667_v47, 0.0 }
 0x493   : > { %5000 = vadd.xlane.f32.xlu1 %v4999_v16  ;;  %v5362_v16 = vld [vmem:[%s10125_s10 + $0xc8] sm:$0xff] }
 0x495   : > { %v7669_v25 = vpop.eup %7668 }
 0x496   : > { %v5002_v24 = vsel %vm4971_vm3, %v7669_v25, 0.0 }
 0x497   : > { %5003 = vadd.xlane.f32.xlu0 %v5002_v24  ;;  %v5382_v24 = vld [vmem:[%s10125_s10 + $0x168] sm:$0xff] }
 0x499   : > { %v9734_v62 = vpop.eup %7670 }
 0x49a   : > { %v5005_v37 = vsel %vm4971_vm3, %v9734_v62, 0.0 }
 0x49b   : > { %5006 = vadd.xlane.f32.xlu1 %v5005_v37  ;;  %v5397_v37 = vld [vmem:[%s10125_s10 + $0x1e0] sm:$0xff] }
 0x518   : > { %v4998_v30 = vpop.xlane.xlu0 %4997 }
 0x519   : > { %7672 = vrcp.f32 %v4998_v30  ;;  %v5394_v30 = vld [vmem:[%s10125_s10 + $0x1c8] sm:$0xff] }
 0x51c   : > { %v5001_v8 = vpop.xlane.xlu1 %5000 }
 0x51d   : > { %7674 = vrcp.f32 %v5001_v8  ;;  %v5358_v8 = vld [vmem:[%s10125_s10 + $0xa8] sm:$0xff] }
 0x520   : > { %v5004_v28 = vpop.xlane.xlu0 %5003 }
 0x521   : > { %7676 = vrcp.f32 %v5004_v28  ;;  %v5378_v28 = vld [vmem:[%s10125_s10 + $0x148] sm:$0xff] }
 0x524   : > { %v5007_v11 = vpop.xlane.xlu1 %5006 }
 0x525   : > { %7678 = vrcp.f32 %v5007_v11  ;;  %v5342_v11 = vld [vmem:[%s10125_s10 + $0x28] sm:$0xff] }
 0x526   : > { %v7673_v0 = vpop.eup %7672 }
 0x527   : > { %v5009_v32 = vmul.f32 %v7673_v0, %v7665_v43  ;;  %v5399_v43 = vld [vmem:[%s10125_s10 + $0x1f0] sm:$0xff]  ;;  %v5393_v0 = vld [vmem:[%s10125_s10 + $0x1c0] sm:$0xff] }
 0x529   : > { %6362 = vmatmul.mubr.msk.f32.vlgmr.msra.gmra.mxu0 %vm4971_vm3, %v5009_v32  ;;  %6368 = vmatmul.mubr.msk.f32.vlgmr.msra.gmra.mxu1 %vm4971_vm3, %v5009_v32 }
 0x52a   : > { %v7675_v1 = vpop.eup %7674  ;;  %5124 = vmatprep.mubr.f32.mxu0 %v7769_v42  ;;  %5213 = vmatprep.mubr.f32.mxu1 %v7769_v42 }
 0x52b   : > { %v5011_v44 = vmul.f32 %v7675_v1, %v7667_v47  ;;  %6926 = vmatpush3.msk.msra.mxu0 %vm5038_vm6, %v5025_v63  ;;  %6714 = vmatpush3.msra.mxu1 %v5352_v3  ;;  %v5383_v47 = vld [vmem:[%s10125_s10 + $0x170] sm:$0xff]  ;;  %v5377_v3 = vld [vmem:[%s10125_s10 + $0x140] sm:$0xff]  ;;  %v5356_v1 = vld [vmem:[%s10125_s10 + $0x98] sm:$0xff] }
 0x52c   : > { %6927 = vmatprep.subr.mxu0 %v5020_v20  ;;  %6715 = vmatprep.subr.mxu1 %v5367_v22  ;;  %v5379_v63 = vld [vmem:[%s10125_s10 + $0x150] sm:$0xff]  ;;  %v5392_v22 = vld [vmem:[%s10125_s10 + $0x1b8] sm:$0xff] }
 0x52d   : > { %6363 = vmatmul.mubr.msk.f32.gmra.mxu0 %vm4971_vm3, %v5011_v44  ;;  %6369 = vmatmul.mubr.msk.f32.gmra.mxu1 %vm4971_vm3, %v5011_v44 }
 0x52e   : > { %v7677_v5 = vpop.eup %7676  ;;  %5130 = vmatprep.mubr.f32.mxu0 %v7769_v42  ;;  %5219 = vmatprep.mubr.f32.mxu1 %v7769_v42 }
 0x52f   : > { %v5013_v27 = vmul.f32 %v7677_v5, %v7669_v25  ;;  %6928 = vmatpush3.msra.mxu0 %v5020_v20  ;;  %6716 = vmatpush3.msra.mxu1 %v5351_v26  ;;  %v5398_v25 = vld [vmem:[%s10125_s10 + $0x1e8] sm:$0xff]  ;;  %v5341_v20 = vld [vmem:[%s10125_s10 + $0x20] sm:$0xff]  ;;  %v5340_v26 = vld [vmem:[%s10125_s10 + $0x18] sm:$0xff] }
 0x530   : > { %6757 = vmatprep.subr.mxu0 %v5400_v4  ;;  %6717 = vmatprep.subr.mxu1 %v5366_v35  ;;  %v5391_v4 = vld [vmem:[%s10125_s10 + $0x1b0] sm:$0xff] }
 0x531   : > { %6364 = vmatmul.mubr.msk.f32.gmra.mxu0 %vm4971_vm3, %v5013_v27  ;;  %6370 = vmatmul.mubr.msk.f32.gmra.mxu1 %vm4971_vm3, %v5013_v27  ;;  %v5355_v35 = vld [vmem:[%s10125_s10 + $0x90] sm:$0xff] }
 0x532   : > { %v7679_v39 = vpop.eup %7678  ;;  %5136 = vmatprep.mubr.f32.mxu0 %v7769_v42  ;;  %5225 = vmatprep.mubr.f32.mxu1 %v7769_v42  ;;  %v5359_v42 = vld [vmem:[%s10125_s10 + $0xb0] sm:$0xff] }
 0x533   : > { %v5015_v6 = vmul.f32 %v7679_v39, %v9734_v62  ;;  %6718 = vmatpush3.msra.mxu1 %v5350_v36  ;;  %v5346_v62 = vld [vmem:[%s10125_s10 + $0x48] sm:$0xff]  ;;  %v5375_v5 = vld [vmem:[%s10125_s10 + $0x130] sm:$0xff]  ;;  %v5373_v39 = vld [vmem:[%s10125_s10 + $0x120] sm:$0xff] }
 0x534   : > { %6719 = vmatprep.subr.mxu1 %v5365_v61  ;;  %v5374_v36 = vld [vmem:[%s10125_s10 + $0x128] sm:$0xff]  ;;  %v5389_v61 = vld [vmem:[%s10125_s10 + $0x1a0] sm:$0xff] }
 0x535   : > { %6365 = vmatmul.mubr.msk.f32.gmra.mxu0 %vm4971_vm3, %v5015_v6  ;;  %6371 = vmatmul.mubr.msk.f32.gmra.mxu1 %vm4971_vm3, %v5015_v6 }
 0x536   : > { %6929 = vmatprep.mubr.msk.f32.mxu0 %vm4971_vm3, %v5009_v32  ;;  %6720 = vmatpush3.msra.mxu1 %v5349_v34  ;;  %v5357_v32 = vld [vmem:[%s10125_s10 + $0xa0] sm:$0xff]  ;;  %v5372_v34 = vld [vmem:[%s10125_s10 + $0x118] sm:$0xff] }
 0x537   : > { %6721 = vmatprep.subr.mxu1 %v5364_v2  ;;  %v5339_v2 = vld [vmem:[%s10125_s10 + $0x10] sm:$0xff] }
 0x538   : > { %6722 = vmatpush3.msra.mxu1 %v5348_v46  ;;  %v5387_v46 = vld [vmem:[%s10125_s10 + $0x190] sm:$0xff] }
 0x539   : > { %6930 = vmatmul.mubr.msk.f32.vlgmr.msra.gmra.mxu0 %vm4971_vm3, %v5011_v44  ;;  %6723 = vmatprep.subr.mxu1 %v5363_v59  ;;  %v5376_v44 = vld [vmem:[%s10125_s10 + $0x138] sm:$0xff]  ;;  %v5354_v59 = vld [vmem:[%s10125_s10 + $0x88] sm:$0xff] }
 0x53a   : > { %6932 = vmatprep.mubr.msk.f32.mxu0 %vm4971_vm3, %v5013_v27  ;;  %6758 = vmatpush3.msra.mxu0 %v5384_v51  ;;  %v5390_v27 = vld [vmem:[%s10125_s10 + $0x1a8] sm:$0xff]  ;;  %v5371_v51 = vld [vmem:[%s10125_s10 + $0x110] sm:$0xff] }
 0x53b   : > { %6759 = vmatprep.subr.mxu0 %v5399_v43  ;;  %6724 = vmatpush3.msra.mxu1 %v5347_v50  ;;  %v5338_v43 = vld [vmem:[%s10125_s10 + $0x8] sm:$0xff] }
 0x53c   : > { %6760 = vmatpush3.msra.mxu0 %v5383_v47  ;;  %6725 = vmatprep.subr.mxu1 %v5362_v16  ;;  %v5386_v50 = vld [vmem:[%s10125_s10 + $0x188] sm:$0xff]  ;;  %v5353_v47 = vld [vmem:[%s10125_s10 + $0x80] sm:$0xff] }
 0x53d   : > { %6933 = vmatmul.mubr.msk.f32.gmra.mxu0 %vm4971_vm3, %v5015_v6  ;;  %6761 = vmatprep.subr.mxu0 %v5398_v25  ;;  %v5388_v6 = vld [vmem:[%s10125_s10 + $0x198] sm:$0xff]  ;;  %v5370_v16 = vld [vmem:[%s10125_s10 + $0x108] sm:$0xff]  ;;  %v5337_v25 = vld [vmem:[%s10125_s10] sm:$0xff] }
 0x53e   : > { %6762 = vmatpush3.msra.mxu0 %v5382_v24  ;;  %6726 = vmatpush3.msra.mxu1 %v5346_v62  ;;  %v5385_v24 = vld [vmem:[%s10125_s10 + $0x180] sm:$0xff] }
 0x53f   : > { %6763 = vmatprep.subr.mxu0 %v5397_v37  ;;  %6727 = vmatprep.subr.mxu1 %v5361_v15  ;;  %v5369_v62 = vld [vmem:[%s10125_s10 + $0x100] sm:$0xff]  ;;  %v5416_v37 = vld [vmem:[%s10125_s10 + $0x278] sm:$0xff] }
 0x540   : > { %6764 = vmatpush3.msra.mxu0 %v5381_v55  ;;  %6728 = vmatpush3.msra.mxu1 %v5345_v38 }
 0x541   : > { %6765 = vmatprep.subr.mxu0 %v5396_v40  ;;  %6729 = vmatprep.subr.mxu1 %v5360_v17 }
 0x542   : > { %6766 = vmatpush3.msra.mxu0 %v5380_v21  ;;  %6730 = vmatpush3.msra.mxu1 %v5344_v41 }
 0x543   : > { %6767 = vmatprep.subr.mxu0 %v5395_v52  ;;  %6731 = vmatprep.subr.mxu1 %v5359_v42 }
 0x544   : > { %6768 = vmatpush3.msra.mxu0 %v5379_v63  ;;  %6732 = vmatpush3.msra.mxu1 %v5343_v18  ;;  %v5415_v18 = vld [vmem:[%s10125_s10 + $0x270] sm:$0xff] }
 0x545   : > { %6769 = vmatprep.subr.mxu0 %v5394_v30  ;;  %6733 = vmatprep.subr.mxu1 %v5358_v8 }
 0x546   : > { %6770 = vmatpush3.msra.mxu0 %v5378_v28  ;;  %6734 = vmatpush3.msra.mxu1 %v5342_v11 }
 0x547   : > { %6771 = vmatprep.subr.mxu0 %v5393_v0  ;;  %6735 = vmatprep.subr.mxu1 %v5357_v32 }
 0x548   : > { %6772 = vmatpush3.msra.mxu0 %v5377_v3  ;;  %6736 = vmatpush3.msra.mxu1 %v5341_v20 }
 0x549   : > { %6773 = vmatprep.subr.mxu0 %v5392_v22  ;;  %6737 = vmatprep.subr.mxu1 %v5356_v1 }
 0x54a   : > { %6774 = vmatpush3.msra.mxu0 %v5376_v44  ;;  %6738 = vmatpush3.msra.mxu1 %v5340_v26 }
 0x54b   : > { %6775 = vmatprep.subr.mxu0 %v5391_v4  ;;  %6739 = vmatprep.subr.mxu1 %v5355_v35 }
 0x54c   : > { %6776 = vmatpush3.msra.mxu0 %v5375_v5  ;;  %6740 = vmatpush3.msra.mxu1 %v5339_v2  ;;  %v5402_v2 = vld [vmem:[%s10125_s10 + $0x208] sm:$0xff] }
 0x54d   : > { %6777 = vmatprep.subr.mxu0 %v5390_v27  ;;  %6741 = vmatprep.subr.mxu1 %v5354_v59 }
 0x54e   : > { %6778 = vmatpush3.msra.mxu0 %v5374_v36  ;;  %6742 = vmatpush3.msra.mxu1 %v5338_v43 }
 0x54f   : > { %6779 = vmatprep.subr.mxu0 %v5389_v61  ;;  %6743 = vmatprep.subr.mxu1 %v5353_v47  ;;  %v5405_v61 = vld [vmem:[%s10125_s10 + $0x220] sm:$0xff] }
 0x550   : > { %6780 = vmatpush3.msra.mxu0 %v5373_v39  ;;  %6744 = vmatpush3.msra.mxu1 %v5337_v25  ;;  %v5404_v39 = vld [vmem:[%s10125_s10 + $0x218] sm:$0xff] }
 0x551   : > { %6781 = vmatprep.subr.mxu0 %v5388_v6  ;;  %6935 = vmatprep.subr.mxu1 %v5416_v37  ;;  %v5403_v6 = vld [vmem:[%s10125_s10 + $0x210] sm:$0xff] }
 0x552   : > { %6782 = vmatpush3.msra.mxu0 %v5372_v34 }
 0x553   : > { %6783 = vmatprep.subr.mxu0 %v5387_v46  ;;  %v5401_v46 = vld [vmem:[%s10125_s10 + $0x200] sm:$0xff] }
 0x554   : > { %6784 = vmatpush3.msra.mxu0 %v5371_v51 }
 0x555   : > { %6785 = vmatprep.subr.mxu0 %v5386_v50 }
 0x556   : > { %6786 = vmatpush3.msra.mxu0 %v5370_v16 }
 0x557   : > { %6787 = vmatprep.subr.mxu0 %v5385_v24 }
 0x558   : > { %6788 = vmatpush3.msra.mxu0 %v5369_v62 }
 0x5e9   : > { %v5120_v15 = vpop.f32.mrf.mxu0  ;;  %v5209_v55 = vpop.f32.mrf.mxu1 }
 0x5ea   : > { %v5317_v41 = vmul.f32 %v5120_v15, %v8764_v49  ;;  %v5319_v52 = vmul.f32 %v5209_v55, %v8856_v19  ;;  %v5414_v49 = vld [vmem:[%s10125_s10 + $0x268] sm:$0xff] }
 0x5eb   : > { %v5122_v38 = vpop.f32.mrf.mxu0  ;;  %v5211_v40 = vpop.f32.mrf.mxu1 }
 0x5ec   : > { %v5318_v17 = vmul.f32 %v5122_v38, %v8760_v31  ;;  %v5320_v21 = vmul.f32 %v5211_v40, %v8852_v54 }
 0x5ed   : > { %v5126_v42 = vpop.f32.mrf.mxu0  ;;  %v5215_v63 = vpop.f32.mrf.mxu1 }
 0x5ee   : > { %5481 = vmatprep.mubr.f32.mxu1 %v5318_v17  ;;  %5566 = vmatprep.mubr.f32.mxu0 %v5320_v21  ;;  %v5322_v11 = vmul.f32 %v5126_v42, %v8758_v29  ;;  %v5324_v0 = vmul.f32 %v5215_v63, %v8850_v48  ;;  %v5412_v48 = vld [vmem:[%s10125_s10 + $0x258] sm:$0xff] }
 0x5ef   : > { %v5128_v30 = vpop.f32.mrf.mxu0  ;;  %v5217_v8 = vpop.f32.mrf.mxu1  ;;  %5482 = vmatmul.mubr.f32.vlgmr.msra.gmra.mxu1 %v5317_v41  ;;  %5567 = vmatmul.mubr.f32.vlgmr.msra.gmra.mxu0 %v5319_v52 }
 0x5f0   : > { %v5323_v31 = vmul.f32 %v5128_v30, %v8762_v33  ;;  %v5325_v54 = vmul.f32 %v5217_v8, %v8854_v56  ;;  %6936 = vmatpush3.msra.mxu1 %v5416_v37  ;;  %v5413_v56 = vld [vmem:[%s10125_s10 + $0x260] sm:$0xff] }
 0x5f1   : > { %6937 = vmatprep.subr.mxu1 %v5415_v18  ;;  %v5132_v19 = vpop.f32.mrf.mxu0  ;;  %v5221_v28 = vpop.f32.mrf.mxu1 }
 0x5f2   : > { %6938 = vmatpush3.msra.mxu1 %v5415_v18  ;;  %5486 = vmatprep.mubr.f32.mxu1 %v5323_v31  ;;  %v5327_v1 = vmul.f32 %v5132_v19, %v8794_v14  ;;  %v5329_v44 = vmul.f32 %v5221_v28, %v8873_v10  ;;  %v5410_v10 = vld [vmem:[%s10125_s10 + $0x248] sm:$0xff] }
 0x5f3   : > { %5571 = vmatprep.mubr.f32.mxu0 %v5325_v54  ;;  %6939 = vmatprep.subr.mxu1 %v5414_v49  ;;  %v5134_v32 = vpop.f32.mrf.mxu0  ;;  %v5223_v33 = vpop.f32.mrf.mxu1 }
 0x5f4   : > { %v5328_v3 = vmul.f32 %v5134_v32, %v8790_v57  ;;  %v5330_v20 = vmul.f32 %v5223_v33, %v8876_v13  ;;  %5487 = vmatmul.mubr.f32.gmra.mxu1 %v5322_v11  ;;  %5572 = vmatmul.mubr.f32.gmra.mxu0 %v5324_v0  ;;  %v5411_v13 = vld [vmem:[%s10125_s10 + $0x250] sm:$0xff] }
 0x5f5   : > { %6940 = vmatpush3.msra.mxu1 %v5414_v49  ;;  %v5138_v29 = vpop.f32.mrf.mxu0  ;;  %v5227_v22 = vpop.f32.mrf.mxu1 }
 0x5f6   : > { %6941 = vmatprep.subr.mxu1 %v5413_v56  ;;  %5491 = vmatprep.mubr.f32.mxu1 %v5328_v3  ;;  %v5332_v5 = vmul.f32 %v5138_v29, %v8785_v53  ;;  %v5334_v27 = vmul.f32 %v5227_v22, %v8878_v9  ;;  %v5408_v53 = vld [vmem:[%s10125_s10 + $0x238] sm:$0xff]  ;;  %v5407_v9 = vld [vmem:[%s10125_s10 + $0x230] sm:$0xff] }
 0x5f7   : > { %6942 = vmatpush3.msra.mxu1 %v5413_v56  ;;  %5576 = vmatprep.mubr.f32.mxu0 %v5330_v20  ;;  %v5140_v57 = vpop.f32.mrf.mxu0  ;;  %v5229_v26 = vpop.f32.mrf.mxu1 }
 0x5f8   : > { %6943 = vmatprep.subr.mxu1 %v5412_v48  ;;  %v5333_v4 = vmul.f32 %v5140_v57, %v8792_v58  ;;  %v5335_v35 = vmul.f32 %v5229_v26, %v8886_v23  ;;  %5492 = vmatmul.mubr.f32.gmra.mxu1 %v5327_v1  ;;  %v5409_v58 = vld [vmem:[%s10125_s10 + $0x240] sm:$0xff] }
 0x5f9   : > { %5577 = vmatmul.mubr.f32.gmra.mxu0 %v5329_v44  ;;  %6944 = vmatpush3.msra.mxu1 %v5412_v48  ;;  %v6931_v14 = vpop.f32.mrf.mxu0 }
 0x5fa   : > { %6945 = vmatprep.subr.mxu1 %v5411_v13  ;;  %5496 = vmatprep.mubr.f32.mxu1 %v5333_v4  ;;  %v5326_v51 = vmul.f32 %v6931_v14, %v8963_v45 }
 0x5fb   : > { %6946 = vmatpush3.msra.mxu1 %v5411_v13  ;;  %5581 = vmatprep.mubr.f32.mxu0 %v5335_v35  ;;  %v5298_v36 = vpop.f32.mrf.mxu0 }
 0x5fc   : > { %6947 = vmatprep.subr.mxu1 %v5410_v10  ;;  %v5321_v23 = vmul.f32 %v5298_v36, %v8961_v7  ;;  %5497 = vmatmul.mubr.f32.gmra.mxu1 %v5332_v5  ;;  %v5406_v7 = vld [vmem:[%s10125_s10 + $0x228] sm:$0xff] }
 0x5fd   : > { %5582 = vmatmul.mubr.f32.gmra.mxu0 %v5334_v27  ;;  %6948 = vmatpush3.msra.mxu1 %v5410_v10  ;;  %v6934_v34 = vpop.f32.mrf.mxu0 }
 0x5fe   : > { %6949 = vmatprep.subr.mxu1 %v5409_v58  ;;  %6967 = vmatprep.mubr.f32.mxu1 %v5321_v23  ;;  %v5336_v50 = vmul.f32 %v6934_v34, %v8965_v60 }
 0x5ff   : > { %6950 = vmatpush3.msra.mxu1 %v5409_v58  ;;  %v5308_v59 = vpop.f32.mrf.mxu0 }
 0x600   : > { %6951 = vmatprep.subr.mxu1 %v5408_v53  ;;  %v5331_v43 = vmul.f32 %v5308_v59, %v8980_v12 }
 0x601   : > { %6952 = vmatpush3.msra.mxu1 %v5408_v53 }
 0x602   : > { %6953 = vmatprep.subr.mxu1 %v5407_v9 }
 0x603   : > { %6954 = vmatpush3.msra.mxu1 %v5407_v9 }
 0x604   : > { %6955 = vmatprep.subr.mxu1 %v5406_v7 }
 0x605   : > { %6956 = vmatpush3.msra.mxu1 %v5406_v7 }
 0x606   : > { %6957 = vmatprep.subr.mxu1 %v5405_v61 }
 0x607   : > { %6958 = vmatpush3.msra.mxu1 %v5405_v61 }
 0x608   : > { %6959 = vmatprep.subr.mxu1 %v5404_v39 }
 0x609   : > { %6960 = vmatpush3.msra.mxu1 %v5404_v39 }
 0x60a   : > { %6961 = vmatprep.subr.mxu1 %v5403_v6 }
 0x60b   : > { %6962 = vmatpush3.msra.mxu1 %v5403_v6 }
 0x60c   : > { %6963 = vmatprep.subr.mxu1 %v5402_v2 }
 0x60d   : > { %6964 = vmatpush3.msra.mxu1 %v5402_v2 }
 0x60e   : > { %6965 = vmatprep.subr.mxu1 %v5401_v46 }
 0x60f   : > { %6966 = vmatpush3.msra.mxu1 %v5401_v46 }
 0x610   : > { %6968 = vmatmul.mubr.f32.vlgmr.msra.gmra.mxu1 %v5326_v51 }
 0x611   : > { %6970 = vmatprep.mubr.f32.mxu1 %v5331_v43 }
 0x614   : > { %6971 = vmatmul.mubr.f32.gmra.mxu1 %v5336_v50 }
 0x6af   : > { %v6745_v47 = vpop.f32.mrf.mxu1  ;;  %v6789_v16 = vpop.f32.mrf.mxu0 }
 0x6b1   : > { %v6746_v25 = vpop.f32.mrf.mxu1  ;;  %v6790_v24 = vpop.f32.mrf.mxu0 }
 0x6b2   : > { %v6747_v63 = vadd.f32 %v6746_v25, %v6745_v47  ;;  %v6791_v18 = vadd.f32 %v6790_v24, %v6789_v16 }
 0x6b4   : > { %v6748_v62 = vpop.f32.mrf.mxu1  ;;  %v6792_v37 = vpop.f32.mrf.mxu0  ;;  %v5569_v11 = vadd.f32 %v6791_v18, %v6747_v63 }
 0x6b6   : > { %v6749_v15 = vpop.f32.mrf.mxu1  ;;  %v6793_v55 = vpop.f32.mrf.mxu0 }
 0x6b7   : > { %v6750_v41 = vadd.f32 %v6749_v15, %v6748_v62  ;;  %v6794_v52 = vadd.f32 %v6793_v55, %v6792_v37 }
 0x6b8   : > { %v6751_v38 = vpop.f32.mrf.mxu1 }
 0x6b9   : > { %v6795_v45 = vpop.f32.mrf.mxu0  ;;  %v5574_v31 = vadd.f32 %v6794_v52, %v6750_v41 }
 0x6ba   : > { %v6752_v40 = vpop.f32.mrf.mxu1 }
 0x6bb   : > { %v6796_v17 = vpop.f32.mrf.mxu0  ;;  %v6753_v49 = vadd.f32 %v6752_v40, %v6751_v38 }
 0x6bc   : > { %v6754_v12 = vpop.f32.mrf.mxu1  ;;  %v6797_v19 = vadd.f32 %v6796_v17, %v6795_v45 }
 0x6bd   : > { %v6798_v21 = vpop.f32.mrf.mxu0 }
 0x6be   : > { %v6755_v60 = vpop.f32.mrf.mxu1  ;;  %v5579_v20 = vadd.f32 %v6797_v19, %v6753_v49 }
 0x6bf   : > { %v6799_v42 = vpop.f32.mrf.mxu0  ;;  %v6756_v30 = vadd.f32 %v6755_v60, %v6754_v12 }
 0x6c0   : > { %v6800_v8 = vadd.f32 %v6799_v42, %v6798_v21 }
 0x6c2   : > { %v5584_v33 = vadd.f32 %v6800_v8, %v6756_v30 }
 0x6d0   : > { %v6969_v54 = vpop.f32.mrf.mxu1 }
 0x6d1   : > { %v5659_v28 = vadd.f32 %v6969_v54, %v5574_v31 }
 0x6d2   : > { %v5653_v0 = vpop.f32.mrf.mxu1 }
 0x6d3   : > { %5673 = vst.msk [vmem:[%s10048_s28 + $0x8] sm:$0xff] %vm4539_vm0, %v5659_v28  ;;  %v5654_v32 = vadd.f32 %v5653_v0, %v5569_v11 }
 0x6d4   : > { %v6972_v56 = vpop.f32.mrf.mxu1 }
 0x6d5   : > { %5672 = vst.msk [vmem:[%s10048_s28] sm:$0xff] %vm4539_vm0, %v5654_v32  ;;  %v5669_v3 = vadd.f32 %v6972_v56, %v5584_v33  ;;  %5682 = sbr.rel (!%p7855_p4) target bundleno = 1793 (0x701), region = 68 }
 0x6d6   : > { %v5663_v29 = vpop.f32.mrf.mxu1 }
 0x6d7   : > { %5675 = vst.msk [vmem:[%s10048_s28 + $0x18] sm:$0xff] %vm4539_vm0, %v5669_v3  ;;  %v5664_v22 = vadd.f32 %v5663_v29, %v5579_v20 }
 0x6d9   : > { %5674 = vst.msk [vmem:[%s10048_s28 + $0x10] sm:$0xff] %vm4539_vm0, %v5664_v22 }
 0x6da   : > { %s10135_s17 = smov (!%p5685_p8, %s5684_s17), 4 }
 0x6db   : > { %s6379_s14 = sshll.u32 %s10135_s17, 7 }
 0x6dc   : > { %p6382_p9 = scmp.eq.s32.totalorder %s6379_s14, 0 }
 0x6dd   : > { %s10072_s12 = sshrl.u32 (!%p6382_p9), %s10135_s17, 2 }
 0x6de   : > { %5693 = sbr.rel (%p6382_p9) target bundleno = 1793 (0x701), region = 72  ;;  %p6383_p10 = scmp.le.s32.totalorder (!%p6382_p9), %s10072_s12, 0 }
 0x6e3   : > { %5860 = sbr.rel (%p6383_p10) target bundleno = 1776 (0x6f0), region = 148  ;;  %s10128_s20 = smov (!%p6383_p10), %s10066_s26 }
 0x6e4   : > { %s10129_s25 = smov (!%p6383_p10), %s10048_s28  ;;  %s10081_s30 = smov (!%p6383_p10), 0  }
 0x6e5   : > { %s7748_s27 = smov (!%p6383_p10), 0  }
 0x6e8 LB: >> { %v5762_v48 = vld [vmem:[%s7742_s25] sm:$0xff]  ;;  %v5764_v1 = vld [vmem:[%s7742_s25 + $0x8] sm:$0xff]  ;;  %v5766_v44 = vld [vmem:[%s7742_s25 + $0x10] sm:$0xff]  ;;  %s5770_s13 = sadd.s32 1, %s7746_s30  ;;  %s5756_s27 = sadd.s32 1, %s7750_s27   ;;  %s7750_s27 = sphi %s7748_s27, %s5756_s27   ;;  %s7746_s30 = sphi %s10081_s30, %s10130_s30   ;;  %s7742_s25 = sphi %s10129_s25, %s5775_s25   ;;  %s7738_s20 = sphi %s10128_s20, %s5776_s20  }
 0x6e9   : >> { %5763 = vst [vmem:[%s7738_s20] sm:$0xff] %v5762_v48  ;;  %5765 = vst [vmem:[%s7738_s20 + $0x8] sm:$0xff] %v5764_v1  ;;  %v5768_v57 = vld [vmem:[%s7742_s25 + $0x18] sm:$0xff]  ;;  %p5771_p11 = scmp.ge.s32.totalorder %s5770_s13, %s10072_s12  ;;  %p5755_p12 = scmp.ge.s32.totalorder %s5756_s27, %s10072_s12 }
 0x6ea   : >> { %5767 = vst [vmem:[%s7738_s20 + $0x10] sm:$0xff] %v5766_v44  ;;  %5769 = vst [vmem:[%s7738_s20 + $0x18] sm:$0xff] %v5768_v57 }
 0x6eb   : >> { %s10137_s13 = smov (%p5771_p11, %s5770_s13), 0  ;;  %5758 = sbr.rel (!%p5755_p12) target bundleno = 1768 (0x6e8), region = 154 }
 0x6ec   : >> { %s6384_s15 = sshll.u32 %s10137_s13, 5  ;;  %s10130_s30 = smov %s10137_s13 }
 0x6ed   : >> { %s5775_s25 = scalar_lea.vmem %s10048_s28, %s6384_s15 [#allocation2]   ;;  %s5776_s20 = scalar_lea.vmem %s10066_s26, %s6384_s15  }
 0x6f0 PF: > { %s10097_s16 = sand.u32 3, %s10135_s17   ;;  %s6395_s19 = sshll.u32 %s10072_s12, 5 }
 0x6f1   : > { %s5781_s22 = scalar_lea.vmem %s10048_s28, %s6395_s19 [#allocation2]   ;;  %s5783_s29 = scalar_lea.vmem %s10066_s26, %s6395_s19  }
 0x6f2   : > { %p6389_p13 = scmp.le.s32.totalorder %s10097_s16, 0 }
 0x6f3   : > { %s7752_s23 = smov (!%p6389_p13), %s5783_s29   ;;  %s7756_s14 = smov (!%p6389_p13), %s5781_s22  }
 0x6f4   : > { %5874 = sbr.rel (%p6389_p13) target bundleno = 1793 (0x701), region = 159  ;;  %s7760_s30 = smov (!%p6389_p13), 0  }
 0x6f5   : > { %s7764_s15 = smov (!%p6389_p13), 0  }
 0x6f9 LB: >> { %v5793_v26 = vld [vmem:[%s7758_s14] sm:$0xff]  ;;  %s5795_s17 = sadd.s32 1, %s7762_s30  ;;  %s5787_s15 = sadd.s32 1, %s7766_s15   ;;  %s7766_s15 = sphi %s7764_s15, %s5787_s15   ;;  %s7762_s30 = sphi %s7760_s30, %s7761_s30   ;;  %s7758_s14 = sphi %s7756_s14, %s5800_s14   ;;  %s7754_s23 = sphi %s7752_s23, %s5801_s23  }
 0x6fa   : >> { %5794 = vst [vmem:[%s7754_s23] sm:$0xff] %v5793_v26  ;;  %p5796_p0 = scmp.ge.s32.totalorder %s5795_s17, %s10097_s16  ;;  %p5786_p1 = scmp.ge.s32.totalorder %s5787_s15, %s10097_s16 }
 0x6fc   : >> { %s10139_s17 = smov (%p5796_p0, %s5795_s17), 0  ;;  %5789 = sbr.rel (!%p5786_p1) target bundleno = 1785 (0x6f9), region = 165 }
 0x6fd   : >> { %s6390_s28 = sshll.u32 %s10139_s17, 3  ;;  %s7761_s30 = smov %s10139_s17  }
 0x6fe   : >> { %s5800_s14 = scalar_lea.vmem %s5781_s22, %s6390_s28 [#allocation2]   ;;  %s5801_s23 = scalar_lea.vmem %s5783_s29, %s6390_s28  }
 0x701 PF: > { %p18_p2 = scmp.ge.s32.totalorder %s7845_s21, 7   ;;  %s10131_s17 = smov %s7730_s18 }
 0x702   : > { %s10132_s18 = smov %s7853_s24  ;;  %s10133_s19 = smov %s7845_s21 }
 0x703   :  { %20 = sbr.rel (!%p18_p2) target bundleno = 2 (0x2), region = 176 }

</bundles_post_ra>
